<compile_context>
chip_gen: v6e
topology: v6e:2x2x1
jax: 0.10.0
libtpu: 0.0.40
codegen_flags: <defaults>
</compile_context>

<pallas_src>
import functools

import jax
import jax.numpy as jnp
import numpy as np
from jax.experimental import pallas as pl
from jax.experimental.pallas import tpu as pltpu

# Keep the Pallas kernels and the pure-JAX reference on the same (full f32) matmul path.
jax.config.update("jax_default_matmul_precision", "highest")


# ------------------------- kernel 1: fused projection matmul -------------------------

def _matmul_bias_kernel(x_ref, w_ref, b_ref, o_ref, *, n_tanh_cols):
    """o = x @ w + b ; columns [0, n_tanh_cols) additionally get tanh(2*.) applied."""
    y = (jnp.dot(x_ref[...], w_ref[...], preferred_element_type=jnp.float32)
         + b_ref[...])
    if n_tanh_cols > 0:
        col = jax.lax.broadcasted_iota(jnp.int32, y.shape, 1)
        y = jnp.where(col < n_tanh_cols, jnp.tanh(2.0 * y), y)
    o_ref[...] = y


def matmul_bias_pallas(x, w, b, *, n_tanh_cols=0, tm=None):
    """y = x @ w + b (f32, MXU); x: [N, Din], w: [Din, Dout], b: [Dout]."""
    N, Din = x.shape
    Dout = w.shape[1]
    if tm is None:
        tm = N
        if N % 16 == 0:
            tm = N // 2            # >= 2 parallel grid steps -> both v7x TensorCores
        tm = min(tm, 512)
        while N % tm:
            tm //= 2
    assert N % tm == 0 and tm % 8 == 0, "TODO(synk): pad + mask ragged N"
    b2 = b.reshape(1, Dout)
    kernel = functools.partial(_matmul_bias_kernel, n_tanh_cols=n_tanh_cols)
    return pl.pallas_call(
        kernel,
        out_shape=jax.ShapeDtypeStruct((N, Dout), jnp.float32),
        grid=(N // tm,),
        in_specs=[pl.BlockSpec((tm, Din), lambda i: (i, 0)),
                  pl.BlockSpec((Din, Dout), lambda i: (0, 0)),
                  pl.BlockSpec((1, Dout), lambda i: (0, 0))],
        out_specs=pl.BlockSpec((tm, Dout), lambda i: (i, 0)),
        compiler_params=pltpu.CompilerParams(
            dimension_semantics=("parallel",)),
    )(x, w, b2)


# --------------- kernel 2: attention + gate + fused final linear (all relations) ---------------

def _rel_attn_gate_kernel(src_f_ref, sa_ref, dst_ref, sd_ref, bo_ref, e8_ref,
                          wl_ref, bl_ref, o_ref, acc_ref, *, head):
    """Per (node-tile i, relation r) grid step; relation axis is a reduction (final linear).

    Blocks:
      src_f_ref : [1, tm, K, HD]  gathered w_liner(h) of source nodes
      sa_ref    : [1, tm, K, C]   gathered per-source scalars: cols 0..head-1 = attention
                                  src+edge halves per head, col head = te (gate edge part)
      dst_ref   : [1, tm, HD]     w_liner(h) of destination node
      sd_ref    : [1, tm, C]      per-destination attention halves (incl. attn bias)
      bo_ref    : [1, 1, HD]      gate beta for the `out` part
      e8_ref    : [C, HD]         0/1 head -> (head*hd) lane expansion matrix
      wl_ref    : [1, HD, HD]     this relation's slice of the final linear weight
      bl_ref    : [1, HD]         final linear bias
      o_ref     : [tm, HD]        layer output (written at the last relation)
      acc_ref   : [tm, HD] f32    VMEM accumulator over relations
    """
    r = pl.program_id(1)
    sf = src_f_ref[0]                                    # [tm, K, HD]
    sa = sa_ref[0]                                       # [tm, K, C]
    dsth = dst_ref[0]                                    # [tm, HD]
    sd = sd_ref[0]                                       # [tm, C]
    bo = bo_ref[0]                                       # [1, HD]
    e8 = e8_ref[...]                                     # [C, HD]
    wl = wl_ref[0]                                       # [HD, HD]

    tm, k_deg, HD = sf.shape

    # attention logits over the K incoming edges (padding columns >= head stay harmless)
    alpha = sa + sd[:, None, :]                          # [tm, K, C]
    alpha = jnp.where(alpha > 0, alpha, 0.01 * alpha)    # LeakyReLU(0.01)
    alpha = alpha - jnp.max(alpha, axis=1, keepdims=True)
    ex = jnp.exp(alpha)
    attn = ex / jnp.sum(ex, axis=1, keepdims=True)       # softmax over K

    # broadcast per-head attention over its hd lanes via a tiny 0/1 MXU matmul, aggregate
    attn_full = jnp.dot(attn.reshape(tm * k_deg, -1), e8,
                        preferred_element_type=jnp.float32).reshape(tm, k_deg, HD)
    out = jnp.sum(attn_full * sf, axis=1)                # [tm, HD]

    # Gate: sigmoid(edge_mean . beta_e + out . beta_o); edge part pre-reduced per node (te)
    te_mean = jnp.mean(sa[:, :, head:head + 1], axis=1)  # [tm, 1]
    gate = jax.nn.sigmoid(te_mean + jnp.sum(out * bo, axis=-1, keepdims=True))
    he = gate * out + (1.0 - gate) * dsth                # [tm, HD]

    # fused final linear: x = cat_r(he_r) @ Wl.T + bl == sum_r he_r @ Wl_r + bl
    @pl.when(r == 0)
    def _():
        acc_ref[...] = jnp.zeros_like(acc_ref)

    acc_ref[...] += jnp.dot(he, wl, preferred_element_type=jnp.float32)

    @pl.when(r == pl.num_programs(1) - 1)
    def _():
        o_ref[...] = acc_ref[...] + bl_ref[...]


def _pick_node_tile(N, K, HD, c_small, budget_bytes=4 << 20):
    assert N % 8 == 0, "TODO(synk): pad + mask ragged N"
    tm = N
    if N % 16 == 0:
        tm = N // 2                                      # >= 2 parallel steps (megacore)

    def tile_bytes(t):  # rough double-buffered footprint of the streamed blocks (f32)
        return 2 * 2 * t * (K * (HD + c_small) + 2 * HD + 2 * c_small) * 4

    while tm > 8 and tm % 16 == 0 and tile_bytes(tm) > budget_bytes:
        tm //= 2
    assert N % tm == 0 and tm % 8 == 0
    return tm


def rel_attn_gate_final_pallas(src_f, sa, dst_h, sd, bo, e8, wl3, bl, *, head, tm=None):
    n_rel, N, K, HD = src_f.shape
    C = sa.shape[-1]
    if tm is None:
        tm = _pick_node_tile(N, K, HD, C)
    grid = (N // tm, n_rel)
    kernel = functools.partial(_rel_attn_gate_kernel, head=head)
    return pl.pallas_call(
        kernel,
        out_shape=jax.ShapeDtypeStruct((N, HD), jnp.float32),
        grid=grid,
        in_specs=[
            pl.BlockSpec((1, tm, K, HD), lambda i, r: (r, i, 0, 0)),
            pl.BlockSpec((1, tm, K, C), lambda i, r: (r, i, 0, 0)),
            pl.BlockSpec((1, tm, HD), lambda i, r: (r, i, 0)),
            pl.BlockSpec((1, tm, C), lambda i, r: (r, i, 0)),
            pl.BlockSpec((1, 1, HD), lambda i, r: (r, 0, 0)),
            pl.BlockSpec((C, HD), lambda i, r: (0, 0)),
            pl.BlockSpec((1, HD, HD), lambda i, r: (r, 0, 0)),
            pl.BlockSpec((1, HD), lambda i, r: (0, 0)),
        ],
        out_specs=pl.BlockSpec((tm, HD), lambda i, r: (i, 0)),
        scratch_shapes=[pltpu.VMEM((tm, HD), jnp.float32)],
        compiler_params=pltpu.CompilerParams(
            dimension_semantics=("parallel", "arbitrary")),
    )(src_f, sa, dst_h, sd, bo, e8, wl3, bl)


# ------------------------- parameters & forward glue -------------------------

def init_params(key, input_dim, hd, head, n_rel):
    HD = head * hd
    ks = jax.random.split(key, 4 + 5 * n_rel)
    s = 0.1
    params = {
        # shared RelationAware.d_liner (nn.Linear(input_dim, HD): weight [HD, input_dim])
        'Wd': s * jax.random.normal(ks[0], (HD, input_dim), jnp.float32),
        'bd': s * jax.random.normal(ks[1], (HD,), jnp.float32),
        # final liner (nn.Linear(n_rel*HD, HD))
        'Wl': s * jax.random.normal(ks[2], (HD, n_rel * HD), jnp.float32),
        'bl': s * jax.random.normal(ks[3], (HD,), jnp.float32),
        'rel': [],
    }
    for r in range(n_rel):
        b = 4 + 5 * r
        params['rel'].append({
            'Ww': s * jax.random.normal(ks[b + 0], (HD, input_dim), jnp.float32),  # w_liner
            'bw': s * jax.random.normal(ks[b + 1], (HD,), jnp.float32),
            'attn_w': s * jax.random.normal(ks[b + 2], (1, 3 * hd), jnp.float32),  # atten
            'attn_b': s * jax.random.normal(ks[b + 3], (1,), jnp.float32),
            'gate_beta': s * jax.random.normal(ks[b + 4], (2 * HD, 1), jnp.float32),
        })
    return params


def _build_aux_mats(params, head, hd, n_rel, c_small):
    """Weight/bias mapping proj=[t | w_1 h | ... | w_R h] -> per-node attention/gate halves.

    Per relation r, output columns [2*c_small*r, 2*c_small*(r+1)):
      cols 0..head-1 : s_src (a_src . w_lin_r chunk + a_edge . t chunk) per head
      col  head      : te   (t . gate_beta[:HD])
      cols c..c+head-1: s_dst (a_dst . w_lin_r chunk + attn_b) per head ; rest zero pad.
    """
    HD = head * hd
    din = (1 + n_rel) * HD
    eye = jnp.eye(head, dtype=jnp.float32)
    mats, biases = [], []
    for r in range(n_rel):
        p = params['rel'][r]
        aw = p['attn_w'][0]
        a_src, a_dst, a_edge = aw[:hd], aw[hd:2 * hd], aw[2 * hd:]
        blk = lambda a: jnp.kron(eye, a[:, None])                      # [HD, head]
        m = jnp.zeros((din, 2 * c_small), jnp.float32)
        m = m.at[:HD, :head].set(blk(a_edge))                          # t -> s_src edge part
        m = m.at[:HD, head].set(p['gate_beta'][:HD, 0])                # t -> te
        r0 = (1 + r) * HD
        m = m.at[r0:r0 + HD, :head].set(blk(a_src))                    # w_lin_r -> s_src part
        m = m.at[r0:r0 + HD, c_small:c_small + head].set(blk(a_dst))   # w_lin_r -> s_dst
        b = jnp.zeros((2 * c_small,), jnp.float32)
        b = b.at[c_small:c_small + head].set(p['attn_b'][0])
        mats.append(m)
        biases.append(b)
    return jnp.concatenate(mats, axis=1), jnp.concatenate(biases, axis=0)


def multirelation_forward(h, params, src_idx_list, *, head, hd):
    N = h.shape[0]
    HD = head * hd
    n_rel = len(src_idx_list)
    K = src_idx_list[0].shape[1]
    c_small = max(8, -(-(head + 1) // 8) * 8)

    # ---- fused projection: [d_liner | w_liner_0 | ... | w_liner_{R-1}] in one matmul,
    #      tanh(2*.) epilogue on the d_liner columns (RelationAware edge feature).
    Wcat = jnp.concatenate([params['Wd'].T] + [p['Ww'].T for p in params['rel']], axis=1)
    bcat = jnp.concatenate([params['bd']] + [p['bw'] for p in params['rel']], axis=0)
    proj = matmul_bias_pallas(h, Wcat, bcat, n_tanh_cols=HD)          # [N, (1+R)*HD]

    # ---- per-node attention / gate halves for every relation in one small matmul kernel
    M_aux, b_aux = _build_aux_mats(params, head, hd, n_rel, c_small)
    aux = matmul_bias_pallas(proj, M_aux, b_aux)                      # [N, 2*c_small*R]

    # ---- gather neighbour (source-node) features per relation -- XLA glue
    # TODO(synk): move the gather into the kernel via scalar-prefetched indices + DMA.
    src_f_l, sa_l, dst_l, sd_l = [], [], [], []
    for r, src_idx in enumerate(src_idx_list):
        assert src_idx.shape[1] == K, "all relations must share the fixed in-degree K"
        flat = src_idx.reshape(-1)
        h_lin = proj[:, (1 + r) * HD:(2 + r) * HD]                    # [N, HD]
        aux_r = aux[:, 2 * c_small * r:2 * c_small * (r + 1)]         # [N, 2*c_small]
        src_f_l.append(jnp.take(h_lin, flat, axis=0).reshape(N, K, HD))
        sa_l.append(jnp.take(aux_r[:, :c_small], flat, axis=0).reshape(N, K, c_small))
        dst_l.append(h_lin)
        sd_l.append(aux_r[:, c_small:])
    src_f = jnp.stack(src_f_l, axis=0)                                # [R, N, K, HD]
    sa = jnp.stack(sa_l, axis=0)                                      # [R, N, K, c_small]
    dst_h = jnp.stack(dst_l, axis=0)                                  # [R, N, HD]
    sd = jnp.stack(sd_l, axis=0)                                      # [R, N, c_small]

    bo = jnp.stack([params['rel'][r]['gate_beta'][HD:, 0].reshape(1, HD)
                    for r in range(n_rel)], axis=0)                   # [R, 1, HD]
    wl3 = jnp.stack([params['Wl'][:, r * HD:(r + 1) * HD].T
                     for r in range(n_rel)], axis=0)                  # [R, HD, HD]
    e8 = jnp.concatenate(
        [jnp.kron(jnp.eye(head, dtype=jnp.float32), jnp.ones((1, hd), jnp.float32)),
         jnp.zeros((c_small - head, HD), jnp.float32)], axis=0)       # [c_small, HD]
    bl = params['bl'].reshape(1, HD)

    # ---- attention + gate + final linear fused over all relations (one pallas_call)
    return rel_attn_gate_final_pallas(src_f, sa, dst_h, sd, bo, e8, wl3, bl, head=head)


# ------------------------- pure-JAX reference -------------------------

def reference_forward(h, params, src_idx_list, head, hd):
    N = h.shape[0]
    HD = head * hd
    d_lin = h @ params['Wd'].T + params['bd']
    hs = []
    for r, src_idx in enumerate(src_idx_list):
        p = params['rel'][r]
        K = src_idx.shape[1]
        h_lin = h @ p['Ww'].T + p['bw']
        src_d = d_lin[src_idx]                                    # [N, K, HD]
        dst_d = d_lin[:, None, :]
        edge_sum = jnp.tanh(src_d + dst_d + (src_d - dst_d))      # [N, K, HD]
        src_f = h_lin[src_idx].reshape(N, K, head, hd)
        dst_f = jnp.broadcast_to(h_lin[:, None, :], (N, K, HD)).reshape(N, K, head, hd)
        edge_s4 = edge_sum.reshape(N, K, head, hd)
        z = jnp.concatenate([src_f, dst_f, edge_s4], axis=-1)     # [N, K, head, 3hd]
        alpha = z @ p['attn_w'][0] + p['attn_b'][0]               # [N, K, head]
        alpha = jnp.where(alpha > 0, alpha, 0.01 * alpha)
        attn = jax.nn.softmax(alpha, axis=1)
        out = jnp.sum(attn[..., None] * src_f, axis=1).reshape(N, HD)
        edge_s = jnp.mean(edge_sum, axis=1)                       # [N, HD]
        gate = jax.nn.sigmoid(jnp.concatenate([edge_s, out], axis=1) @ p['gate_beta'])
        hs.append(gate * out + (1.0 - gate) * h_lin)
    x = jnp.concatenate(hs, axis=1)
    return x @ params['Wl'].T + params['bl']


# ------------------------- main -------------------------

if __name__ == "__main__":
    N, input_dim, hd, head, K, n_rel = 64, 32, 8, 4, 8, 2

    key = jax.random.PRNGKey(0)
    kh, kg, kp = jax.random.split(key, 3)
    h = jax.random.normal(kh, (N, input_dim), jnp.float32)
    src_idx_list = [jax.random.randint(k, (N, K), 0, N, dtype=jnp.int32)
                    for k in jax.random.split(kg, n_rel)]
    params = init_params(kp, input_dim, hd, head, n_rel)

    fwd = jax.jit(functools.partial(multirelation_forward, head=head, hd=hd))
    out = jax.block_until_ready(fwd(h, params, src_idx_list))

    ref = reference_forward(h, params, src_idx_list, head, hd)
    np.testing.assert_allclose(np.asarray(out), np.asarray(ref),
                               rtol=1e-4, atol=1e-4)
    print("KERNEL_OK")
</pallas_src>

<mosaic_0001>
module attributes {stable_mosaic.version = 11 : i64} {
  func.func @_matmul_bias_kernel(%arg0: i32, %arg1: memref<32x32xf32, #tpu.memory_space<vmem>>, %arg2: memref<32x96xf32, #tpu.memory_space<vmem>>, %arg3: memref<1x96xf32, #tpu.memory_space<vmem>>, %arg4: memref<32x96xf32, #tpu.memory_space<vmem>>) attributes {dimension_semantics = [#tpu.dimension_semantics<parallel>], iteration_bounds = array<i64: 2>, scalar_prefetch = 0 : i64, scratch_operands = 0 : i64, tpu.core_type = #tpu.core_type<tc>, window_params = [{transform_indices = @transform_0, window_bounds = array<i64: 32, 32>}, {pipeline_mode = #tpu.pipeline_mode<synchronous>, transform_indices = @transform_1, window_bounds = array<i64: 32, 96>}, {pipeline_mode = #tpu.pipeline_mode<synchronous>, transform_indices = @transform_2, window_bounds = array<i64: 1, 96>}, {transform_indices = @transform_3, window_bounds = array<i64: 32, 96>}]} {
    %c0 = arith.constant 0 : index
    %c0_0 = arith.constant 0 : index
    %0 = vector.load %arg1[%c0, %c0_0] : memref<32x32xf32, #tpu.memory_space<vmem>>, vector<32x32xf32>
    %c0_1 = arith.constant 0 : index
    %c0_2 = arith.constant 0 : index
    %1 = vector.load %arg2[%c0_1, %c0_2] : memref<32x96xf32, #tpu.memory_space<vmem>>, vector<32x96xf32>
    %cst = arith.constant dense<0.000000e+00> : vector<32x96xf32>
    %2 = tpu.matmul %0, %1, %cst {dimension_numbers = #tpu.dot_dimension_numbers<[1], [0], [0], [1], [0, 0, 1, 1], [], []>, precision = #tpu.contract_precision<fp32>} : vector<32x32xf32>, vector<32x96xf32>, vector<32x96xf32> -> vector<32x96xf32>
    %c0_3 = arith.constant 0 : index
    %c0_4 = arith.constant 0 : index
    %3 = vector.load %arg3[%c0_3, %c0_4] : memref<1x96xf32, #tpu.memory_space<vmem>>, vector<1x96xf32>
    %4 = vector.broadcast %3 : vector<1x96xf32> to vector<32x96xf32>
    %5 = arith.addf %2, %4 : vector<32x96xf32>
    %6 = tpu.iota {dimensions = array<i32: 1>} : vector<32x96xi32>
    %c32_i32 = arith.constant 32 : i32
    %7 = vector.broadcast %c32_i32 : i32 to vector<32x96xi32>
    %8 = arith.cmpi slt, %6, %7 : vector<32x96xi32>
    %cst_5 = arith.constant 2.000000e+00 : f32
    %9 = vector.broadcast %cst_5 : f32 to vector<32x96xf32>
    %10 = arith.mulf %9, %5 : vector<32x96xf32>
    %11 = math.tanh %10 : vector<32x96xf32>
    %12 = arith.select %8, %11, %5 : vector<32x96xi1>, vector<32x96xf32>
    %c0_6 = arith.constant 0 : index
    %c0_7 = arith.constant 0 : index
    %13 = vector.load %arg4[%c0_6, %c0_7] : memref<32x96xf32, #tpu.memory_space<vmem>>, vector<32x96xf32>
    tpu.vector_store %arg4[%c0_6, %c0_7], %12 {strides = array<i32>} : memref<32x96xf32, #tpu.memory_space<vmem>>, vector<32x96xf32>,
    return
  }
  func.func @transform_0(%arg0: i32) -> (i32, i32) {
    %c0_i32 = arith.constant 0 : i32
    %c0_i32_0 = arith.constant 0 : i32
    return %arg0, %c0_i32 : i32, i32
  }
  func.func @transform_1(%arg0: i32) -> (i32, i32) {
    %c0_i32 = arith.constant 0 : i32
    %c0_i32_0 = arith.constant 0 : i32
    %c0_i32_1 = arith.constant 0 : i32
    return %c0_i32, %c0_i32_0 : i32, i32
  }
  func.func @transform_2(%arg0: i32) -> (i32, i32) {
    %c0_i32 = arith.constant 0 : i32
    %c0_i32_0 = arith.constant 0 : i32
    %c0_i32_1 = arith.constant 0 : i32
    return %c0_i32, %c0_i32_0 : i32, i32
  }
  func.func @transform_3(%arg0: i32) -> (i32, i32) {
    %c0_i32 = arith.constant 0 : i32
    %c0_i32_0 = arith.constant 0 : i32
    return %arg0, %c0_i32 : i32, i32
  }
}

module attributes {stable_mosaic.version = 11 : i64} {
  func.func @_matmul_bias_kernel(%arg0: i32, %arg1: memref<32x96xf32, #tpu.memory_space<vmem>>, %arg2: memref<96x32xf32, #tpu.memory_space<vmem>>, %arg3: memref<1x32xf32, #tpu.memory_space<vmem>>, %arg4: memref<32x32xf32, #tpu.memory_space<vmem>>) attributes {dimension_semantics = [#tpu.dimension_semantics<parallel>], iteration_bounds = array<i64: 2>, scalar_prefetch = 0 : i64, scratch_operands = 0 : i64, tpu.core_type = #tpu.core_type<tc>, window_params = [{transform_indices = @transform_0, window_bounds = array<i64: 32, 96>}, {pipeline_mode = #tpu.pipeline_mode<synchronous>, transform_indices = @transform_1, window_bounds = array<i64: 96, 32>}, {pipeline_mode = #tpu.pipeline_mode<synchronous>, transform_indices = @transform_2, window_bounds = array<i64: 1, 32>}, {transform_indices = @transform_3, window_bounds = array<i64: 32, 32>}]} {
    %c0 = arith.constant 0 : index
    %c0_0 = arith.constant 0 : index
    %0 = vector.load %arg1[%c0, %c0_0] : memref<32x96xf32, #tpu.memory_space<vmem>>, vector<32x96xf32>
    %c0_1 = arith.constant 0 : index
    %c0_2 = arith.constant 0 : index
    %1 = vector.load %arg2[%c0_1, %c0_2] : memref<96x32xf32, #tpu.memory_space<vmem>>, vector<96x32xf32>
    %cst = arith.constant dense<0.000000e+00> : vector<32x32xf32>
    %2 = tpu.matmul %0, %1, %cst {dimension_numbers = #tpu.dot_dimension_numbers<[1], [0], [0], [1], [0, 0, 1, 1], [], []>, precision = #tpu.contract_precision<fp32>} : vector<32x96xf32>, vector<96x32xf32>, vector<32x32xf32> -> vector<32x32xf32>
    %c0_3 = arith.constant 0 : index
    %c0_4 = arith.constant 0 : index
    %3 = vector.load %arg3[%c0_3, %c0_4] : memref<1x32xf32, #tpu.memory_space<vmem>>, vector<1x32xf32>
    %4 = vector.broadcast %3 : vector<1x32xf32> to vector<32x32xf32>
    %5 = arith.addf %2, %4 : vector<32x32xf32>
    %c0_5 = arith.constant 0 : index
    %c0_6 = arith.constant 0 : index
    %6 = vector.load %arg4[%c0_5, %c0_6] : memref<32x32xf32, #tpu.memory_space<vmem>>, vector<32x32xf32>
    tpu.vector_store %arg4[%c0_5, %c0_6], %5 {strides = array<i32>} : memref<32x32xf32, #tpu.memory_space<vmem>>, vector<32x32xf32>,
    return
  }
  func.func @transform_0(%arg0: i32) -> (i32, i32) {
    %c0_i32 = arith.constant 0 : i32
    %c0_i32_0 = arith.constant 0 : i32
    return %arg0, %c0_i32 : i32, i32
  }
  func.func @transform_1(%arg0: i32) -> (i32, i32) {
    %c0_i32 = arith.constant 0 : i32
    %c0_i32_0 = arith.constant 0 : i32
    %c0_i32_1 = arith.constant 0 : i32
    return %c0_i32, %c0_i32_0 : i32, i32
  }
  func.func @transform_2(%arg0: i32) -> (i32, i32) {
    %c0_i32 = arith.constant 0 : i32
    %c0_i32_0 = arith.constant 0 : i32
    %c0_i32_1 = arith.constant 0 : i32
    return %c0_i32, %c0_i32_0 : i32, i32
  }
  func.func @transform_3(%arg0: i32) -> (i32, i32) {
    %c0_i32 = arith.constant 0 : i32
    %c0_i32_0 = arith.constant 0 : i32
    return %arg0, %c0_i32 : i32, i32
  }
}

module attributes {stable_mosaic.version = 11 : i64} {
  func.func @_rel_attn_gate_kernel(%arg0: i32, %arg1: i32, %arg2: memref<1x32x8x32xf32, #tpu.memory_space<vmem>>, %arg3: memref<1x32x8x8xf32, #tpu.memory_space<vmem>>, %arg4: memref<1x32x32xf32, #tpu.memory_space<vmem>>, %arg5: memref<1x32x8xf32, #tpu.memory_space<vmem>>, %arg6: memref<1x1x32xf32, #tpu.memory_space<vmem>>, %arg7: memref<8x32xf32, #tpu.memory_space<vmem>>, %arg8: memref<1x32x32xf32, #tpu.memory_space<vmem>>, %arg9: memref<1x32xf32, #tpu.memory_space<vmem>>, %arg10: memref<32x32xf32, #tpu.memory_space<vmem>>, %arg11: memref<32x32xf32, #tpu.memory_space<vmem>>) attributes {dimension_semantics = [#tpu.dimension_semantics<parallel>, #tpu.dimension_semantics<arbitrary>], iteration_bounds = array<i64: 2, 2>, scalar_prefetch = 0 : i64, scratch_operands = 1 : i64, tpu.core_type = #tpu.core_type<tc>, window_params = [{transform_indices = @transform_0, window_bounds = array<i64: 1, 32, 8, 32>}, {transform_indices = @transform_1, window_bounds = array<i64: 1, 32, 8, 8>}, {transform_indices = @transform_2, window_bounds = array<i64: 1, 32, 32>}, {transform_indices = @transform_3, window_bounds = array<i64: 1, 32, 8>}, {transform_indices = @transform_4, window_bounds = array<i64: 1, 1, 32>}, {pipeline_mode = #tpu.pipeline_mode<synchronous>, transform_indices = @transform_5, window_bounds = array<i64: 8, 32>}, {transform_indices = @transform_6, window_bounds = array<i64: 1, 32, 32>}, {pipeline_mode = #tpu.pipeline_mode<synchronous>, transform_indices = @transform_7, window_bounds = array<i64: 1, 32>}, {transform_indices = @transform_8, window_bounds = array<i64: 32, 32>}]} {
    %c0 = arith.constant 0 : index
    %c0_0 = arith.constant 0 : index
    %c0_1 = arith.constant 0 : index
    %c0_2 = arith.constant 0 : index
    %0 = vector.load %arg2[%c0, %c0_0, %c0_1, %c0_2] : memref<1x32x8x32xf32, #tpu.memory_space<vmem>>, vector<1x32x8x32xf32>
    %1 = vector.shape_cast %0 : vector<1x32x8x32xf32> to vector<32x8x32xf32>
    %c0_3 = arith.constant 0 : index
    %c0_4 = arith.constant 0 : index
    %c0_5 = arith.constant 0 : index
    %c0_6 = arith.constant 0 : index
    %2 = vector.load %arg3[%c0_3, %c0_4, %c0_5, %c0_6] : memref<1x32x8x8xf32, #tpu.memory_space<vmem>>, vector<1x32x8x8xf32>
    %3 = vector.shape_cast %2 : vector<1x32x8x8xf32> to vector<32x8x8xf32>
    %c0_7 = arith.constant 0 : index
    %c0_8 = arith.constant 0 : index
    %c0_9 = arith.constant 0 : index
    %4 = vector.load %arg4[%c0_7, %c0_8, %c0_9] : memref<1x32x32xf32, #tpu.memory_space<vmem>>, vector<1x32x32xf32>
    %5 = vector.shape_cast %4 : vector<1x32x32xf32> to vector<32x32xf32>
    %c0_10 = arith.constant 0 : index
    %c0_11 = arith.constant 0 : index
    %c0_12 = arith.constant 0 : index
    %6 = vector.load %arg5[%c0_10, %c0_11, %c0_12] : memref<1x32x8xf32, #tpu.memory_space<vmem>>, vector<1x32x8xf32>
    %7 = vector.shape_cast %6 : vector<1x32x8xf32> to vector<32x8xf32>
    %c0_13 = arith.constant 0 : index
    %c0_14 = arith.constant 0 : index
    %c0_15 = arith.constant 0 : index
    %8 = vector.load %arg6[%c0_13, %c0_14, %c0_15] : memref<1x1x32xf32, #tpu.memory_space<vmem>>, vector<1x1x32xf32>
    %9 = vector.shape_cast %8 : vector<1x1x32xf32> to vector<1x32xf32>
    %c0_16 = arith.constant 0 : index
    %c0_17 = arith.constant 0 : index
    %10 = vector.load %arg7[%c0_16, %c0_17] : memref<8x32xf32, #tpu.memory_space<vmem>>, vector<8x32xf32>
    %c0_18 = arith.constant 0 : index
    %c0_19 = arith.constant 0 : index
    %c0_20 = arith.constant 0 : index
    %11 = vector.load %arg8[%c0_18, %c0_19, %c0_20] : memref<1x32x32xf32, #tpu.memory_space<vmem>>, vector<1x32x32xf32>
    %12 = vector.shape_cast %11 : vector<1x32x32xf32> to vector<32x32xf32>
    %13 = vector.shape_cast %7 : vector<32x8xf32> to vector<32x1x8xf32>
    %14 = vector.broadcast %13 : vector<32x1x8xf32> to vector<32x8x8xf32>
    %15 = arith.addf %3, %14 : vector<32x8x8xf32>
    %cst = arith.constant 0.000000e+00 : f32
    %16 = vector.broadcast %cst : f32 to vector<32x8x8xf32>
    %17 = arith.cmpf ogt, %15, %16 : vector<32x8x8xf32>
    %cst_21 = arith.constant 0.00999999977 : f32
    %18 = vector.broadcast %cst_21 : f32 to vector<32x8x8xf32>
    %19 = arith.mulf %18, %15 : vector<32x8x8xf32>
    %20 = arith.select %17, %15, %19 : vector<32x8x8xi1>, vector<32x8x8xf32>
    %cst_22 = arith.constant dense<0xFF800000> : vector<32x8xf32>
    %21 = vector.multi_reduction <maximumf>, %20, %cst_22 [1] : vector<32x8x8xf32> to vector<32x8xf32>
    %22 = vector.shape_cast %21 : vector<32x8xf32> to vector<32x1x8xf32>
    %23 = vector.broadcast %22 : vector<32x1x8xf32> to vector<32x8x8xf32>
    %24 = arith.subf %20, %23 : vector<32x8x8xf32>
    %25 = math.exp %24 : vector<32x8x8xf32>
    %cst_23 = arith.constant dense<0.000000e+00> : vector<32x8xf32>
    %26 = vector.multi_reduction <add>, %25, %cst_23 [1] : vector<32x8x8xf32> to vector<32x8xf32>
    %27 = vector.shape_cast %26 : vector<32x8xf32> to vector<32x1x8xf32>
    %28 = vector.broadcast %27 : vector<32x1x8xf32> to vector<32x8x8xf32>
    %29 = arith.divf %25, %28 : vector<32x8x8xf32>
    %30 = vector.shape_cast %29 : vector<32x8x8xf32> to vector<256x8xf32>
    %cst_24 = arith.constant dense<0.000000e+00> : vector<256x32xf32>
    %31 = tpu.matmul %30, %10, %cst_24 {dimension_numbers = #tpu.dot_dimension_numbers<[1], [0], [0], [1], [0, 0, 1, 1], [], []>, precision = #tpu.contract_precision<fp32>} : vector<256x8xf32>, vector<8x32xf32>, vector<256x32xf32> -> vector<256x32xf32>
    %32 = vector.shape_cast %31 : vector<256x32xf32> to vector<32x8x32xf32>
    %33 = arith.mulf %32, %1 : vector<32x8x32xf32>
    %cst_25 = arith.constant dense<0.000000e+00> : vector<32x32xf32>
    %34 = vector.multi_reduction <add>, %33, %cst_25 [1] : vector<32x8x32xf32> to vector<32x32xf32>
    %35 = vector.extract_strided_slice %3 {offsets = [0, 0, 4], sizes = [32, 8, 1], strides = [1, 1, 1]} : vector<32x8x8xf32> to vector<32x8x1xf32>
    %cst_26 = arith.constant dense<0.000000e+00> : vector<32x1xf32>
    %36 = vector.multi_reduction <add>, %35, %cst_26 [1] : vector<32x8x1xf32> to vector<32x1xf32>
    %cst_27 = arith.constant 8.000000e+00 : f32
    %37 = vector.broadcast %cst_27 : f32 to vector<32x1xf32>
    %38 = arith.divf %36, %37 : vector<32x1xf32>
    %39 = vector.broadcast %9 : vector<1x32xf32> to vector<32x32xf32>
    %40 = arith.mulf %34, %39 : vector<32x32xf32>
    %cst_28 = arith.constant dense<0.000000e+00> : vector<32xf32>
    %41 = vector.multi_reduction <add>, %40, %cst_28 [1] : vector<32x32xf32> to vector<32xf32>
    %42 = vector.shape_cast %41 : vector<32xf32> to vector<32x1xf32>
    %43 = arith.addf %38, %42 : vector<32x1xf32>
    %44 = arith.negf %43 : vector<32x1xf32>
    %45 = math.exp %44 : vector<32x1xf32>
    %cst_29 = arith.constant 1.000000e+00 : f32
    %46 = vector.broadcast %cst_29 : f32 to vector<32x1xf32>
    %47 = arith.addf %46, %45 : vector<32x1xf32>
    %48 = arith.divf %46, %47 : vector<32x1xf32>
    %49 = vector.broadcast %48 : vector<32x1xf32> to vector<32x32xf32>
    %50 = arith.mulf %49, %34 : vector<32x32xf32>
    %cst_30 = arith.constant 1.000000e+00 : f32
    %51 = vector.broadcast %cst_30 : f32 to vector<32x1xf32>
    %52 = arith.subf %51, %48 : vector<32x1xf32>
    %53 = vector.broadcast %52 : vector<32x1xf32> to vector<32x32xf32>
    %54 = arith.mulf %53, %5 : vector<32x32xf32>
    %55 = arith.addf %50, %54 : vector<32x32xf32>
    %c0_i32 = arith.constant 0 : i32
    %56 = arith.cmpi eq, %arg1, %c0_i32 : i32
    %57 = arith.extui %56 : i1 to i32
    %c0_i32_31 = arith.constant 0 : i32
    %58 = arith.cmpi ne, %57, %c0_i32_31 : i32
    scf.if %58 {
      %cst_38 = arith.constant 0.000000e+00 : f32
      %66 = vector.broadcast %cst_38 : f32 to vector<32x32xf32>
      %c0_39 = arith.constant 0 : index
      %c0_40 = arith.constant 0 : index
      %67 = vector.load %arg11[%c0_39, %c0_40] : memref<32x32xf32, #tpu.memory_space<vmem>>, vector<32x32xf32>
      tpu.vector_store %arg11[%c0_39, %c0_40], %66 {strides = array<i32>} : memref<32x32xf32, #tpu.memory_space<vmem>>, vector<32x32xf32>,
    } else {
    }
    %c0_32 = arith.constant 0 : index
    %c0_33 = arith.constant 0 : index
    %59 = vector.load %arg11[%c0_32, %c0_33] : memref<32x32xf32, #tpu.memory_space<vmem>>, vector<32x32xf32>
    %cst_34 = arith.constant dense<0.000000e+00> : vector<32x32xf32>
    %60 = tpu.matmul %55, %12, %cst_34 {dimension_numbers = #tpu.dot_dimension_numbers<[1], [0], [0], [1], [0, 0, 1, 1], [], []>, precision = #tpu.contract_precision<fp32>} : vector<32x32xf32>, vector<32x32xf32>, vector<32x32xf32> -> vector<32x32xf32>
    %61 = arith.addf %59, %60 : vector<32x32xf32>
    %c0_35 = arith.constant 0 : index
    %c0_36 = arith.constant 0 : index
    %62 = vector.load %arg11[%c0_35, %c0_36] : memref<32x32xf32, #tpu.memory_space<vmem>>, vector<32x32xf32>
    tpu.vector_store %arg11[%c0_35, %c0_36], %61 {strides = array<i32>} : memref<32x32xf32, #tpu.memory_space<vmem>>, vector<32x32xf32>,
    %c1_i32 = arith.constant 1 : i32
    %63 = arith.cmpi eq, %arg1, %c1_i32 : i32
    %64 = arith.extui %63 : i1 to i32
    %c0_i32_37 = arith.constant 0 : i32
    %65 = arith.cmpi ne, %64, %c0_i32_37 : i32
    scf.if %65 {
      %c0_38 = arith.constant 0 : index
      %c0_39 = arith.constant 0 : index
      %66 = vector.load %arg11[%c0_38, %c0_39] : memref<32x32xf32, #tpu.memory_space<vmem>>, vector<32x32xf32>
      %c0_40 = arith.constant 0 : index
      %c0_41 = arith.constant 0 : index
      %67 = vector.load %arg9[%c0_40, %c0_41] : memref<1x32xf32, #tpu.memory_space<vmem>>, vector<1x32xf32>
      %68 = vector.broadcast %67 : vector<1x32xf32> to vector<32x32xf32>
      %69 = arith.addf %66, %68 : vector<32x32xf32>
      %c0_42 = arith.constant 0 : index
      %c0_43 = arith.constant 0 : index
      %70 = vector.load %arg10[%c0_42, %c0_43] : memref<32x32xf32, #tpu.memory_space<vmem>>, vector<32x32xf32>
      tpu.vector_store %arg10[%c0_42, %c0_43], %69 {strides = array<i32>} : memref<32x32xf32, #tpu.memory_space<vmem>>, vector<32x32xf32>,
    } else {
    }
    return
  }
  func.func @transform_0(%arg0: i32, %arg1: i32) -> (i32, i32, i32, i32) {
    %c0_i32 = arith.constant 0 : i32
    %c0_i32_0 = arith.constant 0 : i32
    %c0_i32_1 = arith.constant 0 : i32
    return %arg1, %arg0, %c0_i32, %c0_i32_0 : i32, i32, i32, i32
  }
  func.func @transform_1(%arg0: i32, %arg1: i32) -> (i32, i32, i32, i32) {
    %c0_i32 = arith.constant 0 : i32
    %c0_i32_0 = arith.constant 0 : i32
    %c0_i32_1 = arith.constant 0 : i32
    return %arg1, %arg0, %c0_i32, %c0_i32_0 : i32, i32, i32, i32
  }
  func.func @transform_2(%arg0: i32, %arg1: i32) -> (i32, i32, i32) {
    %c0_i32 = arith.constant 0 : i32
    %c0_i32_0 = arith.constant 0 : i32
    return %arg1, %arg0, %c0_i32 : i32, i32, i32
  }
  func.func @transform_3(%arg0: i32, %arg1: i32) -> (i32, i32, i32) {
    %c0_i32 = arith.constant 0 : i32
    %c0_i32_0 = arith.constant 0 : i32
    return %arg1, %arg0, %c0_i32 : i32, i32, i32
  }
  func.func @transform_4(%arg0: i32, %arg1: i32) -> (i32, i32, i32) {
    %c0_i32 = arith.constant 0 : i32
    %c0_i32_0 = arith.constant 0 : i32
    %c0_i32_1 = arith.constant 0 : i32
    return %arg1, %c0_i32, %c0_i32_0 : i32, i32, i32
  }
  func.func @transform_5(%arg0: i32, %arg1: i32) -> (i32, i32) {
    %c0_i32 = arith.constant 0 : i32
    %c0_i32_0 = arith.constant 0 : i32
    %c0_i32_1 = arith.constant 0 : i32
    return %c0_i32, %c0_i32_0 : i32, i32
  }
  func.func @transform_6(%arg0: i32, %arg1: i32) -> (i32, i32, i32) {
    %c0_i32 = arith.constant 0 : i32
    %c0_i32_0 = arith.constant 0 : i32
    %c0_i32_1 = arith.constant 0 : i32
    return %arg1, %c0_i32, %c0_i32_0 : i32, i32, i32
  }
  func.func @transform_7(%arg0: i32, %arg1: i32) -> (i32, i32) {
    %c0_i32 = arith.constant 0 : i32
    %c0_i32_0 = arith.constant 0 : i32
    %c0_i32_1 = arith.constant 0 : i32
    return %c0_i32, %c0_i32_0 : i32, i32
  }
  func.func @transform_8(%arg0: i32, %arg1: i32) -> (i32, i32) {
    %c0_i32 = arith.constant 0 : i32
    %c0_i32_0 = arith.constant 0 : i32
    return %arg0, %c0_i32 : i32, i32
  }
}

</mosaic_0001>

<bundles_post_ra>
// kernel: multirelation_forward.3
= control target key start
LH: loop header
LB: loop body
LE: loop exit
PB: predicated region body
PF: predicated region fallthrough
CT: control target
= control target key end

     0   :  { %s1080_s12 = smov 0   ;;  %s1227_s0 = inlined_call_operand.vmem [shape: f32[64,32], index: 0, kind: input, shape index: {}]   ;;  %s1228_s1 = inlined_call_operand.vmem [shape: f32[32,96], index: 1, kind: input, shape index: {}]   ;;  %s1229_s2 = inlined_call_operand.vmem [shape: f32[1,96], index: 2, kind: input, shape index: {}]   ;;  %s1230_s3 = inlined_call_operand.vmem [shape: f32[64,96], index: 3, kind: output, shape index: {}]  }
   0x1 LB: > { %s892_s13 = sadd.s32 4294967295, %s1058_s12   ;;  %p896_p0 = scmp.ge.s32.totalorder %s1058_s12, 1  ;;  %s1058_s12 = sphi %s1080_s12, %s13_s12  }
   0x2   : > { %p138_p1 = scmp.lt.s32.totalorder %s1058_s12, 3 }
   0x4   : > { %p139_p2 = pnand %p896_p0, %p138_p1 }
   0x5   : > { %s897_s20 = sshll.u32 (!%p139_p2), %s892_s13, 2 }
   0x6   : > { %142 = sbr.rel (%p139_p2) target bundleno = 273 (0x111), region = 32  ;;  %p163_p3 = scmp.lt.s32.totalorder (!%p139_p2), %s897_s20, 7 }
   0xb   : > { %v181_v0 = vld [vmem:[%s1228_s1 + $0x18] sm:$0xff]  ;;  %v180_v1 = vld [vmem:[%s1228_s1 + $0x10] sm:$0xff]  ;;  %v179_v2 = vld [vmem:[%s1228_s1 + $0x8] sm:$0xff]  ;;  %s1232_s20 = smov (!%p163_p3, %s897_s20), 7  ;;  %vm189_vm0 = vcmask 261120   ;;  %vm831_vm2 = vcmask 785408  }
   0xc   : > { %v1097_v3 = vand.u32 4294901760, %v181_v0  ;;  %v1099_v4 = vand.u32 4294901760, %v180_v1  ;;  %v1101_v5 = vand.u32 4294901760, %v179_v2  ;;  %v178_v6 = vld [vmem:[%s1228_s1] sm:$0xff]  ;;  %s898_s23 = sshll.u32 %s1232_s20, 3 }
   0xd   : > { %v1106_v7 = vand.u32 4294901760, %v178_v6  ;;  %s166_s26 = scalar_lea.vmem %s1227_s0, %s898_s23  ;;  %v901_v60 = vld [vmem:[%s1229_s2] ss:$0 sm:$0xff]  ;;  %s172_s4 = scalar_lea.vmem %s1230_s3, %s898_s23 }
   0xe   : > { %952 = vmatprep.subr.mxu0 %v1097_v3  ;;  %v1110_v8 = vsub.f32 %v181_v0, %v1097_v3  ;;  %v1113_v9 = vsub.f32 %v180_v1, %v1099_v4  ;;  %v1116_v10 = vsub.f32 %v179_v2, %v1101_v5  ;;  %v174_v19 = vld [vmem:[%s166_s26] sm:$0xff]  ;;  %v175_v20 = vld [vmem:[%s166_s26 + $0x8] sm:$0xff]  ;;  %v176_v21 = vld [vmem:[%s166_s26 + $0x10] sm:$0xff] }
   0xf   : > { %953 = vmatpush3.msra.mxu0 %v1097_v3  ;;  %v1122_v11 = vsub.f32 %v178_v6, %v1106_v7  ;;  %v191_v22 = vsel %vm189_vm0, %v174_v19, 0  ;;  %v194_v23 = vsel %vm189_vm0, %v175_v20, 0  ;;  %v197_v24 = vsel %vm189_vm0, %v176_v21, 0  ;;  %v177_v25 = vld [vmem:[%s166_s26 + $0x18] sm:$0xff] }
  0x10   : > { %v1125_v12 = vand.u32 4294901760, %v1110_v8  ;;  %954 = vmatprep.subr.mxu0 %v1099_v4  ;;  %v1129_v13 = vand.u32 4294901760, %v1113_v9  ;;  %v1132_v14 = vand.u32 4294901760, %v1116_v10  ;;  %v1158_v29 = vand.u32 4294901760, %v191_v22 }
  0x11   : > { %955 = vmatpush3.msra.mxu0 %v1099_v4  ;;  %v1137_v15 = vand.u32 4294901760, %v1122_v11  ;;  %v1161_v30 = vand.u32 4294901760, %v194_v23  ;;  %v1163_v31 = vand.u32 4294901760, %v197_v24  ;;  %v200_v32 = vsel %vm189_vm0, %v177_v25, 0 }
  0x12   : > { %v339_v16 = vsub.f32 %v1110_v8, %v1125_v12  ;;  %v346_v17 = vsub.f32 %v1113_v9, %v1129_v13  ;;  %956 = vmatprep.subr.mxu0 %v1101_v5  ;;  %v353_v18 = vsub.f32 %v1116_v10, %v1132_v14  ;;  %v272_v34 = vsub.f32 %v191_v22, %v1158_v29 }
  0x13   : > { %957 = vmatpush3.msra.mxu0 %v1101_v5  ;;  %v360_v28 = vsub.f32 %v1122_v11, %v1137_v15  ;;  %974 = vmatprep.mubr.f32.mxu1 %v1158_v29  ;;  %v1168_v35 = vand.u32 4294901760, %v200_v32  ;;  %v282_v36 = vsub.f32 %v194_v23, %v1161_v30  ;;  %v292_v37 = vsub.f32 %v197_v24, %v1163_v31 }
  0x14   : > { %v340_v26 = vand.u32 4294901760, %v339_v16  ;;  %v347_v27 = vand.u32 4294901760, %v346_v17  ;;  %958 = vmatprep.subr.mxu0 %v1106_v7  ;;  %v354_v33 = vand.u32 4294901760, %v353_v18  ;;  %v273_v39 = vand.u32 4294901760, %v272_v34 }
  0x15   : > { %959 = vmatpush3.msra.mxu0 %v1106_v7  ;;  %v361_v38 = vand.u32 4294901760, %v360_v28  ;;  %v302_v40 = vsub.f32 %v200_v32, %v1168_v35  ;;  %v283_v41 = vand.u32 4294901760, %v282_v36  ;;  %v293_v42 = vand.u32 4294901760, %v292_v37 }
  0x16   : > { %966 = vmatprep.subr.mxu1 %v340_v26  ;;  %980 = vmatprep.subr.mxu0 %v1110_v8  ;;  %v274_v43 = vsub.f32 %v272_v34, %v273_v39 }
  0x17   : > { %967 = vmatpush3.msra.mxu1 %v340_v26  ;;  %v303_v44 = vand.u32 4294901760, %v302_v40  ;;  %v284_v45 = vsub.f32 %v282_v36, %v283_v41  ;;  %v294_v46 = vsub.f32 %v292_v37, %v293_v42 }
  0x18   : > { %968 = vmatprep.subr.mxu1 %v347_v27  ;;  %v275_v47 = vand.u32 4294901760, %v274_v43 }
  0x19   : > { %969 = vmatpush3.msra.mxu1 %v347_v27  ;;  %v304_v48 = vsub.f32 %v302_v40, %v303_v44  ;;  %v285_v49 = vand.u32 4294901760, %v284_v45  ;;  %v295_v50 = vand.u32 4294901760, %v294_v46 }
  0x1a   : > { %970 = vmatprep.subr.mxu1 %v354_v33  ;;  %960 = vmatprep.mubr.f32.mxu0 %v275_v47 }
  0x1b   : > { %971 = vmatpush3.msra.mxu1 %v354_v33  ;;  %961 = vmatmul.mubr.f32.vlgmr.msra.gmra.mxu0 %v285_v49  ;;  %v305_v51 = vand.u32 4294901760, %v304_v48 }
  0x1c   : > { %972 = vmatprep.subr.mxu1 %v361_v38  ;;  %981 = vmatpush3.msra.mxu0 %v1110_v8 }
  0x1d   : > { %973 = vmatpush3.msra.mxu1 %v361_v38  ;;  %982 = vmatprep.subr.mxu0 %v1113_v9 }
  0x1e   : > { %975 = vmatmul.mubr.f32.vlgmr.msra.gmra.mxu1 %v1161_v30  ;;  %994 = vmatprep.subr.mxu1 %v1097_v3 }
  0x1f   : > { %995 = vmatpush3.msra.mxu1 %v1097_v3  ;;  %983 = vmatpush3.msra.mxu0 %v1113_v9 }
  0x20   : > { %996 = vmatprep.subr.mxu1 %v1099_v4  ;;  %963 = vmatprep.mubr.f32.mxu0 %v295_v50 }
  0x21   : > { %977 = vmatprep.mubr.f32.mxu1 %v1163_v31  ;;  %984 = vmatprep.subr.mxu0 %v1116_v10 }
  0x22   : > { %997 = vmatpush3.msra.mxu1 %v1099_v4  ;;  %964 = vmatmul.mubr.f32.gmra.mxu0 %v305_v51 }
  0x23   : > { %978 = vmatmul.mubr.f32.gmra.mxu1 %v1168_v35  ;;  %985 = vmatpush3.msra.mxu0 %v1116_v10 }
  0x24   : > { %998 = vmatprep.subr.mxu1 %v1101_v5  ;;  %986 = vmatprep.subr.mxu0 %v1122_v11 }
  0x25   : > { %999 = vmatpush3.msra.mxu1 %v1101_v5  ;;  %987 = vmatpush3.msra.mxu0 %v1122_v11 }
  0x26   : > { %1000 = vmatprep.subr.mxu1 %v1106_v7  ;;  %988 = vmatprep.mubr.f32.mxu0 %v272_v34 }
  0x27   : > { %1001 = vmatpush3.msra.mxu1 %v1106_v7  ;;  %1002 = vmatprep.mubr.f32.mxu1 %v273_v39 }
  0x28   : > { %1008 = vmatprep.subr.mxu0 %v1125_v12  ;;  %989 = vmatmul.mubr.f32.vlgmr.msra.gmra.mxu0 %v282_v36 }
  0x29   : > { %1003 = vmatmul.mubr.f32.vlgmr.msra.gmra.mxu1 %v283_v41  ;;  %1009 = vmatpush3.msra.mxu0 %v1125_v12  ;;  %v816_v41 = vlaneseq }
  0x2a   : > { %1022 = vmatprep.subr.mxu1 %v1097_v3  ;;  %1010 = vmatprep.subr.mxu0 %v1129_v13 }
  0x2b   : > { %1023 = vmatpush3.msra.mxu1 %v1097_v3  ;;  %1011 = vmatpush3.msra.mxu0 %v1129_v13 }
  0x2c   : > { %1024 = vmatprep.subr.mxu1 %v1099_v4  ;;  %991 = vmatprep.mubr.f32.mxu0 %v292_v37 }
  0x2d   : > { %1005 = vmatprep.mubr.f32.mxu1 %v293_v42  ;;  %1012 = vmatprep.subr.mxu0 %v1132_v14  ;;  %v817_v42 = vand.u32 127, %v816_v41 }
  0x2e   : > { %1025 = vmatpush3.msra.mxu1 %v1099_v4  ;;  %992 = vmatmul.mubr.f32.gmra.mxu0 %v302_v40 }
  0x2f   : > { %1006 = vmatmul.mubr.f32.gmra.mxu1 %v303_v44  ;;  %1013 = vmatpush3.msra.mxu0 %v1132_v14  ;;  %vm818_vm1 = vcmp.lt.s32.totalorder %v817_v42, 32 }
  0x30   : > { %1026 = vmatprep.subr.mxu1 %v1101_v5  ;;  %1014 = vmatprep.subr.mxu0 %v1137_v15 }
  0x31   : > { %1027 = vmatpush3.msra.mxu1 %v1101_v5  ;;  %1015 = vmatpush3.msra.mxu0 %v1137_v15 }
  0x32   : > { %1028 = vmatprep.subr.mxu1 %v1106_v7  ;;  %1016 = vmatprep.mubr.f32.mxu0 %v1158_v29 }
  0x33   : > { %1029 = vmatpush3.msra.mxu1 %v1106_v7  ;;  %1030 = vmatprep.mubr.f32.mxu1 %v1158_v29 }
  0x34   : > { %1017 = vmatmul.mubr.f32.vlgmr.msra.gmra.mxu0 %v1161_v30  ;;  %1031 = vmatmul.mubr.f32.vlgmr.msra.gmra.mxu1 %v1161_v30 }
  0x35   : > { %1019 = vmatprep.mubr.f32.mxu0 %v1163_v31  ;;  %1033 = vmatprep.mubr.f32.mxu1 %v1163_v31 }
  0x38   : > { %1020 = vmatmul.mubr.f32.gmra.mxu0 %v1168_v35  ;;  %1034 = vmatmul.mubr.f32.gmra.mxu1 %v1168_v35 }
  0xdb   : > { %v962_v53 = vpop.f32.mrf.mxu0 }
  0xdc   : > { %v288_v62 = vadd.f32 %v962_v53, %v901_v60 }
  0xdd   : > { %v277_v54 = vpop.f32.mrf.mxu0 }
  0xde   : > { %v976_v52 = vpop.f32.mrf.mxu1  ;;  %v278_v1 = vadd.f32 %v901_v60, %v277_v54 }
  0xdf   : > { %v405_v3 = vadd.f32 %v976_v52, %v288_v62 }
  0xe0   : > { %v398_v55 = vpop.f32.mrf.mxu1 }
  0xe1   : > { %v399_v6 = vadd.f32 %v398_v55, %v278_v1 }
  0xe2   : > { %v965_v56 = vpop.f32.mrf.mxu0 }
  0xe3   : > { %v979_v57 = vpop.f32.mrf.mxu1  ;;  %v308_v4 = vadd.f32 %v965_v56, %v901_v60 }
  0xe4   : > { %v297_v58 = vpop.f32.mrf.mxu0 }
  0xe5   : > { %v410_v59 = vpop.f32.mrf.mxu1  ;;  %v298_v7 = vadd.f32 %v901_v60, %v297_v58  ;;  %v417_v11 = vadd.f32 %v979_v57, %v308_v4 }
  0xe7   : > { %v411_v14 = vadd.f32 %v410_v59, %v298_v7 }
  0xe8   : > { %v990_v61 = vpop.f32.mrf.mxu0 }
  0xe9   : > { %v1004_v63 = vpop.f32.mrf.mxu1  ;;  %v504_v8 = vadd.f32 %v990_v61, %v405_v3 }
  0xea   : > { %v496_v0 = vpop.f32.mrf.mxu0 }
  0xeb   : > { %v594_v2 = vpop.f32.mrf.mxu1  ;;  %v497_v12 = vadd.f32 %v496_v0, %v399_v6  ;;  %v603_v15 = vadd.f32 %v1004_v63, %v504_v8 }
  0xed   : > { %v595_v19 = vadd.f32 %v594_v2, %v497_v12 }
  0xee   : > { %v993_v5 = vpop.f32.mrf.mxu0 }
  0xef   : > { %v1007_v9 = vpop.f32.mrf.mxu1  ;;  %v518_v16 = vadd.f32 %v993_v5, %v417_v11 }
  0xf0   : > { %v510_v10 = vpop.f32.mrf.mxu0 }
  0xf1   : > { %v610_v13 = vpop.f32.mrf.mxu1  ;;  %v511_v20 = vadd.f32 %v510_v10, %v411_v14  ;;  %v619_v24 = vadd.f32 %v1007_v9, %v518_v16 }
  0xf3   : > { %v611_v29 = vadd.f32 %v610_v13, %v511_v20 }
  0xf4   : > { %v1018_v17 = vpop.f32.mrf.mxu0  ;;  %v1032_v18 = vpop.f32.mrf.mxu1 }
  0xf5   : > { %v708_v21 = vadd.f32 %v1018_v17, %v603_v15 }
  0xf6   : > { %v701_v22 = vpop.f32.mrf.mxu0  ;;  %v794_v23 = vpop.f32.mrf.mxu1 }
  0xf7   : > { %v801_v25 = vadd.f32 %v1032_v18, %v708_v21  ;;  %v702_v26 = vadd.f32 %v701_v22, %v595_v19 }
  0xf8   : > { %v1021_v27 = vpop.f32.mrf.mxu0  ;;  %v1035_v28 = vpop.f32.mrf.mxu1 }
  0xf9   : > { %v820_v30 = vmul.f32 2.0, %v801_v25  ;;  %v795_v31 = vadd.f32 %v794_v23, %v702_v26  ;;  %v720_v32 = vadd.f32 %v1021_v27, %v619_v24 }
  0xfa   : > { %v713_v33 = vpop.f32.mrf.mxu0  ;;  %v806_v37 = vpop.f32.mrf.mxu1 }
  0xfb   : > { %v819_v34 = vmul.f32 2.0, %v795_v31  ;;  %v813_v35 = vadd.f32 %v1035_v28, %v720_v32  ;;  %v714_v36 = vadd.f32 %v713_v33, %v611_v29  ;;  %1044 = vtanh.f32 %v820_v30 }
  0xfd   : > { %1046 = vtanh.f32 %v819_v34  ;;  %v822_v38 = vmul.f32 2.0, %v813_v35  ;;  %v807_v39 = vadd.f32 %v806_v37, %v714_v36 }
  0xff   : > { %v821_v40 = vmul.f32 2.0, %v807_v39  ;;  %1048 = vtanh.f32 %v822_v38 }
 0x101   : > { %1050 = vtanh.f32 %v821_v40 }
 0x108   : > { %v1045_v43 = vpop.eup %1044 }
 0x109   : > { %v828_v46 = vsel %vm818_vm1, %v1045_v43, %v801_v25 }
 0x10a   : > { %v1047_v44 = vpop.eup %1046  ;;  %833 = vst.msk [vmem:[%s172_s4 + $0x8] sm:$0xff] %vm831_vm2, %v828_v46 }
 0x10b   : > { %v827_v45 = vsel %vm818_vm1, %v1047_v44, %v795_v31 }
 0x10c   : > { %832 = vst.msk [vmem:[%s172_s4] sm:$0xff] %vm831_vm2, %v827_v45  ;;  %v1049_v47 = vpop.eup %1048 }
 0x10d   : > { %v830_v50 = vsel %vm818_vm1, %v1049_v47, %v813_v35 }
 0x10e   : > { %v1051_v48 = vpop.eup %1050  ;;  %835 = vst.msk [vmem:[%s172_s4 + $0x18] sm:$0xff] %vm831_vm2, %v830_v50 }
 0x10f   : > { %v829_v49 = vsel %vm818_vm1, %v1051_v48, %v807_v39 }
 0x110   : > { %834 = vst.msk [vmem:[%s172_s4 + $0x10] sm:$0xff] %vm831_vm2, %v829_v49 }
 0x111 PF: > { %s13_s12 = sadd.s32 1, %s1058_s12  }
 0x112   : > { %p10_p4 = scmp.ge.s32.totalorder %s13_s12, 4  }
 0x114   :  { %12 = sbr.rel (!%p10_p4) target bundleno = 1 (0x1), region = 62 }

// kernel: multirelation_forward.4
= control target key start
LH: loop header
LB: loop body
LE: loop exit
PB: predicated region body
PF: predicated region fallthrough
CT: control target
= control target key end

     0   :  { %s1313_s12 = smov 0   ;;  %s1686_s0 = inlined_call_operand.vmem [shape: f32[64,96], index: 0, kind: input, shape index: {}]   ;;  %s1687_s1 = inlined_call_operand.vmem [shape: f32[96,32], index: 1, kind: input, shape index: {}]   ;;  %s1688_s2 = inlined_call_operand.vmem [shape: f32[1,32], index: 2, kind: input, shape index: {}]   ;;  %s1689_s3 = inlined_call_operand.vmem [shape: f32[64,32], index: 3, kind: output, shape index: {}]  }
   0x1 LB: > { %s989_s13 = sadd.s32 4294967295, %s1291_s12   ;;  %p993_p0 = scmp.ge.s32.totalorder %s1291_s12, 1  ;;  %s1291_s12 = sphi %s1313_s12, %s13_s12  }
   0x2   : > { %p138_p1 = scmp.lt.s32.totalorder %s1291_s12, 3 }
   0x4   : > { %p139_p2 = pnand %p993_p0, %p138_p1 }
   0x5   : > { %s994_s20 = sshll.u32 (!%p139_p2), %s989_s13, 2 }
   0x6   : > { %142 = sbr.rel (%p139_p2) target bundleno = 305 (0x131), region = 32  ;;  %p163_p3 = scmp.lt.s32.totalorder (!%p139_p2), %s994_s20, 7 }
   0xb   : > { %v189_v0 = vld [vmem:[%s1687_s1 + $0x58] sm:$0xff]  ;;  %v188_v1 = vld [vmem:[%s1687_s1 + $0x50] sm:$0xff]  ;;  %v187_v2 = vld [vmem:[%s1687_s1 + $0x48] sm:$0xff]  ;;  %s1691_s20 = smov (!%p163_p3, %s994_s20), 7  ;;  %vm197_vm0 = vcmask 785408   ;;  %vm928_vm1 = vcmask 261120  }
   0xc   : > { %v1330_v3 = vand.u32 4294901760, %v189_v0  ;;  %v1332_v4 = vand.u32 4294901760, %v188_v1  ;;  %v1334_v5 = vand.u32 4294901760, %v187_v2  ;;  %v186_v6 = vld [vmem:[%s1687_s1 + $0x40] sm:$0xff]  ;;  %v185_v7 = vld [vmem:[%s1687_s1 + $0x38] sm:$0xff]  ;;  %v184_v8 = vld [vmem:[%s1687_s1 + $0x30] sm:$0xff] }
   0xd   : > { %v1345_v9 = vand.u32 4294901760, %v186_v6  ;;  %v1347_v10 = vand.u32 4294901760, %v185_v7  ;;  %v1349_v11 = vand.u32 4294901760, %v184_v8  ;;  %v183_v12 = vld [vmem:[%s1687_s1 + $0x28] sm:$0xff]  ;;  %v182_v13 = vld [vmem:[%s1687_s1 + $0x20] sm:$0xff]  ;;  %v181_v18 = vld [vmem:[%s1687_s1 + $0x18] sm:$0xff] }
   0xe   : > { %1097 = vmatprep.subr.mxu0 %v1330_v3  ;;  %v1359_v14 = vsub.f32 %v189_v0, %v1330_v3  ;;  %v1362_v15 = vsub.f32 %v188_v1, %v1332_v4  ;;  %v1364_v16 = vand.u32 4294901760, %v183_v12  ;;  %v1367_v17 = vsub.f32 %v187_v2, %v1334_v5  ;;  %v180_v32 = vld [vmem:[%s1687_s1 + $0x10] sm:$0xff]  ;;  %s995_s8 = sshll.u32 %s1691_s20, 3  ;;  %v179_v38 = vld [vmem:[%s1687_s1 + $0x8] sm:$0xff]  ;;  %v178_v46 = vld [vmem:[%s1687_s1] sm:$0xff] }
   0xf   : > { %1098 = vmatpush3.msra.mxu0 %v1330_v3  ;;  %v1374_v19 = vsub.f32 %v186_v6, %v1345_v9  ;;  %v1377_v20 = vsub.f32 %v185_v7, %v1347_v10  ;;  %v1389_v24 = vand.u32 4294901760, %v182_v13  ;;  %v1397_v26 = vand.u32 4294901760, %v181_v18  ;;  %s1425_s11 = scalar_lea.vmem %s1686_s0, %s995_s8  ;;  %s172_s22 = scalar_lea.vmem %s1689_s3, %s995_s8 }
  0x10   : > { %1099 = vmatprep.subr.mxu0 %v1332_v4  ;;  %v1381_v21 = vand.u32 4294901760, %v1359_v14  ;;  %v1384_v22 = vand.u32 4294901760, %v1362_v15  ;;  %v1387_v23 = vand.u32 4294901760, %v1367_v17  ;;  %v1403_v28 = vsub.f32 %v184_v8, %v1349_v11  ;;  %v174_v39 = vld [vmem:[%s1425_s11] sm:$0xff]  ;;  %v175_v40 = vld [vmem:[%s1425_s11 + $0x8] sm:$0xff] }
  0x11   : > { %1100 = vmatpush3.msra.mxu0 %v1332_v4  ;;  %v1395_v25 = vand.u32 4294901760, %v1374_v19  ;;  %v1400_v27 = vand.u32 4294901760, %v1377_v20  ;;  %v1416_v33 = vsub.f32 %v183_v12, %v1364_v16  ;;  %v1441_v43 = vand.u32 4294901760, %v180_v32 }
  0x12   : > { %1101 = vmatprep.subr.mxu0 %v1334_v5  ;;  %v339_v29 = vsub.f32 %v1359_v14, %v1381_v21  ;;  %v346_v30 = vsub.f32 %v1362_v15, %v1384_v22  ;;  %v353_v31 = vsub.f32 %v1367_v17, %v1387_v23  ;;  %v1431_v37 = vand.u32 4294901760, %v1403_v28 }
  0x13   : > { %1102 = vmatpush3.msra.mxu0 %v1334_v5  ;;  %v360_v36 = vsub.f32 %v1374_v19, %v1395_v25  ;;  %v367_v42 = vsub.f32 %v1377_v20, %v1400_v27  ;;  %v1444_v44 = vsub.f32 %v182_v13, %v1389_v24  ;;  %v1448_v45 = vand.u32 4294901760, %v1416_v33 }
  0x14   : > { %1103 = vmatprep.subr.mxu0 %v1345_v9  ;;  %v340_v34 = vand.u32 4294901760, %v339_v29  ;;  %v347_v35 = vand.u32 4294901760, %v346_v30  ;;  %v354_v41 = vand.u32 4294901760, %v353_v31  ;;  %v199_v47 = vsel %vm197_vm0, %v174_v39, 0  ;;  %v177_v39 = vld [vmem:[%s1425_s11 + $0x18] sm:$0xff] }
  0x15   : > { %1104 = vmatpush3.msra.mxu0 %v1345_v9  ;;  %v1455_v48 = vsub.f32 %v181_v18, %v1397_v26  ;;  %v202_v49 = vsel %vm197_vm0, %v175_v40, 0  ;;  %v1459_v50 = vand.u32 4294901760, %v179_v38  ;;  %v1461_v51 = vand.u32 4294901760, %v199_v47 }
  0x16   : > { %1105 = vmatprep.subr.mxu0 %v1347_v10  ;;  %1127 = vmatprep.subr.mxu1 %v340_v34  ;;  %v1463_v52 = vand.u32 4294901760, %v202_v49  ;;  %v361_v53 = vand.u32 4294901760, %v360_v36  ;;  %v374_v54 = vsub.f32 %v1403_v28, %v1431_v37  ;;  %v1469_v55 = vand.u32 4294901760, %v1444_v44 }
  0x17   : > { %1106 = vmatpush3.msra.mxu0 %v1347_v10  ;;  %1128 = vmatpush3.msra.mxu1 %v340_v34  ;;  %v1472_v56 = vand.u32 4294901760, %v178_v46  ;;  %v1475_v57 = vsub.f32 %v199_v47, %v1461_v51  ;;  %v1481_v59 = vsub.f32 %v180_v32, %v1441_v43  ;;  %v368_v60 = vand.u32 4294901760, %v367_v42 }
  0x18   : > { %1107 = vmatprep.subr.mxu0 %v1349_v11  ;;  %1129 = vmatprep.subr.mxu1 %v347_v35  ;;  %v1478_v58 = vsub.f32 %v202_v49, %v1463_v52  ;;  %v381_v61 = vsub.f32 %v1416_v33, %v1448_v45  ;;  %v1487_v62 = vand.u32 4294901760, %v1455_v48  ;;  %v1493_v1 = vsub.f32 %v179_v38, %v1459_v50 }
  0x19   : > { %1108 = vmatpush3.msra.mxu0 %v1349_v11  ;;  %1130 = vmatpush3.msra.mxu1 %v347_v35  ;;  %v289_v63 = vand.u32 4294901760, %v1475_v57  ;;  %v375_v2 = vand.u32 4294901760, %v374_v54  ;;  %v388_v6 = vsub.f32 %v1444_v44, %v1469_v55  ;;  %v1500_v7 = vand.u32 4294901760, %v1481_v59  ;;  %v176_v35 = vld [vmem:[%s1425_s11 + $0x10] sm:$0xff] }
  0x1a   : > { %1109 = vmatprep.subr.mxu0 %v1364_v16  ;;  %1131 = vmatprep.subr.mxu1 %v354_v41  ;;  %v299_v0 = vand.u32 4294901760, %v1478_v58  ;;  %v1503_v8 = vsub.f32 %v178_v46, %v1472_v56  ;;  %v382_v12 = vand.u32 4294901760, %v381_v61  ;;  %v395_v18 = vsub.f32 %v1455_v48, %v1487_v62 }
  0x1b   : > { %1110 = vmatpush3.msra.mxu0 %v1364_v16  ;;  %1132 = vmatpush3.msra.mxu1 %v354_v41  ;;  %v290_v13 = vsub.f32 %v1475_v57, %v289_v63  ;;  %v1516_v30 = vand.u32 4294901760, %v1493_v1  ;;  %v389_v31 = vand.u32 4294901760, %v388_v6  ;;  %v402_v32 = vsub.f32 %v1481_v59, %v1500_v7 }
  0x1c   : > { %1111 = vmatprep.subr.mxu0 %v1389_v24  ;;  %1133 = vmatprep.subr.mxu1 %v361_v53  ;;  %v300_v29 = vsub.f32 %v1478_v58, %v299_v0  ;;  %v1523_v34 = vand.u32 4294901760, %v1503_v8  ;;  %v396_v38 = vand.u32 4294901760, %v395_v18  ;;  %v205_v42 = vsel %vm197_vm0, %v176_v35, 0 }
  0x1d   : > { %1112 = vmatpush3.msra.mxu0 %v1389_v24  ;;  %1134 = vmatpush3.msra.mxu1 %v361_v53  ;;  %v291_v36 = vand.u32 4294901760, %v290_v13  ;;  %v409_v41 = vsub.f32 %v1493_v1, %v1516_v30  ;;  %v403_v46 = vand.u32 4294901760, %v402_v32  ;;  %v208_v49 = vsel %vm197_vm0, %v177_v39, 0 }
  0x1e   : > { %1113 = vmatprep.subr.mxu0 %v1397_v26  ;;  %1135 = vmatprep.subr.mxu1 %v368_v60  ;;  %v301_v40 = vand.u32 4294901760, %v300_v29  ;;  %v416_v47 = vsub.f32 %v1503_v8, %v1523_v34  ;;  %v1538_v54 = vand.u32 4294901760, %v205_v42 }
  0x1f   : > { %1114 = vmatpush3.msra.mxu0 %v1397_v26  ;;  %1136 = vmatpush3.msra.mxu1 %v368_v60  ;;  %v410_v53 = vand.u32 4294901760, %v409_v41  ;;  %v1541_v60 = vand.u32 4294901760, %v208_v49 }
  0x20   : > { %1115 = vmatprep.subr.mxu0 %v1441_v43  ;;  %1137 = vmatprep.subr.mxu1 %v375_v2  ;;  %v417_v61 = vand.u32 4294901760, %v416_v47 }
  0x21   : > { %1116 = vmatpush3.msra.mxu0 %v1441_v43  ;;  %1138 = vmatpush3.msra.mxu1 %v375_v2  ;;  %v1547_v2 = vsub.f32 %v205_v42, %v1538_v54 }
  0x22   : > { %1117 = vmatprep.subr.mxu0 %v1459_v50  ;;  %1139 = vmatprep.subr.mxu1 %v382_v12 }
  0x23   : > { %1118 = vmatpush3.msra.mxu0 %v1459_v50  ;;  %1140 = vmatpush3.msra.mxu1 %v382_v12 }
  0x24   : > { %1119 = vmatprep.subr.mxu0 %v1472_v56  ;;  %1141 = vmatprep.subr.mxu1 %v389_v31 }
  0x25   : > { %1120 = vmatpush3.msra.mxu0 %v1472_v56  ;;  %1142 = vmatpush3.msra.mxu1 %v389_v31 }
  0x26   : > { %1121 = vmatprep.mubr.f32.mxu0 %v291_v36  ;;  %1143 = vmatprep.subr.mxu1 %v396_v38 }
  0x27   : > { %1157 = vmatprep.subr.mxu0 %v1359_v14  ;;  %1122 = vmatmul.mubr.f32.vlgmr.msra.gmra.mxu0 %v301_v40 }
  0x28   : > { %1144 = vmatpush3.msra.mxu1 %v396_v38  ;;  %1158 = vmatpush3.msra.mxu0 %v1359_v14  ;;  %v1551_v14 = vsub.f32 %v208_v49, %v1541_v60 }
  0x29   : > { %1145 = vmatprep.subr.mxu1 %v403_v46  ;;  %1159 = vmatprep.subr.mxu0 %v1362_v15 }
  0x2a   : > { %1146 = vmatpush3.msra.mxu1 %v403_v46  ;;  %1160 = vmatpush3.msra.mxu0 %v1362_v15  ;;  %v309_v15 = vand.u32 4294901760, %v1547_v2 }
  0x2b   : > { %1147 = vmatprep.subr.mxu1 %v410_v53  ;;  %1161 = vmatprep.subr.mxu0 %v1367_v17 }
  0x2c   : > { %1148 = vmatpush3.msra.mxu1 %v410_v53  ;;  %1162 = vmatpush3.msra.mxu0 %v1367_v17  ;;  %v319_v17 = vand.u32 4294901760, %v1551_v14 }
  0x2d   : > { %1149 = vmatprep.subr.mxu1 %v417_v61  ;;  %1163 = vmatprep.subr.mxu0 %v1374_v19 }
  0x2e   : > { %1150 = vmatpush3.msra.mxu1 %v417_v61  ;;  %1151 = vmatprep.mubr.f32.mxu1 %v1461_v51 }
  0x2f   : > { %1164 = vmatpush3.msra.mxu0 %v1374_v19  ;;  %1152 = vmatmul.mubr.f32.vlgmr.msra.gmra.mxu1 %v1463_v52  ;;  %v310_v19 = vsub.f32 %v1547_v2, %v309_v15 }
  0x30   : > { %1165 = vmatprep.subr.mxu0 %v1377_v20  ;;  %1187 = vmatprep.subr.mxu1 %v1330_v3 }
  0x31   : > { %1166 = vmatpush3.msra.mxu0 %v1377_v20  ;;  %1188 = vmatpush3.msra.mxu1 %v1330_v3  ;;  %v320_v20 = vsub.f32 %v1551_v14, %v319_v17 }
  0x32   : > { %1167 = vmatprep.subr.mxu0 %v1403_v28  ;;  %1189 = vmatprep.subr.mxu1 %v1332_v4 }
  0x33   : > { %1168 = vmatpush3.msra.mxu0 %v1403_v28  ;;  %1190 = vmatpush3.msra.mxu1 %v1332_v4  ;;  %v311_v28 = vand.u32 4294901760, %v310_v19  ;;  %v321_v6 = vand.u32 4294901760, %v320_v20 }
  0x34   : > { %1169 = vmatprep.subr.mxu0 %v1416_v33  ;;  %1191 = vmatprep.subr.mxu1 %v1334_v5 }
  0x35   : > { %1170 = vmatpush3.msra.mxu0 %v1416_v33  ;;  %1192 = vmatpush3.msra.mxu1 %v1334_v5 }
  0x36   : > { %1171 = vmatprep.subr.mxu0 %v1444_v44  ;;  %1193 = vmatprep.subr.mxu1 %v1345_v9 }
  0x37   : > { %1172 = vmatpush3.msra.mxu0 %v1444_v44  ;;  %1194 = vmatpush3.msra.mxu1 %v1345_v9 }
  0x38   : > { %1173 = vmatprep.subr.mxu0 %v1455_v48  ;;  %1195 = vmatprep.subr.mxu1 %v1347_v10 }
  0x39   : > { %1174 = vmatpush3.msra.mxu0 %v1455_v48  ;;  %1196 = vmatpush3.msra.mxu1 %v1347_v10 }
  0x3a   : > { %1175 = vmatprep.subr.mxu0 %v1481_v59  ;;  %1197 = vmatprep.subr.mxu1 %v1349_v11 }
  0x3b   : > { %1124 = vmatprep.mubr.f32.mxu0 %v311_v28  ;;  %1176 = vmatpush3.msra.mxu0 %v1481_v59 }
  0x3c   : > { %1198 = vmatpush3.msra.mxu1 %v1349_v11  ;;  %1125 = vmatmul.mubr.f32.gmra.mxu0 %v321_v6 }
  0x3d   : > { %1177 = vmatprep.subr.mxu0 %v1493_v1  ;;  %1199 = vmatprep.subr.mxu1 %v1364_v16 }
  0x3e   : > { %1178 = vmatpush3.msra.mxu0 %v1493_v1  ;;  %1200 = vmatpush3.msra.mxu1 %v1364_v16 }
  0x3f   : > { %1179 = vmatprep.subr.mxu0 %v1503_v8  ;;  %1201 = vmatprep.subr.mxu1 %v1389_v24 }
  0x40   : > { %1180 = vmatpush3.msra.mxu0 %v1503_v8  ;;  %1181 = vmatprep.mubr.f32.mxu0 %v1475_v57 }
  0x41   : > { %1202 = vmatpush3.msra.mxu1 %v1389_v24  ;;  %1182 = vmatmul.mubr.f32.vlgmr.msra.gmra.mxu0 %v1478_v58 }
  0x42   : > { %1203 = vmatprep.subr.mxu1 %v1397_v26  ;;  %1217 = vmatprep.subr.mxu0 %v1381_v21 }
  0x43   : > { %1204 = vmatpush3.msra.mxu1 %v1397_v26  ;;  %1218 = vmatpush3.msra.mxu0 %v1381_v21 }
  0x44   : > { %1154 = vmatprep.mubr.f32.mxu1 %v1538_v54  ;;  %1205 = vmatprep.subr.mxu1 %v1441_v43 }
  0x45   : > { %1219 = vmatprep.subr.mxu0 %v1384_v22  ;;  %1155 = vmatmul.mubr.f32.gmra.mxu1 %v1541_v60 }
  0x46   : > { %1206 = vmatpush3.msra.mxu1 %v1441_v43  ;;  %1220 = vmatpush3.msra.mxu0 %v1384_v22 }
  0x47   : > { %1184 = vmatprep.mubr.f32.mxu0 %v1547_v2  ;;  %1207 = vmatprep.subr.mxu1 %v1459_v50 }
  0x48   : > { %1221 = vmatprep.subr.mxu0 %v1387_v23  ;;  %1185 = vmatmul.mubr.f32.gmra.mxu0 %v1551_v14 }
  0x49   : > { %1208 = vmatpush3.msra.mxu1 %v1459_v50  ;;  %1222 = vmatpush3.msra.mxu0 %v1387_v23 }
  0x4a   : > { %1209 = vmatprep.subr.mxu1 %v1472_v56  ;;  %1223 = vmatprep.subr.mxu0 %v1395_v25 }
  0x4b   : > { %1210 = vmatpush3.msra.mxu1 %v1472_v56  ;;  %1211 = vmatprep.mubr.f32.mxu1 %v289_v63 }
  0x4c   : > { %1224 = vmatpush3.msra.mxu0 %v1395_v25  ;;  %1212 = vmatmul.mubr.f32.vlgmr.msra.gmra.mxu1 %v299_v0 }
  0x4d   : > { %1225 = vmatprep.subr.mxu0 %v1400_v27  ;;  %1247 = vmatprep.subr.mxu1 %v1330_v3 }
  0x4e   : > { %1226 = vmatpush3.msra.mxu0 %v1400_v27  ;;  %1248 = vmatpush3.msra.mxu1 %v1330_v3 }
  0x4f   : > { %1227 = vmatprep.subr.mxu0 %v1431_v37  ;;  %1249 = vmatprep.subr.mxu1 %v1332_v4 }
  0x50   : > { %1214 = vmatprep.mubr.f32.mxu1 %v309_v15  ;;  %1228 = vmatpush3.msra.mxu0 %v1431_v37 }
  0x51   : > { %1250 = vmatpush3.msra.mxu1 %v1332_v4  ;;  %1229 = vmatprep.subr.mxu0 %v1448_v45 }
  0x52   : > { %1215 = vmatmul.mubr.f32.gmra.mxu1 %v319_v17  ;;  %1251 = vmatprep.subr.mxu1 %v1334_v5 }
  0x53   : > { %1230 = vmatpush3.msra.mxu0 %v1448_v45  ;;  %1252 = vmatpush3.msra.mxu1 %v1334_v5 }
  0x54   : > { %1231 = vmatprep.subr.mxu0 %v1469_v55  ;;  %1253 = vmatprep.subr.mxu1 %v1345_v9 }
  0x55   : > { %1232 = vmatpush3.msra.mxu0 %v1469_v55  ;;  %1254 = vmatpush3.msra.mxu1 %v1345_v9 }
  0x56   : > { %1233 = vmatprep.subr.mxu0 %v1487_v62  ;;  %1255 = vmatprep.subr.mxu1 %v1347_v10 }
  0x57   : > { %1234 = vmatpush3.msra.mxu0 %v1487_v62  ;;  %1256 = vmatpush3.msra.mxu1 %v1347_v10 }
  0x58   : > { %1235 = vmatprep.subr.mxu0 %v1500_v7  ;;  %1257 = vmatprep.subr.mxu1 %v1349_v11 }
  0x59   : > { %1236 = vmatpush3.msra.mxu0 %v1500_v7  ;;  %1258 = vmatpush3.msra.mxu1 %v1349_v11 }
  0x5a   : > { %1237 = vmatprep.subr.mxu0 %v1516_v30  ;;  %1259 = vmatprep.subr.mxu1 %v1364_v16 }
  0x5b   : > { %1238 = vmatpush3.msra.mxu0 %v1516_v30  ;;  %1260 = vmatpush3.msra.mxu1 %v1364_v16 }
  0x5c   : > { %1239 = vmatprep.subr.mxu0 %v1523_v34  ;;  %1261 = vmatprep.subr.mxu1 %v1389_v24 }
  0x5d   : > { %1240 = vmatpush3.msra.mxu0 %v1523_v34  ;;  %1241 = vmatprep.mubr.f32.mxu0 %v1461_v51 }
  0x5e   : > { %1262 = vmatpush3.msra.mxu1 %v1389_v24  ;;  %1242 = vmatmul.mubr.f32.vlgmr.msra.gmra.mxu0 %v1463_v52 }
  0x5f   : > { %1263 = vmatprep.subr.mxu1 %v1397_v26  ;;  %1244 = vmatprep.mubr.f32.mxu0 %v1538_v54 }
  0x60   : > { %1264 = vmatpush3.msra.mxu1 %v1397_v26  ;;  %1271 = vmatprep.mubr.f32.mxu1 %v1461_v51  ;;  %v998_v26 = vld [vmem:[%s1688_s2] ss:$0 sm:$0xff] }
  0x61   : > { %1265 = vmatprep.subr.mxu1 %v1441_v43 }
  0x62   : > { %1266 = vmatpush3.msra.mxu1 %v1441_v43  ;;  %1245 = vmatmul.mubr.f32.gmra.mxu0 %v1541_v60 }
  0x63   : > { %1267 = vmatprep.subr.mxu1 %v1459_v50 }
  0x64   : > { %1268 = vmatpush3.msra.mxu1 %v1459_v50 }
  0x65   : > { %1269 = vmatprep.subr.mxu1 %v1472_v56 }
  0x66   : > { %1270 = vmatpush3.msra.mxu1 %v1472_v56 }
  0x67   : > { %1272 = vmatmul.mubr.f32.vlgmr.msra.gmra.mxu1 %v1463_v52 }
  0x68   : > { %1274 = vmatprep.mubr.f32.mxu1 %v1538_v54 }
  0x6b   : > { %1275 = vmatmul.mubr.f32.gmra.mxu1 %v1541_v60 }
  0xe7   : > { %v1123_v3 = vpop.f32.mrf.mxu0 }
  0xe8   : > { %v304_v44 = vadd.f32 %v1123_v3, %v998_v26 }
  0xe9   : > { %v293_v4 = vpop.f32.mrf.mxu0 }
  0xea   : > { %v294_v37 = vadd.f32 %v998_v26, %v293_v4 }
  0xef   : > { %v1153_v9 = vpop.f32.mrf.mxu1 }
  0xf0   : > { %v461_v55 = vadd.f32 %v1153_v9, %v304_v44 }
  0xf1   : > { %v454_v11 = vpop.f32.mrf.mxu1 }
  0xf2   : > { %v455_v52 = vadd.f32 %v454_v11, %v294_v37 }
  0xfc   : > { %v1126_v5 = vpop.f32.mrf.mxu0 }
  0xfd   : > { %v324_v48 = vadd.f32 %v1126_v5, %v998_v26 }
  0xfe   : > { %v313_v10 = vpop.f32.mrf.mxu0 }
  0xff   : > { %v314_v45 = vadd.f32 %v998_v26, %v313_v10 }
 0x101   : > { %v1183_v16 = vpop.f32.mrf.mxu0 }
 0x102   : > { %v576_v58 = vadd.f32 %v1183_v16, %v461_v55 }
 0x103   : > { %v568_v22 = vpop.f32.mrf.mxu0 }
 0x104   : > { %v569_v56 = vadd.f32 %v568_v22, %v455_v52 }
 0x105   : > { %v1156_v21 = vpop.f32.mrf.mxu1 }
 0x106   : > { %v473_v59 = vadd.f32 %v1156_v21, %v324_v48 }
 0x107   : > { %v466_v23 = vpop.f32.mrf.mxu1 }
 0x108   : > { %v1186_v24 = vpop.f32.mrf.mxu0  ;;  %v467_v57 = vadd.f32 %v466_v23, %v314_v45 }
 0x109   : > { %v590_v13 = vadd.f32 %v1186_v24, %v473_v59 }
 0x10a   : > { %v582_v27 = vpop.f32.mrf.mxu0 }
 0x10b   : > { %v583_v8 = vadd.f32 %v582_v27, %v467_v57 }
 0x10c   : > { %v1213_v25 = vpop.f32.mrf.mxu1 }
 0x10d   : > { %v683_v1 = vadd.f32 %v1213_v25, %v576_v58 }
 0x10e   : > { %v674_v33 = vpop.f32.mrf.mxu1 }
 0x10f   : > { %v675_v0 = vadd.f32 %v674_v33, %v569_v56 }
 0x112   : > { %v1216_v50 = vpop.f32.mrf.mxu1 }
 0x113   : > { %v699_v34 = vadd.f32 %v1216_v50, %v590_v13 }
 0x114   : > { %v690_v62 = vpop.f32.mrf.mxu1 }
 0x115   : > { %v691_v31 = vadd.f32 %v690_v62, %v583_v8 }
 0x11e   : > { %v1243_v43 = vpop.f32.mrf.mxu0 }
 0x11f   : > { %v812_v18 = vadd.f32 %v1243_v43, %v683_v1 }
 0x120   : > { %v805_v51 = vpop.f32.mrf.mxu0 }
 0x121   : > { %v806_v12 = vadd.f32 %v805_v51, %v675_v0 }
 0x122   : > { %v1246_v63 = vpop.f32.mrf.mxu0 }
 0x123   : > { %v824_v39 = vadd.f32 %v1246_v63, %v699_v34 }
 0x124   : > { %v817_v29 = vpop.f32.mrf.mxu0 }
 0x125   : > { %v818_v38 = vadd.f32 %v817_v29, %v691_v31 }
 0x127   : > { %v1273_v7 = vpop.f32.mrf.mxu1 }
 0x128   : > { %v913_v35 = vadd.f32 %v1273_v7, %v812_v18 }
 0x129   : > { %v906_v30 = vpop.f32.mrf.mxu1 }
 0x12a   : > { %v907_v32 = vadd.f32 %v906_v30, %v806_v12  ;;  %930 = vst.msk [vmem:[%s172_s22 + $0x8] sm:$0xff] %vm928_vm1, %v913_v35 }
 0x12b   : > { %v1276_v36 = vpop.f32.mrf.mxu1 }
 0x12c   : > { %929 = vst.msk [vmem:[%s172_s22] sm:$0xff] %vm928_vm1, %v907_v32  ;;  %v925_v42 = vadd.f32 %v1276_v36, %v824_v39 }
 0x12d   : > { %v918_v40 = vpop.f32.mrf.mxu1 }
 0x12e   : > { %v919_v41 = vadd.f32 %v918_v40, %v818_v38  ;;  %932 = vst.msk [vmem:[%s172_s22 + $0x18] sm:$0xff] %vm928_vm1, %v925_v42 }
 0x130   : > { %931 = vst.msk [vmem:[%s172_s22 + $0x10] sm:$0xff] %vm928_vm1, %v919_v41 }
 0x131 PF: > { %s13_s12 = sadd.s32 1, %s1291_s12  }
 0x132   : > { %p10_p4 = scmp.ge.s32.totalorder %s13_s12, 4  }
 0x134   :  { %12 = sbr.rel (!%p10_p4) target bundleno = 1 (0x1), region = 62 }

// kernel: multirelation_forward.5
= control target key start
LH: loop header
LB: loop body
LE: loop exit
PB: predicated region body
PF: predicated region fallthrough
CT: control target
= control target key end

     0   :  { %s7008_s27 = smov 0   ;;  %s7010_s28 = smov 0   ;;  %s9173_s0 = inlined_call_operand.vmem [shape: f32[2,64,8,32], index: 0, kind: input, shape index: {}]   ;;  %s9174_s1 = inlined_call_operand.vmem [shape: f32[2,64,8,8], index: 1, kind: input, shape index: {}]   ;;  %s9175_s2 = inlined_call_operand.vmem [shape: f32[2,64,32], index: 2, kind: input, shape index: {}]   ;;  %s9176_s3 = inlined_call_operand.vmem [shape: f32[2,64,8], index: 3, kind: input, shape index: {}]   ;;  %s9177_s4 = inlined_call_operand.vmem [shape: f32[2,1,32], index: 4, kind: input, shape index: {}]   ;;  %s9178_s5 = inlined_call_operand.vmem [shape: f32[8,32], index: 5, kind: input, shape index: {}]   ;;  %s9179_s6 = inlined_call_operand.vmem [shape: f32[2,32,32], index: 6, kind: input, shape index: {}]   ;;  %s9180_s7 = inlined_call_operand.vmem [shape: f32[1,32], index: 7, kind: input, shape index: {}]   ;;  %s9181_s8 = inlined_call_operand.vmem [shape: f32[64,32], index: 8, kind: output, shape index: {}]  }
   0x1   :  { %s7012_s29 = smov 0   ;;  %s7014_s30 = smov 0  }
   0x2   :  { %s7016_s9 = smov 0  }
   0x3 LB: > { %s27_s10 = sadd.s32 1, %s6950_s29  ;;  %s30_s11 = sadd.s32 1, %s6954_s30  ;;  %s6958_s9 = sphi %s7016_s9, %s18_s9   ;;  %s6954_s30 = sphi %s7014_s30, %s9344_s30   ;;  %s6950_s29 = sphi %s7012_s29, %s9343_s29   ;;  %s6946_s28 = sphi %s7010_s28, %s9342_s28   ;;  %s6942_s27 = sphi %s7008_s27, %s9341_s27  }
   0x4   : > { %p28_p0 = scmp.ge.s32.totalorder %s27_s10, 2  ;;  %p5897_p1 = scmp.ge.s32.totalorder %s6958_s9, 1 }
   0x5   : > { %p350_p2 = scmp.lt.s32.totalorder %s6958_s9, 5 }
   0x6   : > { %s9346_s10 = smov (%p28_p0, %s27_s10), 0  ;;  %s9348_s11 = smov (!%p28_p0, %s30_s11), %s6954_s30 }
   0x7   : > { %p351_p3 = pnand %p5897_p1, %p350_p2  ;;  %p32_p4 = scmp.ge.s32.totalorder %s9348_s11, 2 }
   0x9   : > { %s9350_s11 = smov (%p32_p4, %s9348_s11), 0  ;;  %354 = sbr.rel (%p351_p3) target bundleno = 1350 (0x546), region = 52 }
   0xe   : > { %v550_v0 = vld [vmem:[%s9178_s5] sm:$0xff]  ;;  %s5898_s14 = sshll.u32 %s6946_s28, 5  ;;  %p424_p5 = scmp.lt.s32.totalorder %s6942_s27, 1  ;;  %v6960_v2 = vmov 1966171168   ;;  %v563_v4 = vlaneseq  ;;  %vm1043_vm0 = vcmask 64512  }
   0xf   : > { %v7047_v1 = vand.u32 4294901760, %v550_v0  ;;  %p426_p6 = scmp.lt.s32.totalorder %s5898_s14, 63  ;;  %s5904_s15 = sshll.u32 %s6946_s28, 2  ;;  %v561_v3 = vunpack.c.l.s4 %v6960_v2 }
  0x10   : > { %s7051_s16 = scalar_select %p424_p5, %s6942_s27, 1  ;;  %v564_v8 = vshrl.u32 %v563_v4, 7 }
  0x11   : > { %6199 = vmatprep.subr.mxu0 %v7047_v1  ;;  %v7055_v5 = vsub.f32 %v550_v0, %v7047_v1  ;;  %s9352_s14 = smov (!%p426_p6, %s5898_s14), 63  ;;  %p446_p7 = scmp.lt.s32.totalorder %s5904_s15, 7  ;;  %v562_v7 = vunpack.c.0.s8 %v561_v3 }
  0x12   : > { %6200 = vmatpush3.msra.mxu0 %v7047_v1  ;;  %s5899_s17 = sshll.u32 %s7051_s16, 6  ;;  %s5905_s19 = sshll.u32 %s7051_s16, 3  ;;  %v7099_v17 = vsub.s32 0, %v564_v8 }
  0x13   : > { %v7060_v6 = vand.u32 4294901760, %v7055_v5  ;;  %6299 = vmatprep.subr.mxu0 %v7055_v5  ;;  %s7063_s18 = sadd.s32 %s5899_s17, %s9352_s14  ;;  %s9354_s15 = smov (!%p446_p7, %s5904_s15), 7  ;;  %v7075_v11 = vsub.s32 %v562_v7, %v564_v8 }
  0x14   : > { %s5900_s20 = sshll.u32 %s7063_s18, 3  ;;  %s5952_s21 = sshll.u32 %s7051_s16, 5 }
  0x15   : > { %v2168_v9 = vsub.f32 %v7055_v5, %v7060_v6  ;;  %s7070_s22 = sadd.s32 %s5905_s19, %s9354_s15  ;;  %s470_s25 = scalar_lea.vmem %s9179_s6, %s5952_s21 }
  0x16   : > { %s5906_s26 = sshll.u32 %s7070_s22, 3  ;;  %s5913_s28 = sshll.u32 %s9354_s15, 3  ;;  %v7078_v12 = vld [vmem:[%s470_s25] sm:$0xff]  ;;  %v7080_v13 = vld [vmem:[%s470_s25 + $0x8] sm:$0xff]  ;;  %v7082_v14 = vld [vmem:[%s470_s25 + $0x10] sm:$0xff] }
  0x17   : > { %v2169_v10 = vand.u32 4294901760, %v2168_v9  ;;  %9252 = vst [vmem:[#allocation3_spill] sm:$0xff] %v7078_v12  ;;  %9253 = vst [vmem:[#allocation4_spill] sm:$0xff] %v7080_v13  ;;  %s7089_s14 = scalar_lea.vmem %s9176_s3, %s5906_s26  ;;  %s7094_s21 = scalar_lea.vmem %s9181_s8, %s5913_s28  ;;  %v7096_v15 = vld [vmem:[%s470_s25 + $0x18] sm:$0xff] }
  0x18   : > { %9254 = vst [vmem:[#allocation5_spill] sm:$0xff] %v7082_v14  ;;  %9255 = vst [vmem:[#allocation6_spill] sm:$0xff] %v7096_v15  ;;  %v545_v16 = vld [vmem:[%s7089_s14] sm:$0xff]  ;;  %v546_v18 = vld [vmem:[%s7089_s14 + $0x8] sm:$0xff]  ;;  %s7108_s24 = scalar_lea.vmem %s9174_s1, %s5900_s20  ;;  %s8306_s12 = scalar_lea.vmem %s9173_s0, %s5900_s20 }
  0x19   : > { %6249 = vmatprep.subr.mxu1 %v2169_v10  ;;  %v559_v19 = vcombine.high %v545_v16, %v545_v16  ;;  %v566_v20 = vrot.slane %v545_v16, %v7075_v11  ;;  %v615_v21 = vrot.slane %v546_v18, %v7075_v11  ;;  %v608_v22 = vcombine.high %v546_v18, %v546_v18  ;;  %v509_v27 = vld [vmem:[%s7108_s24] sm:$0xff]  ;;  %v510_v35 = vld [vmem:[%s7108_s24 + $0x8] sm:$0xff]  ;;  %v511_v36 = vld [vmem:[%s7108_s24 + $0x10] sm:$0xff]  ;;  %s465_s13 = scalar_lea.vmem %s9177_s4, %s7051_s16  ;;  %s8860_s17 = scalar_lea.vmem %s9175_s2, %s5906_s26 }
  0x1a   : > { %6250 = vmatpush3.msra.mxu1 %v2169_v10  ;;  %v517_v34 = vld [vmem:[%s7108_s24 + $0x40] sm:$0xff]  ;;  %v512_v53 = vld [vmem:[%s7108_s24 + $0x18] sm:$0xff]  ;;  %v514_v56 = vld [vmem:[%s7108_s24 + $0x28] sm:$0xff]  ;;  %p5947_p8 = scmp.ne.s32.totalorder %s6942_s27, 0 }
  0x1b   : > { %6349 = vmatprep.subr.mxu1 %v7047_v1  ;;  %v574_v23 = vcombine.high %v566_v20, %v566_v20  ;;  %v582_v24 = vrot.slane %v566_v20, %v7075_v11  ;;  %v573_v25 = vrot.slane %v559_v19, %v7075_v11  ;;  %v7115_v26 = vrot.slane %v615_v21, %v7075_v11  ;;  %v513_v45 = vld [vmem:[%s7108_s24 + $0x20] sm:$0xff]  ;;  %v515_v20 = vld [vmem:[%s7108_s24 + $0x30] sm:$0xff] }
  0x1c   : > { %v623_v28 = vcombine.high %v615_v21, %v615_v21  ;;  %v7119_v29 = vrot.slane %v608_v22, %v7075_v11 }
  0x1d   : > { %v604_v30 = vcombine.high %v582_v24, %v582_v24  ;;  %v758_v31 = vrot.slane %v582_v24, %v7099_v17  ;;  %v596_v32 = vrot.slane %v574_v23, %v7075_v11  ;;  %v589_v33 = vrot.slane %v573_v25, %v7075_v11 }
  0x1e   : > { %v575_v37 = vcombine.high %v573_v25, %v573_v25  ;;  %v790_v38 = vrot.slane %v7115_v26, %v7099_v17  ;;  %v7130_v39 = vrot.slane %v623_v28, %v7075_v11  ;;  %v653_v40 = vcombine.high %v7115_v26, %v7115_v26 }
  0x1f   : > { %v915_v41 = vadd.f32 %v758_v31, %v509_v27  ;;  %v762_v42 = vrot.slane %v596_v32, %v7099_v17  ;;  %v766_v43 = vrot.slane %v604_v30, %v7099_v17  ;;  %v606_v44 = vcombine.high %v596_v32, %v596_v32 }
  0x20   : > { %v774_v46 = vrot.slane %v589_v33, %v7099_v17  ;;  %v7139_v47 = vrot.slane %v575_v37, %v7075_v11  ;;  %v605_v48 = vcombine.high %v589_v33, %v589_v33  ;;  %v7141_v49 = vadd.f32 %v790_v38, %v517_v34 }
  0x21   : > { %vm947_vm1 = vcmp.gt.f32.partialorder %v915_v41, 0.0  ;;  %v979_v50 = vmul.f32 0.01, %v915_v41  ;;  %v916_v51 = vadd.f32 %v762_v42, %v510_v35  ;;  %v917_v52 = vadd.f32 %v766_v43, %v511_v36 }
  0x22   : > { %v770_v54 = vrot.slane %v606_v44, %v7099_v17  ;;  %v919_v55 = vadd.f32 %v774_v46, %v513_v45  ;;  %v778_v57 = vrot.slane %v7139_v47, %v7099_v17  ;;  %v782_v58 = vrot.slane %v605_v48, %v7099_v17 }
  0x23   : > { %v7149_v59 = vsel %vm947_vm1, %v915_v41, %v979_v50  ;;  %vm948_vm2 = vcmp.gt.f32.partialorder %v916_v51, 0.0  ;;  %v980_v60 = vmul.f32 0.01, %v916_v51  ;;  %vm949_vm3 = vcmp.gt.f32.partialorder %v917_v52, 0.0 }
  0x24   : > { %v1044_v61 = vsel %vm1043_vm0, %v7149_v59, -inf  ;;  %v981_v62 = vmul.f32 0.01, %v917_v52  ;;  %v918_v63 = vadd.f32 %v770_v54, %v512_v53  ;;  %vm951_vm4 = vcmp.gt.f32.partialorder %v919_v55, 0.0 }
  0x25   : > { %v1045_v0 = vrot.slane %v1044_v61, 4  ;;  %v7153_v2 = vsel %vm948_vm2, %v916_v51, %v980_v60  ;;  %v983_v3 = vmul.f32 0.01, %v919_v55  ;;  %v920_v4 = vadd.f32 %v778_v57, %v514_v56 }
  0x26   : > { %v1051_v7 = vsel %vm1043_vm0, %v7153_v2, -inf  ;;  %v7157_v8 = vsel %vm949_vm3, %v917_v52, %v981_v62  ;;  %vm950_vm5 = vcmp.gt.f32.partialorder %v918_v63, 0.0  ;;  %v982_v9 = vmul.f32 0.01, %v918_v63 }
  0x27   : > { %v1046_v10 = vmax.f32 %v1044_v61, %v1045_v0  ;;  %v1052_v16 = vrot.slane %v1051_v7, 4  ;;  %v1058_v18 = vsel %vm1043_vm0, %v7157_v8, -inf  ;;  %v7161_v19 = vsel %vm951_vm4, %v919_v55, %v983_v3  ;;  %v516_v61 = vld [vmem:[%s7108_s24 + $0x38] sm:$0xff] }
  0x28   : > { %v1059_v21 = vrot.slane %v1058_v18, 4  ;;  %v7164_v22 = vsel %vm950_vm5, %v918_v63, %v982_v9  ;;  %v1072_v23 = vsel %vm1043_vm0, %v7161_v19, -inf  ;;  %vm952_vm6 = vcmp.gt.f32.partialorder %v920_v4, 0.0 }
  0x29   : > { %v1047_v24 = vrot.slane %v1046_v10, 2  ;;  %v1053_v25 = vmax.f32 %v1051_v7, %v1052_v16  ;;  %v1065_v27 = vsel %vm1043_vm0, %v7164_v22, -inf  ;;  %v1073_v28 = vrot.slane %v1072_v23, 4 }
  0x2a   : > { %v1060_v30 = vmax.f32 %v1058_v18, %v1059_v21  ;;  %v1066_v31 = vrot.slane %v1065_v27, 4  ;;  %v984_v32 = vmul.f32 0.01, %v920_v4  ;;  %v921_v33 = vadd.f32 %v782_v58, %v515_v20 }
  0x2b   : > { %v1048_v34 = vmax.f32 %v1046_v10, %v1047_v24  ;;  %v1054_v35 = vrot.slane %v1053_v25, 2  ;;  %v1074_v36 = vmax.f32 %v1072_v23, %v1073_v28  ;;  %v607_v37 = vcombine.high %v7139_v47, %v7139_v47 }
  0x2c   : > { %v1061_v38 = vrot.slane %v1060_v30, 2  ;;  %v1067_v41 = vmax.f32 %v1065_v27, %v1066_v31  ;;  %v7172_v42 = vsel %vm952_vm6, %v920_v4, %v984_v32  ;;  %vm953_vm7 = vcmp.gt.f32.partialorder %v921_v33, 0.0 }
  0x2d   : > { %v1049_v43 = vrot.slane %v1048_v34, 1  ;;  %v1055_v44 = vmax.f32 %v1053_v25, %v1054_v35  ;;  %v1075_v45 = vrot.slane %v1074_v36, 2  ;;  %v1079_v46 = vsel %vm1043_vm0, %v7172_v42, -inf }
  0x2e   : > { %v1062_v48 = vmax.f32 %v1060_v30, %v1061_v38  ;;  %v1068_v50 = vrot.slane %v1067_v41, 2  ;;  %v1080_v51 = vrot.slane %v1079_v46, 4  ;;  %v985_v52 = vmul.f32 0.01, %v921_v33 }
  0x2f   : > { %v1050_v53 = vmax.f32 %v1048_v34, %v1049_v43  ;;  %v1056_v54 = vrot.slane %v1055_v44, 1  ;;  %v1076_v55 = vmax.f32 %v1074_v36, %v1075_v45  ;;  %v786_v47 = vrot.slane %v607_v37, %v7099_v17  ;;  %v518_v37 = vld [vmem:[%s7108_s24 + $0x48] sm:$0xff] }
  0x30   : > { %v1063_v56 = vrot.slane %v1062_v48, 1  ;;  %v1069_v57 = vmax.f32 %v1067_v41, %v1068_v50  ;;  %v1081_v58 = vmax.f32 %v1079_v46, %v1080_v51  ;;  %v7178_v60 = vsel %vm953_vm7, %v921_v33, %v985_v52  ;;  %v519_v50 = vld [vmem:[%s7108_s24 + $0x50] sm:$0xff] }
  0x31   : > { %v1268_v62 = vsub.f32 %v7149_v59, %v1050_v53  ;;  %v1057_v63 = vmax.f32 %v1055_v44, %v1056_v54  ;;  %v1077_v0 = vrot.slane %v1076_v55, 1  ;;  %v1086_v3 = vsel %vm1043_vm0, %v7178_v60, -inf }
  0x32   : > { %v1064_v4 = vmax.f32 %v1062_v48, %v1063_v56  ;;  %v1070_v7 = vrot.slane %v1069_v57, 1  ;;  %v1082_v9 = vrot.slane %v1081_v58, 2  ;;  %v1087_v10 = vrot.slane %v1086_v3, 4 }
  0x33   : > { %v1300_v16 = vmul.f32 1.442695, %v1268_v62  ;;  %v1269_v18 = vsub.f32 %v7153_v2, %v1057_v63  ;;  %v1078_v20 = vmax.f32 %v1076_v55, %v1077_v0  ;;  %v922_v21 = vadd.f32 %v786_v47, %v516_v61 }
  0x34   : > { %v1270_v23 = vsub.f32 %v7157_v8, %v1064_v4  ;;  %v1071_v24 = vmax.f32 %v1069_v57, %v1070_v7  ;;  %v1083_v25 = vmax.f32 %v1081_v58, %v1082_v9  ;;  %v1088_v27 = vmax.f32 %v1086_v3, %v1087_v10  ;;  %v520_v58 = vld [vmem:[%s7108_s24 + $0x58] sm:$0xff] }
  0x35   : > { %6632 = vpow2.f32 %v1300_v16  ;;  %v1302_v59 = vmul.f32 1.442695, %v1269_v18  ;;  %v1272_v28 = vsub.f32 %v7161_v19, %v1078_v20  ;;  %vm954_vm8 = vcmp.gt.f32.partialorder %v922_v21, 0.0 }
  0x36   : > { %v1304_v30 = vmul.f32 1.442695, %v1270_v23  ;;  %v1271_v31 = vsub.f32 %v7164_v22, %v1071_v24  ;;  %v1084_v32 = vrot.slane %v1083_v25, 1  ;;  %v1089_v33 = vrot.slane %v1088_v27, 2 }
  0x37   : > { %6634 = vpow2.f32 %v1302_v59  ;;  %v1308_v2 = vmul.f32 1.442695, %v1272_v28  ;;  %v986_v34 = vmul.f32 0.01, %v922_v21  ;;  %vm955_vm9 = vcmp.gt.f32.partialorder %v7141_v49, 0.0 }
  0x38   : > { %6636 = vpow2.f32 %v1304_v30  ;;  %v1306_v8 = vmul.f32 1.442695, %v1271_v31  ;;  %v1085_v35 = vmax.f32 %v1083_v25, %v1084_v32  ;;  %v1090_v36 = vmax.f32 %v1088_v27, %v1089_v33 }
  0x39   : > { %6638 = vpow2.f32 %v1308_v2  ;;  %v7190_v38 = vsel %vm954_vm8, %v922_v21, %v986_v34  ;;  %v987_v19 = vmul.f32 0.01, %v7141_v49  ;;  %v794_v22 = vrot.slane %v7130_v39, %v7099_v17 }
  0x3a   : > { %6640 = vpow2.f32 %v1306_v8  ;;  %v1273_v41 = vsub.f32 %v7172_v42, %v1085_v35  ;;  %v1091_v43 = vrot.slane %v1090_v36, 1  ;;  %v1093_v44 = vsel %vm1043_vm0, %v7190_v38, -inf }
  0x3b   : > { %v1094_v45 = vrot.slane %v1093_v44, 4  ;;  %v7199_v46 = vsel %vm955_vm9, %v7141_v49, %v987_v19  ;;  %v924_v48 = vadd.f32 %v794_v22, %v518_v37  ;;  %v798_v51 = vrot.slane %v653_v40, %v7099_v17 }
  0x3c   : > { %v1310_v52 = vmul.f32 1.442695, %v1273_v41  ;;  %v1092_v53 = vmax.f32 %v1090_v36, %v1091_v43  ;;  %v1100_v42 = vsel %vm1043_vm0, %v7199_v46, -inf  ;;  %v655_v54 = vcombine.high %v7130_v39, %v7130_v39  ;;  %v7220_v39 = vld [vmem:[%s7089_s14 + $0x10] sm:$0xff] }
  0x3d   : > { %v1095_v55 = vmax.f32 %v1093_v44, %v1094_v45  ;;  %v1101_v47 = vrot.slane %v1100_v42, 4  ;;  %vm956_vm10 = vcmp.gt.f32.partialorder %v924_v48, 0.0  ;;  %v988_v49 = vmul.f32 0.01, %v924_v48 }
  0x3e   : > { %6642 = vpow2.f32 %v1310_v52  ;;  %v1274_v56 = vsub.f32 %v7178_v60, %v1092_v53  ;;  %v925_v57 = vadd.f32 %v798_v51, %v519_v50  ;;  %v802_v26 = vrot.slane %v655_v54, %v7099_v17 }
  0x3f   : > { %v1096_v40 = vrot.slane %v1095_v55, 2  ;;  %v1102_v61 = vmax.f32 %v1100_v42, %v1101_v47  ;;  %v7213_v62 = vsel %vm956_vm10, %v924_v48, %v988_v49  ;;  %v7217_v63 = vrot.slane %v7119_v29, %v7075_v11 }
  0x40   : > { %v1312_v0 = vmul.f32 1.442695, %v1274_v56  ;;  %v1107_v3 = vsel %vm1043_vm0, %v7213_v62, -inf  ;;  %vm957_vm11 = vcmp.gt.f32.partialorder %v925_v57, 0.0  ;;  %v989_v60 = vmul.f32 0.01, %v925_v57 }
  0x41   : > { %v1097_v4 = vmax.f32 %v1095_v55, %v1096_v40  ;;  %v1103_v7 = vrot.slane %v1102_v61, 2  ;;  %v1108_v9 = vrot.slane %v1107_v3, 4  ;;  %v7224_v10 = vadd.f32 %v802_v26, %v520_v58 }
  0x42   : > { %v7226_v16 = vpop.eup %6632  ;;  %6644 = vpow2.f32 %v1312_v0  ;;  %v7228_v18 = vsel %vm957_vm11, %v925_v57, %v989_v60  ;;  %v806_v20 = vrot.slane %v7217_v63, %v7099_v17  ;;  %v7234_v21 = vrot.slane %v7220_v39, %v7075_v11 }
  0x43   : > { %v1364_v23 = vsel %vm1043_vm0, %v7226_v16, 0.0  ;;  %v1098_v24 = vrot.slane %v1097_v4, 1  ;;  %v1104_v25 = vmax.f32 %v1102_v61, %v1103_v7  ;;  %v1109_v27 = vmax.f32 %v1107_v3, %v1108_v9 }
  0x44   : > { %v7238_v59 = vpop.eup %6634  ;;  %v1365_v28 = vrot.slane %v1364_v23, 4  ;;  %v1114_v30 = vsel %vm1043_vm0, %v7228_v18, -inf  ;;  %v7243_v31 = vmul.f32 0.01, %v7224_v10  ;;  %v624_v32 = vcombine.high %v7119_v29, %v7119_v29 }
  0x45   : > { %v7247_v33 = vpop.eup %6636  ;;  %v1371_v2 = vsel %vm1043_vm0, %v7238_v59, 0.0  ;;  %v1099_v34 = vmax.f32 %v1097_v4, %v1098_v24  ;;  %v1105_v8 = vrot.slane %v1104_v25, 1  ;;  %v1110_v35 = vrot.slane %v1109_v27, 2 }
  0x46   : > { %v7251_v36 = vpop.eup %6638  ;;  %v1366_v37 = vadd.f32 %v1365_v28, %v1364_v23  ;;  %v1372_v19 = vrot.slane %v1371_v2, 4  ;;  %v1378_v22 = vsel %vm1043_vm0, %v7247_v33, 0.0  ;;  %v1115_v41 = vrot.slane %v1114_v30, 4 }
  0x47   : > { %v7255_v43 = vpop.eup %6640  ;;  %v1379_v44 = vrot.slane %v1378_v22, 4  ;;  %v1392_v45 = vsel %vm1043_vm0, %v7251_v36, 0.0  ;;  %v1275_v48 = vsub.f32 %v7190_v38, %v1099_v34  ;;  %v1106_v50 = vmax.f32 %v1104_v25, %v1105_v8 }
  0x48   : > { %v1367_v51 = vrot.slane %v1366_v37, 2  ;;  %v1373_v52 = vadd.f32 %v1372_v19, %v1371_v2  ;;  %v1385_v53 = vsel %vm1043_vm0, %v7255_v43, 0.0  ;;  %v1393_v42 = vrot.slane %v1392_v45, 4 }
  0x49   : > { %v1380_v54 = vadd.f32 %v1379_v44, %v1378_v22  ;;  %v1386_v55 = vrot.slane %v1385_v53, 4  ;;  %v1314_v47 = vmul.f32 1.442695, %v1275_v48  ;;  %v1276_v49 = vsub.f32 %v7199_v46, %v1106_v50 }
  0x4a   : > { %vm958_vm12 = vcmp.gt.f32.partialorder %v7224_v10, 0.0  ;;  %v1368_v56 = vadd.f32 %v1367_v51, %v1366_v37  ;;  %v1374_v57 = vrot.slane %v1373_v52, 2  ;;  %v1394_v58 = vadd.f32 %v1393_v42, %v1392_v45 }
  0x4b   : > { %v1111_v26 = vmax.f32 %v1109_v27, %v1110_v35  ;;  %v7264_v40 = vpop.eup %6642  ;;  %v1381_v38 = vrot.slane %v1380_v54, 2  ;;  %v1387_v61 = vadd.f32 %v1386_v55, %v1385_v53  ;;  %6646 = vpow2.f32 %v1314_v47 }
  0x4c   : > { %v1316_v0 = vmul.f32 1.442695, %v1276_v49  ;;  %v1369_v3 = vrot.slane %v1368_v56, 1  ;;  %v1375_v60 = vadd.f32 %v1374_v57, %v1373_v52  ;;  %v1395_v4 = vrot.slane %v1394_v58, 2 }
  0x4d   : > { %v1399_v7 = vsel %vm1043_vm0, %v7264_v40, 0.0  ;;  %v1382_v9 = vadd.f32 %v1381_v38, %v1380_v54  ;;  %v1388_v46 = vrot.slane %v1387_v61, 2  ;;  %v1112_v27 = vrot.slane %v1111_v26, 1 }
  0x4e   : > { %v1400_v23 = vrot.slane %v1399_v7, 4  ;;  %6648 = vpow2.f32 %v1316_v0  ;;  %v1370_v24 = vadd.f32 %v1369_v3, %v1368_v56  ;;  %v1376_v25 = vrot.slane %v1375_v60, 1 }
  0x4f   : > { %v1396_v28 = vadd.f32 %v1395_v4, %v1394_v58  ;;  %v7268_v2 = vpop.eup %6644  ;;  %v1383_v34 = vrot.slane %v1382_v9, 1  ;;  %v1389_v8 = vadd.f32 %v1388_v46, %v1387_v61  ;;  %v1116_v37 = vmax.f32 %v1114_v30, %v1115_v41  ;;  %v521_v30 = vld [vmem:[%s7108_s24 + $0x60] sm:$0xff] }
  0x50   : > { %v1401_v35 = vadd.f32 %v1400_v23, %v1399_v7  ;;  %6650 = vrcp.f32 %v1370_v24  ;;  %v1377_v19 = vadd.f32 %v1376_v25, %v1375_v60  ;;  %v1406_v44 = vsel %vm1043_vm0, %v7268_v2, 0.0 }
  0x51   : > { %v1397_v22 = vrot.slane %v1396_v28, 1  ;;  %v1384_v45 = vadd.f32 %v1383_v34, %v1382_v9  ;;  %v1390_v48 = vrot.slane %v1389_v8, 1  ;;  %v1407_v51 = vrot.slane %v1406_v44, 4 }
  0x52   : > { %v1402_v50 = vrot.slane %v1401_v35, 2  ;;  %6652 = vrcp.f32 %v1377_v19  ;;  %v1113_v53 = vmax.f32 %v1111_v26, %v1112_v27  ;;  %v1117_v42 = vrot.slane %v1116_v37, 2 }
  0x53   : > { %v1398_v52 = vadd.f32 %v1397_v22, %v1396_v28  ;;  %6654 = vrcp.f32 %v1384_v45  ;;  %v1391_v54 = vadd.f32 %v1390_v48, %v1389_v8  ;;  %v1408_v47 = vadd.f32 %v1407_v51, %v1406_v44  ;;  %v523_v45 = vld [vmem:[%s7108_s24 + $0x70] sm:$0xff] }
  0x54   : > { %v1403_v55 = vadd.f32 %v1402_v50, %v1401_v35  ;;  %v1277_v41 = vsub.f32 %v7213_v62, %v1113_v53  ;;  %v1118_v49 = vmax.f32 %v1116_v37, %v1117_v42  ;;  %v7278_v56 = vsel %vm958_vm12, %v7224_v10, %v7243_v31 }
  0x55   : > { %6656 = vrcp.f32 %v1398_v52  ;;  %v1409_v58 = vrot.slane %v1408_v47, 2  ;;  %v1121_v26 = vsel %vm1043_vm0, %v7278_v56, -inf  ;;  %v927_v62 = vadd.f32 %v806_v20, %v521_v30 }
  0x56   : > { %6658 = vrcp.f32 %v1391_v54  ;;  %v1404_v57 = vrot.slane %v1403_v55, 1  ;;  %v1318_v38 = vmul.f32 1.442695, %v1277_v41  ;;  %v1119_v61 = vrot.slane %v1118_v49, 1 }
  0x57   : > { %v1122_v0 = vrot.slane %v1121_v26, 4  ;;  %v1410_v60 = vadd.f32 %v1409_v58, %v1408_v47  ;;  %v7289_v10 = vrot.slane %v624_v32, %v7075_v11  ;;  %v654_v31 = vcombine.high %v7217_v63, %v7217_v63  ;;  %v522_v63 = vld [vmem:[%s7108_s24 + $0x68] sm:$0xff] }
  0x58   : > { %v1405_v3 = vadd.f32 %v1404_v57, %v1403_v55  ;;  %v7293_v4 = vpop.eup %6646  ;;  %6660 = vpow2.f32 %v1318_v38  ;;  %v1120_v7 = vmax.f32 %v1118_v49, %v1119_v61  ;;  %vm959_vm13 = vcmp.gt.f32.partialorder %v927_v62, 0.0 }
  0x59   : > { %v1123_v9 = vmax.f32 %v1121_v26, %v1122_v0  ;;  %v1411_v20 = vrot.slane %v1410_v60, 1  ;;  %v1413_v46 = vsel %vm1043_vm0, %v7293_v4, 0.0  ;;  %v991_v23 = vmul.f32 0.01, %v927_v62 }
  0x5a   : > { %6662 = vrcp.f32 %v1405_v3  ;;  %v1414_v32 = vrot.slane %v1413_v46, 4  ;;  %v1278_v24 = vsub.f32 %v7228_v18, %v1120_v7  ;;  %v810_v28 = vrot.slane %v7289_v10, %v7099_v17 }
  0x5b   : > { %v7297_v29 = vpop.eup %6648  ;;  %v1124_v25 = vrot.slane %v1123_v9, 2  ;;  %v1412_v27 = vadd.f32 %v1411_v20, %v1410_v60  ;;  %v7305_v8 = vsel %vm959_vm13, %v927_v62, %v991_v23  ;;  %v814_v35 = vrot.slane %v654_v31, %v7099_v17 }
  0x5c   : > { %v1420_v34 = vsel %vm1043_vm0, %v7297_v29, 0.0  ;;  %v1415_v37 = vadd.f32 %v1414_v32, %v1413_v46  ;;  %v1320_v22 = vmul.f32 1.442695, %v1278_v24  ;;  %v1128_v18 = vsel %vm1043_vm0, %v7305_v8, -inf }
  0x5d   : > { %v1421_v19 = vrot.slane %v1420_v34, 4  ;;  %v1125_v44 = vmax.f32 %v1123_v9, %v1124_v25  ;;  %v6651_v48 = vpop.eup %6650  ;;  %6664 = vrcp.f32 %v1412_v27  ;;  %v7311_v50 = vadd.f32 %v810_v28, %v522_v63 }
  0x5e   : > { %v657_v51 = vcombine.high %v7220_v39, %v7220_v39  ;;  %v1589_v52 = vmul.f32 %v6651_v48, %v7226_v16  ;;  %v1416_v53 = vrot.slane %v1415_v37, 2  ;;  %6666 = vpow2.f32 %v1320_v22 }
  0x5f   : > { %v1422_v42 = vadd.f32 %v1421_v19, %v1420_v34  ;;  %v6653_v54 = vpop.eup %6652  ;;  %v1126_v55 = vrot.slane %v1125_v44, 1  ;;  %v1129_v47 = vrot.slane %v1128_v18, 4  ;;  %v7317_v30 = vmul.f32 0.01, %v7311_v50 }
  0x60   : > { %v7319_v41 = vadd.f32 %v814_v35, %v523_v45  ;;  %v6655_v49 = vpop.eup %6654  ;;  %v1653_v57 = vsel %vm1043_vm0, %v1589_v52, 0  ;;  %v1591_v58 = vmul.f32 %v6653_v54, %v7238_v59  ;;  %v1417_v26 = vadd.f32 %v1416_v53, %v1415_v37 }
  0x61   : > { %v1423_v38 = vrot.slane %v1422_v42, 2  ;;  %v7323_v16 = vand.u32 4294901760, %v1653_v57  ;;  %v1593_v0 = vmul.f32 %v6655_v49, %v7247_v33  ;;  %v7326_v62 = vmax.f32 %v1125_v44, %v1126_v55 }
  0x62   : > { %v6657_v61 = vpop.eup %6656  ;;  %v7328_v3 = vmax.f32 %v1128_v18, %v1129_v47  ;;  %v1656_v31 = vsel %vm1043_vm0, %v1591_v58, 0  ;;  %v1418_v9 = vrot.slane %v1417_v26, 1  ;;  %vm960_vm14 = vcmp.gt.f32.partialorder %v7311_v50, 0.0 }
  0x63   : > { %v6659_v60 = vpop.eup %6658  ;;  %v1597_v7 = vmul.f32 %v6657_v61, %v7251_v36  ;;  %v1424_v20 = vadd.f32 %v1423_v38, %v1422_v42  ;;  %v7333_v59 = vsub.f32 %v1653_v57, %v7323_v16  ;;  %6251 = vmatprep.mubr.f32.mxu1 %v7323_v16  ;;  %v7336_v46 = vand.u32 4294901760, %v1656_v31 }
  0x64   : > { %v1659_v33 = vsel %vm1043_vm0, %v1593_v0, 0  ;;  %v1595_v23 = vmul.f32 %v6659_v60, %v7255_v43  ;;  %v1419_v25 = vadd.f32 %v1418_v9, %v1417_v26  ;;  %vm961_vm15 = vcmp.gt.f32.partialorder %v7319_v41, 0.0 }
  0x65   : > { %v7340_v32 = vand.u32 4294901760, %v1659_v33  ;;  %v1665_v24 = vsel %vm1043_vm0, %v1597_v7, 0  ;;  %v1425_v63 = vrot.slane %v1424_v20, 1  ;;  %v7344_v36 = vpop.eup %6660  ;;  %v9192_v28 = vand.u32 4294901760, %v7333_v59  ;;  %6252 = vmatmul.mubr.f32.vlgmr.msra.gmra.mxu1 %v7336_v46 }
  0x66   : > { %v7348_v27 = vsub.f32 %v1656_v31, %v7336_v46  ;;  %v1662_v34 = vsel %vm1043_vm0, %v1595_v23, 0  ;;  %v7352_v43 = vand.u32 4294901760, %v1665_v24  ;;  %6350 = vmatpush3.msra.mxu1 %v7047_v1  ;;  %6668 = vrcp.f32 %v1419_v25 }
  0x67   : > { %v6663_v35 = vpop.eup %6662  ;;  %v7356_v37 = vsub.f32 %v1659_v33, %v7340_v32  ;;  %6254 = vmatprep.mubr.f32.mxu1 %v7340_v32  ;;  %v7359_v19 = vand.u32 4294901760, %v1662_v34  ;;  %v1426_v22 = vadd.f32 %v1425_v63, %v1424_v20  ;;  %v1817_v44 = vsub.f32 %v7333_v59, %v9192_v28  ;;  %6449 = vmatprep.subr.mxu1 %v7047_v1 }
  0x68   : > { %v9191_v45 = vand.u32 4294901760, %v7348_v27  ;;  %v7366_v48 = vsub.f32 %v1665_v24, %v7352_v43  ;;  %v1599_v18 = vmul.f32 %v6663_v35, %v7264_v40  ;;  %v1427_v42 = vsel %vm1043_vm0, %v7344_v36, 0.0 }
  0x69   : > { %v9190_v52 = vand.u32 4294901760, %v7356_v37  ;;  %v7372_v53 = vsub.f32 %v1662_v34, %v7359_v19  ;;  %6670 = vrcp.f32 %v1426_v22  ;;  %v1818_v54 = vand.u32 4294901760, %v1817_v44  ;;  %6255 = vmatmul.mubr.f32.gmra.mxu1 %v7359_v19 }
  0x6a   : > { %v1827_v55 = vsub.f32 %v7348_v27, %v9191_v45  ;;  %v9187_v40 = vand.u32 4294901760, %v7366_v48  ;;  %v1668_v47 = vsel %vm1043_vm0, %v1599_v18, 0  ;;  %v6665_v49 = vpop.eup %6664  ;;  %6257 = vmatprep.mubr.f32.mxu1 %v7352_v43  ;;  %v1428_v38 = vrot.slane %v1427_v42, 4 }
  0x6b   : > { %v1837_v57 = vsub.f32 %v7356_v37, %v9190_v52  ;;  %v9188_v58 = vand.u32 4294901760, %v7372_v53  ;;  %v7387_v26 = vand.u32 4294901760, %v1668_v47  ;;  %v7389_v61 = vpop.eup %6666  ;;  %6201 = vmatprep.mubr.f32.mxu0 %v1818_v54  ;;  %v1601_v31 = vmul.f32 %v6665_v49, %v7268_v2 }
  0x6c   : > { %v1828_v0 = vand.u32 4294901760, %v1827_v55  ;;  %v1857_v60 = vsub.f32 %v7366_v48, %v9187_v40  ;;  %v1279_v7 = vsub.f32 %v7278_v56, %v7326_v62  ;;  %v1429_v23 = vadd.f32 %v1428_v38, %v1427_v42 }
  0x6d   : > { %v1838_v9 = vand.u32 4294901760, %v1837_v57  ;;  %v1847_v20 = vsub.f32 %v7372_v53, %v9188_v58  ;;  %v7401_v33 = vsub.f32 %v1668_v47, %v7387_v26  ;;  %6258 = vmatmul.mubr.f32.gmra.mxu1 %v7387_v26  ;;  %v1671_v25 = vsel %vm1043_vm0, %v1601_v31, 0 }
  0x6e   : > { %6202 = vmatmul.mubr.f32.vlgmr.msra.gmra.mxu0 %v1828_v0  ;;  %v1858_v24 = vand.u32 4294901760, %v1857_v60  ;;  %v1434_v2 = vsel %vm1043_vm0, %v7389_v61, 0.0  ;;  %v1322_v63 = vmul.f32 1.442695, %v1279_v7  ;;  %v7409_v34 = vand.u32 4294901760, %v1671_v25 }
  0x6f   : > { %6300 = vmatpush3.msra.mxu0 %v7055_v5  ;;  %6204 = vmatprep.mubr.f32.mxu0 %v1838_v9  ;;  %v1848_v56 = vand.u32 4294901760, %v1847_v20  ;;  %v9185_v62 = vand.u32 4294901760, %v7401_v33  ;;  %v1430_v35 = vrot.slane %v1429_v23, 2  ;;  %v1435_v22 = vrot.slane %v1434_v2, 4 }
  0x70   : > { %6672 = vpow2.f32 %v1322_v63  ;;  %v1131_v44 = vrot.slane %v7328_v3, 2  ;;  %v7416_v18 = vsel %vm960_vm14, %v7311_v50, %v7317_v30  ;;  %6399 = vmatprep.subr.mxu0 %v7060_v6  ;;  %v7423_v42 = vsub.f32 %v1671_v25, %v7409_v34  ;;  %6260 = vmatprep.mubr.f32.mxu1 %v7409_v34 }
  0x71   : > { %v1867_v5 = vsub.f32 %v7401_v33, %v9185_v62  ;;  %v1431_v54 = vadd.f32 %v1430_v35, %v1429_v23  ;;  %v1135_v55 = vsel %vm1043_vm0, %v7416_v18, -inf  ;;  %v1436_v47 = vadd.f32 %v1435_v22, %v1434_v2 }
  0x72   : > { %6205 = vmatmul.mubr.f32.gmra.mxu0 %v1848_v56  ;;  %v1132_v50 = vmax.f32 %v7328_v3, %v1131_v44  ;;  %v1136_v30 = vrot.slane %v1135_v55, 4  ;;  %v9184_v57 = vand.u32 4294901760, %v7423_v42  ;;  %v993_v0 = vmul.f32 0.01, %v7319_v41 }
  0x73   : > { %6207 = vmatprep.mubr.f32.mxu0 %v1858_v24  ;;  %v1868_v49 = vand.u32 4294901760, %v1867_v5  ;;  %v1432_v38 = vrot.slane %v1431_v54, 1  ;;  %v6669_v60 = vpop.eup %6668  ;;  %v1437_v31 = vrot.slane %v1436_v47, 2  ;;  %v656_v20 = vcombine.high %v7289_v10, %v7289_v10 }
  0x74   : > { %v1133_v7 = vrot.slane %v1132_v50, 1  ;;  %v1137_v9 = vmax.f32 %v1135_v55, %v1136_v30  ;;  %v1877_v3 = vsub.f32 %v7423_v42, %v9184_v57  ;;  %v1603_v23 = vmul.f32 %v6669_v60, %v7293_v4  ;;  %v524_v30 = vld [vmem:[%s7108_s24 + $0x78] sm:$0xff]  ;;  %v527_v57 = vld [vmem:[%s7108_s24 + $0x90] sm:$0xff] }
  0x75   : > { %v1433_v24 = vadd.f32 %v1432_v38, %v1431_v54  ;;  %v7439_v25 = vsel %vm961_vm15, %v7319_v41, %v993_v0  ;;  %v1438_v63 = vadd.f32 %v1437_v31, %v1436_v47  ;;  %v680_v38 = vrot.slane %v7234_v21, %v7075_v11 }
  0x76   : > { %v6671_v2 = vpop.eup %6670  ;;  %6208 = vmatmul.mubr.f32.gmra.mxu0 %v1868_v49  ;;  %v1134_v56 = vmax.f32 %v1132_v50, %v1133_v7  ;;  %v1138_v35 = vrot.slane %v1137_v9, 2  ;;  %v1142_v22 = vsel %vm1043_vm0, %v7439_v25, -inf  ;;  %v1878_v10 = vand.u32 4294901760, %v1877_v3 }
  0x77   : > { %v1674_v44 = vsel %vm1043_vm0, %v1603_v23, 0  ;;  %v1605_v5 = vmul.f32 %v6671_v2, %v7297_v29  ;;  %6674 = vrcp.f32 %v1433_v24  ;;  %v1439_v54 = vrot.slane %v1438_v63, 1  ;;  %v525_v24 = vld [vmem:[%s7108_s24 + $0x80] sm:$0xff] }
  0x78   : > { %v7445_v4 = vand.u32 4294901760, %v1674_v44  ;;  %v1280_v41 = vsub.f32 %v7305_v8, %v1134_v56  ;;  %v1139_v55 = vmax.f32 %v1137_v9, %v1138_v35  ;;  %6210 = vmatprep.mubr.f32.mxu0 %v1878_v10  ;;  %v1143_v50 = vrot.slane %v1142_v22, 4 }
  0x79   : > { %v1677_v47 = vsel %vm1043_vm0, %v1605_v5, 0  ;;  %v818_v49 = vrot.slane %v656_v20, %v7099_v17  ;;  %v1440_v8 = vadd.f32 %v1439_v54, %v1438_v63  ;;  %v822_v3 = vrot.slane %v680_v38, %v7099_v17 }
  0x7a   : > { %v7454_v29 = vsub.f32 %v1674_v44, %v7445_v4  ;;  %6261 = vmatmul.mubr.f32.gmra.mxu1 %v7445_v4  ;;  %v7457_v0 = vand.u32 4294901760, %v1677_v47  ;;  %v1324_v60 = vmul.f32 1.442695, %v1280_v41  ;;  %v1140_v31 = vrot.slane %v1139_v55, 1 }
  0x7b   : > { %v1144_v7 = vmax.f32 %v1142_v22, %v1143_v50  ;;  %v930_v9 = vadd.f32 %v818_v49, %v524_v30  ;;  %6676 = vrcp.f32 %v1440_v8  ;;  %v672_v2 = vcombine.high %v7234_v21, %v7234_v21 }
  0x7c   : > { %v9182_v23 = vand.u32 4294901760, %v7454_v29  ;;  %v7462_v20 = vsub.f32 %v1677_v47, %v7457_v0  ;;  %6263 = vmatprep.mubr.f32.mxu1 %v7457_v0  ;;  %6678 = vpow2.f32 %v1324_v60  ;;  %v1141_v63 = vmax.f32 %v1139_v55, %v1140_v31 }
  0x7d   : > { %v7468_v56 = vpop.eup %6672  ;;  %v1145_v35 = vrot.slane %v1144_v7, 2  ;;  %vm962_vm1 = vcmp.gt.f32.partialorder %v930_v9, 0.0  ;;  %v994_v5 = vmul.f32 0.01, %v930_v9  ;;  %v931_v30 = vadd.f32 %v822_v3, %v525_v24 }
  0x7e   : > { %v1887_v22 = vsub.f32 %v7454_v29, %v9182_v23  ;;  %v9183_v10 = vand.u32 4294901760, %v7462_v20  ;;  %v1441_v44 = vsel %vm1043_vm0, %v7468_v56, 0.0  ;;  %v1281_v41 = vsub.f32 %v7416_v18, %v1141_v63 }
  0x7f   : > { %v1442_v54 = vrot.slane %v1441_v44, 4  ;;  %v1146_v21 = vmax.f32 %v1144_v7, %v1145_v35  ;;  %v7480_v50 = vsel %vm962_vm1, %v930_v9, %v994_v5  ;;  %v694_v49 = vrot.slane %v672_v2, %v7075_v11  ;;  %v526_v35 = vld [vmem:[%s7108_s24 + $0x88] sm:$0xff] }
  0x80   : > { %v1888_v47 = vand.u32 4294901760, %v1887_v22  ;;  %v1897_v55 = vsub.f32 %v7462_v20, %v9183_v10  ;;  %v1326_v60 = vmul.f32 1.442695, %v1281_v41  ;;  %v1149_v23 = vsel %vm1043_vm0, %v7480_v50, -inf }
  0x81   : > { %v1443_v8 = vadd.f32 %v1442_v54, %v1441_v44  ;;  %v1147_v31 = vrot.slane %v1146_v21, 1  ;;  %v1150_v7 = vrot.slane %v1149_v23, 4  ;;  %vm963_vm2 = vcmp.gt.f32.partialorder %v931_v30, 0.0 }
  0x82   : > { %6211 = vmatmul.mubr.f32.gmra.mxu0 %v1888_v47  ;;  %v1898_v18 = vand.u32 4294901760, %v1897_v55  ;;  %v995_v3 = vmul.f32 0.01, %v931_v30  ;;  %6680 = vpow2.f32 %v1326_v60  ;;  %v826_v9 = vrot.slane %v694_v49, %v7099_v17 }
  0x83   : > { %v1444_v24 = vrot.slane %v1443_v8, 2  ;;  %v1148_v63 = vmax.f32 %v1146_v21, %v1147_v31  ;;  %v1151_v2 = vmax.f32 %v1149_v23, %v1150_v7  ;;  %v702_v5 = vcombine.high %v680_v38, %v680_v38 }
  0x84   : > { %v6675_v22 = vpop.eup %6674  ;;  %6213 = vmatprep.mubr.f32.mxu0 %v1898_v18  ;;  %v7487_v44 = vsel %vm963_vm2, %v931_v30, %v995_v3  ;;  %v704_v54 = vcombine.high %v694_v49, %v694_v49  ;;  %v932_v10 = vadd.f32 %v826_v9, %v526_v35 }
  0x85   : > { %v1607_v41 = vmul.f32 %v6675_v22, %v7344_v36  ;;  %v1445_v47 = vadd.f32 %v1444_v24, %v1443_v8  ;;  %v1282_v55 = vsub.f32 %v7439_v25, %v1148_v63  ;;  %v1156_v60 = vsel %vm1043_vm0, %v7487_v44, -inf }
  0x86   : > { %v1152_v21 = vrot.slane %v1151_v2, 2  ;;  %v1157_v31 = vrot.slane %v1156_v60, 4  ;;  %v830_v62 = vrot.slane %v702_v5, %v7099_v17  ;;  %v834_v38 = vrot.slane %v704_v54, %v7099_v17 }
  0x87   : > { %v1680_v23 = vsel %vm1043_vm0, %v1607_v41, 0  ;;  %v1446_v30 = vrot.slane %v1445_v47, 1  ;;  %v1328_v18 = vmul.f32 1.442695, %v1282_v55  ;;  %vm964_vm3 = vcmp.gt.f32.partialorder %v932_v10, 0.0  ;;  %v528_v55 = vld [vmem:[%s7108_s24 + $0x98] sm:$0xff] }
  0x88   : > { %v7497_v49 = vand.u32 4294901760, %v1680_v23  ;;  %v1153_v36 = vmax.f32 %v1151_v2, %v1152_v21  ;;  %v1158_v8 = vmax.f32 %v1156_v60, %v1157_v31  ;;  %v6677_v25 = vpop.eup %6676  ;;  %v996_v3 = vmul.f32 0.01, %v932_v10 }
  0x89   : > { %v1447_v7 = vadd.f32 %v1446_v30, %v1445_v47  ;;  %6682 = vpow2.f32 %v1328_v18  ;;  %v933_v24 = vadd.f32 %v830_v62, %v527_v57  ;;  %v7499_v63 = vpop.eup %6678  ;;  %v1609_v9 = vmul.f32 %v6677_v25, %v7389_v61 }
  0x8a   : > { %9256 = vst [vmem:[#allocation7_spill] sm:$0xff] %v7497_v49  ;;  %v7502_v35 = vsub.f32 %v1680_v23, %v7497_v49  ;;  %6264 = vmatmul.mubr.f32.gmra.mxu1 %v7497_v49  ;;  %v1154_v22 = vrot.slane %v1153_v36, 1  ;;  %v1159_v5 = vrot.slane %v1158_v8, 2  ;;  %v1448_v2 = vsel %vm1043_vm0, %v7499_v63, 0.0  ;;  %v540_v49 = vld [vmem:[%s7108_s24 + $0xf8] sm:$0xff] }
  0x8b   : > { %6684 = vrcp.f32 %v1447_v7  ;;  %v7508_v54 = vsel %vm964_vm3, %v932_v10, %v996_v3  ;;  %vm965_vm4 = vcmp.gt.f32.partialorder %v933_v24, 0.0  ;;  %v1683_v57 = vsel %vm1043_vm0, %v1609_v9, 0 }
  0x8c   : > { %v9186_v62 = vand.u32 4294901760, %v7502_v35  ;;  %v1449_v41 = vrot.slane %v1448_v2, 4  ;;  %v1155_v47 = vmax.f32 %v1153_v36, %v1154_v22  ;;  %v7513_v60 = vand.u32 4294901760, %v1683_v57 }
  0x8d   : > { %v1160_v21 = vmax.f32 %v1158_v8, %v1159_v5  ;;  %v1163_v61 = vsel %vm1043_vm0, %v7508_v54, -inf  ;;  %v997_v31 = vmul.f32 0.01, %v933_v24  ;;  %v934_v7 = vadd.f32 %v834_v38, %v528_v55 }
  0x8e   : > { %9257 = vst [vmem:[#allocation8_spill] sm:$0xff] %v7513_v60  ;;  %v1907_v10 = vsub.f32 %v7502_v35, %v9186_v62  ;;  %v1450_v23 = vadd.f32 %v1449_v41, %v1448_v2  ;;  %v1283_v30 = vsub.f32 %v7480_v50, %v1155_v47  ;;  %v1164_v18 = vrot.slane %v1163_v61, 4  ;;  %6266 = vmatprep.mubr.f32.mxu1 %v7513_v60 }
  0x8f   : > { %v7522_v25 = vsub.f32 %v1683_v57, %v7513_v60  ;;  %v1161_v36 = vrot.slane %v1160_v21, 1  ;;  %v7526_v8 = vsel %vm965_vm4, %v933_v24, %v997_v31  ;;  %v7528_v3 = vpop.eup %6680  ;;  %vm966_vm5 = vcmp.gt.f32.partialorder %v934_v7, 0.0 }
  0x90   : > { %v1908_v9 = vand.u32 4294901760, %v1907_v10  ;;  %v1451_v22 = vrot.slane %v1450_v23, 2  ;;  %v1330_v5 = vmul.f32 1.442695, %v1283_v30  ;;  %v1165_v62 = vmax.f32 %v1163_v61, %v1164_v18 }
  0x91   : > { %v9189_v2 = vand.u32 4294901760, %v7522_v25  ;;  %v1455_v50 = vsel %vm1043_vm0, %v7528_v3, 0.0  ;;  %v1162_v57 = vmax.f32 %v1160_v21, %v1161_v36  ;;  %v1170_v41 = vsel %vm1043_vm0, %v7526_v8, -inf }
  0x92   : > { %6214 = vmatmul.mubr.f32.gmra.mxu0 %v1908_v9  ;;  %v1452_v47 = vadd.f32 %v1451_v22, %v1450_v23  ;;  %v1456_v24 = vrot.slane %v1455_v50, 4  ;;  %6686 = vpow2.f32 %v1330_v5  ;;  %v1166_v38 = vrot.slane %v1165_v62, 2 }
  0x93   : > { %v1917_v55 = vsub.f32 %v7522_v25, %v9189_v2  ;;  %v1284_v61 = vsub.f32 %v7487_v44, %v1162_v57  ;;  %v1171_v31 = vrot.slane %v1170_v41, 4  ;;  %v998_v21 = vmul.f32 0.01, %v934_v7 }
  0x94   : > { %v1453_v10 = vrot.slane %v1452_v47, 1  ;;  %v1457_v30 = vadd.f32 %v1456_v24, %v1455_v50  ;;  %v1167_v18 = vmax.f32 %v1165_v62, %v1166_v38  ;;  %v671_v23 = vrot.slane %v657_v51, %v7075_v11 }
  0x95   : > { %v1918_v36 = vand.u32 4294901760, %v1917_v55  ;;  %v1332_v40 = vmul.f32 1.442695, %v1284_v61  ;;  %v1172_v58 = vmax.f32 %v1170_v41, %v1171_v31  ;;  %v7545_v44 = vsel %vm966_vm5, %v934_v7, %v998_v21 }
  0x96   : > { %v7543_v9 = vpop.eup %6682  ;;  %v1454_v22 = vadd.f32 %v1453_v10, %v1452_v47  ;;  %v1458_v5 = vrot.slane %v1457_v30, 2  ;;  %v1168_v2 = vrot.slane %v1167_v18, 1  ;;  %v1177_v57 = vsel %vm1043_vm0, %v7545_v44, -inf }
  0x97   : > { %6216 = vmatprep.mubr.f32.mxu0 %v1918_v36  ;;  %v1462_v62 = vsel %vm1043_vm0, %v7543_v9, 0.0  ;;  %6688 = vpow2.f32 %v1332_v40  ;;  %v1173_v50 = vrot.slane %v1172_v58, 2  ;;  %v1178_v7 = vrot.slane %v1177_v57, 4  ;;  %v529_v40 = vld [vmem:[%s7108_s24 + $0xa0] sm:$0xff] }
  0x98   : > { %v6685_v41 = vpop.eup %6684  ;;  %6690 = vrcp.f32 %v1454_v22  ;;  %v1459_v39 = vadd.f32 %v1458_v5, %v1457_v30  ;;  %v1463_v51 = vrot.slane %v1462_v62, 4  ;;  %v1169_v24 = vmax.f32 %v1167_v18, %v1168_v2 }
  0x99   : > { %v1611_v47 = vmul.f32 %v6685_v41, %v7468_v56  ;;  %v1174_v38 = vmax.f32 %v1172_v58, %v1173_v50  ;;  %v687_v55 = vrot.slane %v671_v23, %v7075_v11  ;;  %v673_v21 = vcombine.high %v671_v23, %v671_v23 }
  0x9a   : > { %v1460_v61 = vrot.slane %v1459_v39, 1  ;;  %v1464_v31 = vadd.f32 %v1463_v51, %v1462_v62  ;;  %v1285_v10 = vsub.f32 %v7508_v54, %v1169_v24  ;;  %v1179_v45 = vmax.f32 %v1177_v57, %v1178_v7 }
  0x9b   : > { %v1686_v36 = vsel %vm1043_vm0, %v1611_v47, 0  ;;  %v1175_v52 = vrot.slane %v1174_v38, 1  ;;  %v838_v30 = vrot.slane %v687_v55, %v7099_v17  ;;  %v7560_v62 = vrot.slane %v673_v21, %v7075_v11  ;;  %v531_v21 = vld [vmem:[%s7108_s24 + $0xb0] sm:$0xff] }
  0x9c   : > { %v7557_v22 = vand.u32 4294901760, %v1686_v36  ;;  %v1461_v2 = vadd.f32 %v1460_v61, %v1459_v39  ;;  %v1465_v56 = vrot.slane %v1464_v31, 2  ;;  %v1334_v58 = vmul.f32 1.442695, %v1285_v10 }
  0x9d   : > { %v1176_v18 = vmax.f32 %v1174_v38, %v1175_v52  ;;  %v1180_v5 = vrot.slane %v1179_v45, 2  ;;  %v935_v50 = vadd.f32 %v838_v30, %v529_v40  ;;  %v703_v57 = vcombine.high %v687_v55, %v687_v55 }
  0x9e   : > { %9258 = vst [vmem:[#allocation9_spill] sm:$0xff] %v7557_v22  ;;  %v7563_v54 = vsub.f32 %v1686_v36, %v7557_v22  ;;  %6267 = vmatmul.mubr.f32.gmra.mxu1 %v7557_v22  ;;  %6692 = vrcp.f32 %v1461_v2  ;;  %v1466_v23 = vadd.f32 %v1465_v56, %v1464_v31  ;;  %v530_v31 = vld [vmem:[%s7108_s24 + $0xa8] sm:$0xff]  ;;  %v842_v55 = vrot.slane %v7560_v62, %v7099_v17 }
  0x9f   : > { %v7566_v41 = vpop.eup %6686  ;;  %6694 = vpow2.f32 %v1334_v58  ;;  %v1286_v52 = vsub.f32 %v7526_v8, %v1176_v18  ;;  %v1181_v39 = vmax.f32 %v1179_v45, %v1180_v5  ;;  %vm967_vm6 = vcmp.gt.f32.partialorder %v935_v50, 0.0 }
  0xa0   : > { %v9193_v51 = vand.u32 4294901760, %v7563_v54  ;;  %v1467_v24 = vrot.slane %v1466_v23, 1  ;;  %v1469_v47 = vsel %vm1043_vm0, %v7566_v41, 0.0  ;;  %v999_v38 = vmul.f32 0.01, %v935_v50 }
  0xa1   : > { %v1470_v7 = vrot.slane %v1469_v47, 4  ;;  %v1336_v61 = vmul.f32 1.442695, %v1286_v52  ;;  %v1182_v10 = vrot.slane %v1181_v39, 1  ;;  %v846_v36 = vrot.slane %v703_v57, %v7099_v17 }
  0xa2   : > { %v1927_v8 = vsub.f32 %v7563_v54, %v9193_v51  ;;  %v1468_v45 = vadd.f32 %v1467_v24, %v1466_v23  ;;  %v7578_v40 = vsel %vm967_vm6, %v935_v50, %v999_v38  ;;  %v936_v52 = vadd.f32 %v842_v55, %v530_v31 }
  0xa3   : > { %v1471_v30 = vadd.f32 %v1470_v7, %v1469_v47  ;;  %6696 = vpow2.f32 %v1336_v61  ;;  %v1183_v2 = vmax.f32 %v1181_v39, %v1182_v10  ;;  %v1184_v56 = vsel %vm1043_vm0, %v7578_v40, -inf }
  0xa4   : > { %v7584_v58 = vpop.eup %6688  ;;  %v1928_v18 = vand.u32 4294901760, %v1927_v8  ;;  %6698 = vrcp.f32 %v1468_v45  ;;  %v1185_v5 = vrot.slane %v1184_v56, 4  ;;  %v937_v57 = vadd.f32 %v846_v36, %v531_v21 }
  0xa5   : > { %v6691_v28 = vpop.eup %6690  ;;  %v1472_v51 = vrot.slane %v1471_v30, 2  ;;  %v1476_v50 = vsel %vm1043_vm0, %v7584_v58, 0.0  ;;  %v1287_v23 = vsub.f32 %v7545_v44, %v1183_v2  ;;  %vm968_vm7 = vcmp.gt.f32.partialorder %v936_v52, 0.0 }
  0xa6   : > { %6217 = vmatmul.mubr.f32.gmra.mxu0 %v1928_v18  ;;  %v1613_v39 = vmul.f32 %v6691_v28, %v7499_v63  ;;  %v1477_v24 = vrot.slane %v1476_v50, 4  ;;  %v1186_v47 = vmax.f32 %v1184_v56, %v1185_v5  ;;  %v1000_v61 = vmul.f32 0.01, %v936_v52 }
  0xa7   : > { %v1473_v38 = vadd.f32 %v1472_v51, %v1471_v30  ;;  %v1338_v7 = vmul.f32 1.442695, %v1287_v23  ;;  %vm969_vm8 = vcmp.gt.f32.partialorder %v937_v57, 0.0  ;;  %v1001_v8 = vmul.f32 0.01, %v937_v57 }
  0xa8   : > { %v1689_v10 = vsel %vm1043_vm0, %v1613_v39, 0  ;;  %v1478_v31 = vadd.f32 %v1477_v24, %v1476_v50  ;;  %v1187_v55 = vrot.slane %v1186_v47, 2  ;;  %v7593_v44 = vsel %vm968_vm7, %v936_v52, %v1000_v61 }
  0xa9   : > { %v7591_v45 = vand.u32 4294901760, %v1689_v10  ;;  %v1474_v12 = vrot.slane %v1473_v38, 1  ;;  %6700 = vpow2.f32 %v1338_v7  ;;  %v1191_v63 = vsel %vm1043_vm0, %v7593_v44, -inf }
  0xaa   : > { %v1479_v21 = vrot.slane %v1478_v31, 2  ;;  %v1188_v28 = vmax.f32 %v1186_v47, %v1187_v55  ;;  %v7597_v51 = vsel %vm969_vm8, %v937_v57, %v1001_v8  ;;  %v1192_v56 = vrot.slane %v1191_v63, 4 }
  0xab   : > { %9259 = vst [vmem:[#allocation10_spill] sm:$0xff] %v7591_v45  ;;  %v6693_v36 = vpop.eup %6692  ;;  %v7600_v30 = vsub.f32 %v1689_v10, %v7591_v45  ;;  %6269 = vmatprep.mubr.f32.mxu1 %v7591_v45  ;;  %v1475_v2 = vadd.f32 %v1474_v12, %v1473_v38  ;;  %v1198_v18 = vsel %vm1043_vm0, %v7597_v51, -inf  ;;  %vm4113_vm3 = vcmask 1041409  }
  0xac   : > { %v7605_v5 = vpop.eup %6694  ;;  %v1615_v52 = vmul.f32 %v6693_v36, %v7528_v3  ;;  %v1480_v50 = vadd.f32 %v1479_v21, %v1478_v31  ;;  %v1189_v23 = vrot.slane %v1188_v28, 1  ;;  %v1199_v39 = vrot.slane %v1198_v18, 4 }
  0xad   : > { %v9195_v57 = vand.u32 4294901760, %v7600_v30  ;;  %6702 = vrcp.f32 %v1475_v2  ;;  %v1483_v24 = vsel %vm1043_vm0, %v7605_v5, 0.0  ;;  %v1193_v47 = vmax.f32 %v1191_v63, %v1192_v56 }
  0xae   : > { %v1692_v12 = vsel %vm1043_vm0, %v1615_v52, 0  ;;  %v1481_v38 = vrot.slane %v1480_v50, 1  ;;  %v1484_v7 = vrot.slane %v1483_v24, 4  ;;  %v1190_v61 = vmax.f32 %v1188_v28, %v1189_v23 }
  0xaf   : > { %v1937_v10 = vsub.f32 %v7600_v30, %v9195_v57  ;;  %v7615_v3 = vand.u32 4294901760, %v1692_v12  ;;  %v1194_v31 = vrot.slane %v1193_v47, 2  ;;  %v1200_v55 = vmax.f32 %v1198_v18, %v1199_v39 }
  0xb0   : > { %v7617_v8 = vpop.eup %6696  ;;  %v1482_v21 = vadd.f32 %v1481_v38, %v1480_v50  ;;  %v1485_v36 = vadd.f32 %v1484_v7, %v1483_v24  ;;  %v1288_v2 = vsub.f32 %v7578_v40, %v1190_v61  ;;  %v705_v63 = vcombine.high %v7560_v62, %v7560_v62  ;;  %v532_v61 = vld [vmem:[%s7108_s24 + $0xb8] sm:$0xff] }
  0xb1   : > { %9260 = vst [vmem:[#allocation11_spill] sm:$0xff] %v7615_v3  ;;  %v6699_v56 = vpop.eup %6698  ;;  %v1938_v28 = vand.u32 4294901760, %v1937_v10  ;;  %v7623_v52 = vsub.f32 %v1692_v12, %v7615_v3  ;;  %6270 = vmatmul.mubr.f32.gmra.mxu1 %v7615_v3  ;;  %v1490_v18 = vsel %vm1043_vm0, %v7617_v8, 0.0  ;;  %v1195_v23 = vmax.f32 %v1193_v47, %v1194_v31 }
  0xb2   : > { %v1617_v50 = vmul.f32 %v6699_v56, %v7543_v9  ;;  %6704 = vrcp.f32 %v1482_v21  ;;  %v1486_v39 = vrot.slane %v1485_v36, 2  ;;  %v1491_v40 = vrot.slane %v1490_v18, 4 }
  0xb3   : > { %6219 = vmatprep.mubr.f32.mxu0 %v1938_v28  ;;  %v9201_v62 = vand.u32 4294901760, %v7623_v52  ;;  %v1340_v24 = vmul.f32 1.442695, %v1288_v2  ;;  %v1196_v38 = vrot.slane %v1195_v23, 1  ;;  %v1201_v7 = vrot.slane %v1200_v55, 2 }
  0xb4   : > { %v1695_v12 = vsel %vm1043_vm0, %v1617_v50, 0  ;;  %v1487_v10 = vadd.f32 %v1486_v39, %v1485_v36  ;;  %v1492_v57 = vadd.f32 %v1491_v40, %v1490_v18  ;;  %v850_v13 = vrot.slane %v705_v63, %v7099_v17 }
  0xb5   : > { %v1947_v9 = vsub.f32 %v7623_v52, %v9201_v62  ;;  %v7636_v47 = vand.u32 4294901760, %v1695_v12  ;;  %6706 = vpow2.f32 %v1340_v24  ;;  %v1197_v31 = vmax.f32 %v1195_v23, %v1196_v38 }
  0xb6   : > { %v7638_v21 = vpop.eup %6700  ;;  %v1488_v2 = vrot.slane %v1487_v10, 1  ;;  %v1493_v56 = vrot.slane %v1492_v57, 2  ;;  %v1202_v28 = vmax.f32 %v1200_v55, %v1201_v7  ;;  %v938_v14 = vadd.f32 %v850_v13, %v532_v61 }
  0xb7   : > { %9261 = vst [vmem:[#allocation12_spill] sm:$0xff] %v7636_v47  ;;  %v1948_v15 = vand.u32 4294901760, %v1947_v9  ;;  %v7641_v36 = vsub.f32 %v1695_v12, %v7636_v47  ;;  %6272 = vmatprep.mubr.f32.mxu1 %v7636_v47  ;;  %v1497_v63 = vsel %vm1043_vm0, %v7638_v21, 0.0  ;;  %v1289_v18 = vsub.f32 %v7593_v44, %v1197_v31  ;;  %v548_v9 = vld [vmem:[%s7089_s14 + $0x18] sm:$0xff] }
  0xb8   : > { %v1489_v50 = vadd.f32 %v1488_v2, %v1487_v10  ;;  %v1494_v23 = vadd.f32 %v1493_v56, %v1492_v57  ;;  %v1498_v39 = vrot.slane %v1497_v63, 4  ;;  %v1203_v40 = vrot.slane %v1202_v28, 1 }
  0xb9   : > { %6220 = vmatmul.mubr.f32.gmra.mxu0 %v1948_v15  ;;  %v9199_v55 = vand.u32 4294901760, %v7641_v36  ;;  %v1342_v13 = vmul.f32 1.442695, %v1289_v18  ;;  %vm970_vm9 = vcmp.gt.f32.partialorder %v938_v14, 0.0  ;;  %v1002_v24 = vmul.f32 0.01, %v938_v14 }
  0xba   : > { %v6703_v38 = vpop.eup %6702  ;;  %6708 = vrcp.f32 %v1489_v50  ;;  %v1495_v7 = vrot.slane %v1494_v23, 1  ;;  %v1499_v61 = vadd.f32 %v1498_v39, %v1497_v63  ;;  %v1204_v12 = vmax.f32 %v1202_v28, %v1203_v40 }
  0xbb   : > { %v1957_v44 = vsub.f32 %v7641_v36, %v9199_v55  ;;  %v1619_v57 = vmul.f32 %v6703_v38, %v7566_v41  ;;  %6710 = vpow2.f32 %v1342_v13  ;;  %v7653_v10 = vsel %vm970_vm9, %v938_v14, %v1002_v24 }
  0xbc   : > { %v1496_v15 = vadd.f32 %v1495_v7, %v1494_v23  ;;  %v1500_v31 = vrot.slane %v1499_v61, 2  ;;  %v1290_v2 = vsub.f32 %v7597_v51, %v1204_v12  ;;  %v1205_v56 = vsel %vm1043_vm0, %v7653_v10, -inf }
  0xbd   : > { %v1958_v18 = vand.u32 4294901760, %v1957_v44  ;;  %v1698_v28 = vsel %vm1043_vm0, %v1619_v57, 0  ;;  %v1206_v63 = vrot.slane %v1205_v56, 4  ;;  %v713_v50 = vrot.slane %v548_v9, %v7075_v11  ;;  %v533_v44 = vld [vmem:[%s7108_s24 + $0xc0] sm:$0xff] }
  0xbe   : > { %v7660_v39 = vand.u32 4294901760, %v1698_v28  ;;  %6712 = vrcp.f32 %v1496_v15  ;;  %v1501_v41 = vadd.f32 %v1500_v31, %v1499_v61  ;;  %v1344_v14 = vmul.f32 1.442695, %v1290_v2 }
  0xbf   : > { %v6705_v40 = vpop.eup %6704  ;;  %6222 = vmatprep.mubr.f32.mxu0 %v1958_v18  ;;  %v1207_v23 = vmax.f32 %v1205_v56, %v1206_v63  ;;  %v729_v51 = vrot.slane %v713_v50, %v7075_v11  ;;  %v721_v13 = vcombine.high %v713_v50, %v713_v50  ;;  %v706_v24 = vcombine.high %v548_v9, %v548_v9 }
  0xc0   : > { %9262 = vst [vmem:[#allocation13_spill] sm:$0xff] %v7660_v39  ;;  %v7664_v38 = vsub.f32 %v1698_v28, %v7660_v39  ;;  %6273 = vmatmul.mubr.f32.gmra.mxu1 %v7660_v39  ;;  %v1621_v7 = vmul.f32 %v6705_v40, %v7584_v58  ;;  %v1502_v12 = vrot.slane %v1501_v41, 1  ;;  %6714 = vpow2.f32 %v1344_v14  ;;  %v534_v40 = vld [vmem:[%s7108_s24 + $0xc8] sm:$0xff] }
  0xc1   : > { %v1208_v61 = vrot.slane %v1207_v23, 2  ;;  %v854_v57 = vrot.slane %v729_v51, %v7099_v17  ;;  %v7671_v15 = vrot.slane %v721_v13, %v7075_v11  ;;  %v751_v31 = vcombine.high %v729_v51, %v729_v51 }
  0xc2   : > { %v7673_v2 = vpop.eup %6706  ;;  %v9200_v9 = vand.u32 4294901760, %v7664_v38  ;;  %v1701_v56 = vsel %vm1043_vm0, %v1621_v7, 0  ;;  %v1503_v18 = vadd.f32 %v1502_v12, %v1501_v41  ;;  %v7678_v58 = vrot.slane %v706_v24, %v7075_v11 }
  0xc3   : > { %v7680_v28 = vand.u32 4294901760, %v1701_v56  ;;  %v1504_v63 = vsel %vm1043_vm0, %v7673_v2, 0.0  ;;  %v1209_v50 = vmax.f32 %v1207_v23, %v1208_v61  ;;  %v939_v14 = vadd.f32 %v854_v57, %v533_v44 }
  0xc4   : > { %v1967_v51 = vsub.f32 %v7664_v38, %v9200_v9  ;;  %6716 = vrcp.f32 %v1503_v18  ;;  %v1505_v13 = vrot.slane %v1504_v63, 4  ;;  %v858_v41 = vrot.slane %v7671_v15, %v7099_v17 }
  0xc5   : > { %9263 = vst [vmem:[#allocation14_spill] sm:$0xff] %v7680_v28  ;;  %v7691_v24 = vsub.f32 %v1701_v56, %v7680_v28  ;;  %6275 = vmatprep.mubr.f32.mxu1 %v7680_v28  ;;  %v1210_v7 = vrot.slane %v1209_v50, 1  ;;  %vm971_vm10 = vcmp.gt.f32.partialorder %v939_v14, 0.0  ;;  %v1003_v12 = vmul.f32 0.01, %v939_v14 }
  0xc6   : > { %v1968_v23 = vand.u32 4294901760, %v1967_v51  ;;  %v1506_v44 = vadd.f32 %v1505_v13, %v1504_v63  ;;  %v940_v61 = vadd.f32 %v858_v41, %v534_v40  ;;  %v862_v57 = vrot.slane %v751_v31, %v7099_v17 }
  0xc7   : > { %v6709_v55 = vpop.eup %6708  ;;  %v9208_v18 = vand.u32 4294901760, %v7691_v24  ;;  %v1211_v9 = vmax.f32 %v1209_v50, %v1210_v7  ;;  %v7696_v62 = vsel %vm971_vm10, %v939_v14, %v1003_v12  ;;  %vm4116_vm4 = vcmask 1042434  }
  0xc8   : > { %v7700_v39 = vpop.eup %6710  ;;  %6223 = vmatmul.mubr.f32.gmra.mxu0 %v1968_v23  ;;  %v1623_v28 = vmul.f32 %v6709_v55, %v7605_v5  ;;  %v1507_v47 = vrot.slane %v1506_v44, 2  ;;  %v1212_v63 = vsel %vm1043_vm0, %v7696_v62, -inf  ;;  %vm972_vm11 = vcmp.gt.f32.partialorder %v940_v61, 0.0 }
  0xc9   : > { %v1977_v31 = vsub.f32 %v7691_v24, %v9208_v18  ;;  %v1511_v50 = vsel %vm1043_vm0, %v7700_v39, 0.0  ;;  %v1291_v14 = vsub.f32 %v7653_v10, %v1211_v9  ;;  %v1213_v40 = vrot.slane %v1212_v63, 4 }
  0xca   : > { %v1704_v51 = vsel %vm1043_vm0, %v1623_v28, 0  ;;  %v1508_v13 = vadd.f32 %v1507_v47, %v1506_v44  ;;  %v1512_v41 = vrot.slane %v1511_v50, 4  ;;  %v1004_v5 = vmul.f32 0.01, %v940_v61  ;;  %v535_v44 = vld [vmem:[%s7108_s24 + $0xd0] sm:$0xff] }
  0xcb   : > { %v6713_v55 = vpop.eup %6712  ;;  %v1978_v7 = vand.u32 4294901760, %v1977_v31  ;;  %v7712_v12 = vand.u32 4294901760, %v1704_v51  ;;  %v1346_v23 = vmul.f32 1.442695, %v1291_v14  ;;  %v1214_v56 = vmax.f32 %v1212_v63, %v1213_v40 }
  0xcc   : > { %v1625_v18 = vmul.f32 %v6713_v55, %v7617_v8  ;;  %v1509_v3 = vrot.slane %v1508_v13, 1  ;;  %v1513_v45 = vadd.f32 %v1512_v41, %v1511_v50  ;;  %v7716_v22 = vsel %vm972_vm11, %v940_v61, %v1004_v5 }
  0xcd   : > { %9264 = vst [vmem:[#allocation15_spill] sm:$0xff] %v7712_v12  ;;  %v7718_v10 = vpop.eup %6714  ;;  %6225 = vmatprep.mubr.f32.mxu0 %v1978_v7  ;;  %v7721_v47 = vsub.f32 %v1704_v51, %v7712_v12  ;;  %6276 = vmatmul.mubr.f32.gmra.mxu1 %v7712_v12  ;;  %6718 = vpow2.f32 %v1346_v23  ;;  %v1215_v9 = vrot.slane %v1214_v56, 2  ;;  %v1219_v28 = vsel %vm1043_vm0, %v7716_v22, -inf }
  0xce   : > { %v1707_v8 = vsel %vm1043_vm0, %v1625_v18, 0  ;;  %v1510_v63 = vadd.f32 %v1509_v3, %v1508_v13  ;;  %v1514_v31 = vrot.slane %v1513_v45, 2  ;;  %v1518_v61 = vsel %vm1043_vm0, %v7718_v10, 0.0 }
  0xcf   : > { %v9219_v50 = vand.u32 4294901760, %v7721_v47  ;;  %v7731_v14 = vand.u32 4294901760, %v1707_v8  ;;  %v1519_v40 = vrot.slane %v1518_v61, 4  ;;  %v1216_v51 = vmax.f32 %v1214_v56, %v1215_v9 }
  0xd0   : > { %6720 = vrcp.f32 %v1510_v63  ;;  %v1515_v41 = vadd.f32 %v1514_v31, %v1513_v45  ;;  %v1220_v5 = vrot.slane %v1219_v28, 4  ;;  %v941_v55 = vadd.f32 %v862_v57, %v535_v44 }
  0xd1   : > { %9265 = vst [vmem:[#allocation16_spill] sm:$0xff] %v7731_v14  ;;  %v6717_v7 = vpop.eup %6716  ;;  %v1987_v18 = vsub.f32 %v7721_v47, %v9219_v50  ;;  %v7737_v3 = vsub.f32 %v1707_v8, %v7731_v14  ;;  %6278 = vmatprep.mubr.f32.mxu1 %v7731_v14  ;;  %v1520_v13 = vadd.f32 %v1519_v40, %v1518_v61  ;;  %v1217_v23 = vrot.slane %v1216_v51, 1 }
  0xd2   : > { %v1627_v12 = vmul.f32 %v6717_v7, %v7638_v21  ;;  %v1516_v60 = vrot.slane %v1515_v41, 1  ;;  %v1221_v56 = vmax.f32 %v1219_v28, %v1220_v5  ;;  %vm973_vm12 = vcmp.gt.f32.partialorder %v941_v55, 0.0  ;;  %v536_v5 = vld [vmem:[%s7108_s24 + $0xd8] sm:$0xff] }
  0xd3   : > { %v1988_v45 = vand.u32 4294901760, %v1987_v18  ;;  %v9220_v57 = vand.u32 4294901760, %v7737_v3  ;;  %v1521_v9 = vrot.slane %v1520_v13, 2  ;;  %v1218_v44 = vmax.f32 %v1216_v51, %v1217_v23 }
  0xd4   : > { %v1710_v63 = vsel %vm1043_vm0, %v1627_v12, 0  ;;  %v1517_v31 = vadd.f32 %v1516_v60, %v1515_v41  ;;  %v1222_v8 = vrot.slane %v1221_v56, 2  ;;  %v1005_v50 = vmul.f32 0.01, %v941_v55 }
  0xd5   : > { %6226 = vmatmul.mubr.f32.gmra.mxu0 %v1988_v45  ;;  %v1997_v61 = vsub.f32 %v7737_v3, %v9220_v57  ;;  %v7746_v21 = vand.u32 4294901760, %v1710_v63  ;;  %v1522_v40 = vadd.f32 %v1521_v9, %v1520_v13  ;;  %v1292_v28 = vsub.f32 %v7696_v62, %v1218_v44  ;;  %v537_v44 = vld [vmem:[%s7108_s24 + $0xe0] sm:$0xff] }
  0xd6   : > { %6722 = vrcp.f32 %v1517_v31  ;;  %v1223_v7 = vmax.f32 %v1221_v56, %v1222_v8  ;;  %v7751_v51 = vsel %vm973_vm12, %v941_v55, %v1005_v50  ;;  %v9267_v60 = vcombine.high %v7671_v15, %v7671_v15 }
  0xd7   : > { %9266 = vst [vmem:[#allocation17_spill] sm:$0xff] %v7746_v21  ;;  %v1998_v41 = vand.u32 4294901760, %v1997_v61  ;;  %v7758_v18 = vsub.f32 %v1710_v63, %v7746_v21  ;;  %6279 = vmatmul.mubr.f32.gmra.mxu1 %v7746_v21  ;;  %v1523_v13 = vrot.slane %v1522_v40, 1  ;;  %v1348_v62 = vmul.f32 1.442695, %v1292_v28 }
  0xd8   : > { %v866_v12 = vrot.slane %v9267_v60, %v7099_v17  ;;  %v1224_v23 = vrot.slane %v1223_v7, 1  ;;  %v1226_v56 = vsel %vm1043_vm0, %v7751_v51, -inf  ;;  %v736_v55 = vrot.slane %v7678_v58, %v7075_v11 }
  0xd9   : > { %6228 = vmatprep.mubr.f32.mxu0 %v1998_v41  ;;  %v9221_v15 = vand.u32 4294901760, %v7758_v18  ;;  %v1524_v45 = vadd.f32 %v1523_v13, %v1522_v40  ;;  %6724 = vpow2.f32 %v1348_v62  ;;  %v1227_v9 = vrot.slane %v1226_v56, 4 }
  0xda   : > { %v942_v50 = vadd.f32 %v866_v12, %v536_v5  ;;  %v7767_v63 = vpop.eup %6718  ;;  %v1225_v31 = vmax.f32 %v1223_v7, %v1224_v23  ;;  %v870_v61 = vrot.slane %v736_v55, %v7099_v17  ;;  %vm4119_vm5 = vcmask 1043459  }
  0xdb   : > { %v2007_v28 = vsub.f32 %v7758_v18, %v9221_v15  ;;  %6726 = vrcp.f32 %v1524_v45  ;;  %v1525_v5 = vsel %vm1043_vm0, %v7767_v63, 0.0  ;;  %v1228_v60 = vmax.f32 %v1226_v56, %v1227_v9 }
  0xdc   : > { %vm974_vm13 = vcmp.gt.f32.partialorder %v942_v50, 0.0  ;;  %v1006_v8 = vmul.f32 0.01, %v942_v50  ;;  %v1526_v40 = vrot.slane %v1525_v5, 4  ;;  %v1293_v12 = vsub.f32 %v7716_v22, %v1225_v31 }
  0xdd   : > { %v943_v13 = vadd.f32 %v870_v61, %v537_v44  ;;  %v6721_v7 = vpop.eup %6720  ;;  %v2008_v62 = vand.u32 4294901760, %v2007_v28  ;;  %v1229_v23 = vrot.slane %v1228_v60, 2  ;;  %v722_v45 = vcombine.high %v7678_v58, %v7678_v58  ;;  %v538_v28 = vld [vmem:[%s7108_s24 + $0xe8] sm:$0xff] }
  0xde   : > { %v7776_v41 = vsel %vm974_vm13, %v942_v50, %v1006_v8  ;;  %v1629_v15 = vmul.f32 %v6721_v7, %v7673_v2  ;;  %v1527_v21 = vadd.f32 %v1526_v40, %v1525_v5  ;;  %v1350_v56 = vmul.f32 1.442695, %v1293_v12 }
  0xdf   : > { %v1233_v57 = vsel %vm1043_vm0, %v7776_v41, -inf  ;;  %6229 = vmatmul.mubr.f32.gmra.mxu0 %v2008_v62  ;;  %v1230_v22 = vmax.f32 %v1228_v60, %v1229_v23  ;;  %vm975_vm14 = vcmp.gt.f32.partialorder %v943_v13, 0.0  ;;  %v1007_v50 = vmul.f32 0.01, %v943_v13 }
  0xe0   : > { %v1234_v9 = vrot.slane %v1233_v57, 4  ;;  %v7784_v44 = vrot.slane %v722_v45, %v7075_v11  ;;  %v1713_v31 = vsel %vm1043_vm0, %v1629_v15, 0  ;;  %v1528_v8 = vrot.slane %v1527_v21, 2 }
  0xe1   : > { %6728 = vpow2.f32 %v1350_v56  ;;  %v7788_v14 = vand.u32 4294901760, %v1713_v31  ;;  %v1231_v58 = vrot.slane %v1230_v22, 1  ;;  %v7790_v2 = vsel %vm975_vm14, %v943_v13, %v1007_v50 }
  0xe2   : > { %v1235_v61 = vmax.f32 %v1233_v57, %v1234_v9  ;;  %v874_v5 = vrot.slane %v7784_v44, %v7099_v17  ;;  %v1529_v60 = vadd.f32 %v1528_v8, %v1527_v21  ;;  %v1240_v11 = vsel %vm1043_vm0, %v7790_v2, -inf }
  0xe3   : > { %9268 = vst [vmem:[#allocation18_spill] sm:$0xff] %v7788_v14  ;;  %v752_v12 = vcombine.high %v736_v55, %v736_v55  ;;  %v6723_v7 = vpop.eup %6722  ;;  %v7797_v15 = vsub.f32 %v1713_v31, %v7788_v14  ;;  %6281 = vmatprep.mubr.f32.mxu1 %v7788_v14  ;;  %v1232_v57 = vmax.f32 %v1230_v22, %v1231_v58  ;;  %v1241_v62 = vrot.slane %v1240_v11, 4 }
  0xe4   : > { %v1236_v40 = vrot.slane %v1235_v61, 2  ;;  %v944_v23 = vadd.f32 %v874_v5, %v538_v28  ;;  %v1631_v13 = vmul.f32 %v6723_v7, %v7700_v39  ;;  %v1530_v45 = vrot.slane %v1529_v60, 1 }
  0xe5   : > { %v878_v21 = vrot.slane %v752_v12, %v7099_v17  ;;  %v9226_v9 = vand.u32 4294901760, %v7797_v15  ;;  %v1294_v50 = vsub.f32 %v7751_v51, %v1232_v57  ;;  %v1242_v55 = vmax.f32 %v1240_v11, %v1241_v62  ;;  %v539_v57 = vld [vmem:[%s7108_s24 + $0xf0] sm:$0xff] }
  0xe6   : > { %v1237_v56 = vmax.f32 %v1235_v61, %v1236_v40  ;;  %vm976_vm15 = vcmp.gt.f32.partialorder %v944_v23, 0.0  ;;  %v7804_v31 = vpop.eup %6724  ;;  %v1716_v8 = vsel %vm1043_vm0, %v1631_v13, 0  ;;  %v1531_v22 = vadd.f32 %v1530_v45, %v1529_v60 }
  0xe7   : > { %v1008_v28 = vmul.f32 0.01, %v944_v23  ;;  %v2017_v39 = vsub.f32 %v7797_v15, %v9226_v9  ;;  %v7810_v61 = vand.u32 4294901760, %v1716_v8  ;;  %v1532_v5 = vsel %vm1043_vm0, %v7804_v31, 0.0 }
  0xe8   : > { %v1238_v58 = vrot.slane %v1237_v56, 1  ;;  %v1352_v51 = vmul.f32 1.442695, %v1294_v50  ;;  %v6727_v40 = vpop.eup %6726  ;;  %6730 = vrcp.f32 %v1531_v22  ;;  %v1533_v11 = vrot.slane %v1532_v5, 4 }
  0xe9   : > { %9269 = vst [vmem:[#allocation19_spill] sm:$0xff] %v7810_v61  ;;  %v1243_v7 = vrot.slane %v1242_v55, 2  ;;  %v2018_v62 = vand.u32 4294901760, %v2017_v39  ;;  %v7816_v60 = vsub.f32 %v1716_v8, %v7810_v61  ;;  %6282 = vmatmul.mubr.f32.gmra.mxu1 %v7810_v61  ;;  %v1633_v13 = vmul.f32 %v6727_v40, %v7718_v10 }
  0xea   : > { %v1239_v12 = vmax.f32 %v1237_v56, %v1238_v58  ;;  %6732 = vpow2.f32 %v1352_v51  ;;  %v1534_v45 = vadd.f32 %v1533_v11, %v1532_v5  ;;  %v7822_v50 = vsel %vm976_vm15, %v944_v23, %v1008_v28 }
  0xeb   : > { %v1244_v14 = vmax.f32 %v1242_v55, %v1243_v7  ;;  %6231 = vmatprep.mubr.f32.mxu0 %v2018_v62  ;;  %v9229_v56 = vand.u32 4294901760, %v7816_v60  ;;  %v1719_v22 = vsel %vm1043_vm0, %v1633_v13, 0  ;;  %v1247_v8 = vsel %vm1043_vm0, %v7822_v50, -inf }
  0xec   : > { %v1295_v9 = vsub.f32 %v7776_v41, %v1239_v12  ;;  %v945_v58 = vadd.f32 %v878_v21, %v539_v57  ;;  %v7828_v39 = vand.u32 4294901760, %v1719_v22  ;;  %v1535_v10 = vrot.slane %v1534_v45, 2 }
  0xed   : > { %v1245_v5 = vrot.slane %v1244_v14, 1  ;;  %v2027_v41 = vsub.f32 %v7816_v60, %v9229_v56  ;;  %v1248_v23 = vrot.slane %v1247_v8, 4  ;;  %vm4122_vm6 = vcmask 1044484  }
  0xee   : > { %9270 = vst [vmem:[#allocation20_spill] sm:$0xff] %v7828_v39  ;;  %v1354_v51 = vmul.f32 1.442695, %v1295_v9  ;;  %v7830_v40 = vpop.eup %6728  ;;  %vm977_vm1 = vcmp.gt.f32.partialorder %v945_v58, 0.0  ;;  %v1009_v55 = vmul.f32 0.01, %v945_v58  ;;  %v7836_v28 = vsub.f32 %v1719_v22, %v7828_v39  ;;  %6284 = vmatprep.mubr.f32.mxu1 %v7828_v39 }
  0xef   : > { %v1536_v21 = vadd.f32 %v1535_v10, %v1534_v45  ;;  %v1539_v9 = vsel %vm1043_vm0, %v7830_v40, 0.0  ;;  %v2028_v11 = vand.u32 4294901760, %v2027_v41  ;;  %v1246_v7 = vmax.f32 %v1244_v14, %v1245_v5 }
  0xf0   : > { %6734 = vpow2.f32 %v1354_v51  ;;  %v1540_v12 = vrot.slane %v1539_v9, 4  ;;  %v1249_v57 = vmax.f32 %v1247_v8, %v1248_v23  ;;  %v9236_v62 = vand.u32 4294901760, %v7836_v28 }
  0xf1   : > { %v1537_v13 = vrot.slane %v1536_v21, 1  ;;  %v1041_v56 = vsel %vm977_vm1, %v945_v58, %v1009_v55  ;;  %v754_v22 = vcombine.high %v7784_v44, %v7784_v44  ;;  %6232 = vmatmul.mubr.f32.gmra.mxu0 %v2028_v11  ;;  %v1296_v45 = vsub.f32 %v7790_v2, %v1246_v7 }
  0xf2   : > { %v1541_v61 = vadd.f32 %v1540_v12, %v1539_v9  ;;  %v1250_v10 = vrot.slane %v1249_v57, 2  ;;  %v1254_v39 = vsel %vm1043_vm0, %v1041_v56, -inf  ;;  %v2037_v14 = vsub.f32 %v7836_v28, %v9236_v62 }
  0xf3   : > { %v1538_v8 = vadd.f32 %v1537_v13, %v1536_v21  ;;  %v1255_v51 = vrot.slane %v1254_v39, 4  ;;  %v882_v5 = vrot.slane %v754_v22, %v7099_v17  ;;  %v1356_v41 = vmul.f32 1.442695, %v1296_v45 }
  0xf4   : > { %v1542_v58 = vrot.slane %v1541_v61, 2  ;;  %v1251_v23 = vmax.f32 %v1249_v57, %v1250_v10  ;;  %v2038_v44 = vand.u32 4294901760, %v2037_v14  ;;  %vm4125_vm7 = vcmask 1045509  }
  0xf5   : > { %6736 = vrcp.f32 %v1538_v8  ;;  %v1256_v55 = vmax.f32 %v1254_v39, %v1255_v51  ;;  %v946_v9 = vadd.f32 %v882_v5, %v540_v49  ;;  %v6731_v2 = vpop.eup %6730  ;;  %vm4128_vm8 = vcmask 1046534  }
  0xf6   : > { %v1543_v11 = vadd.f32 %v1542_v58, %v1541_v61  ;;  %6738 = vpow2.f32 %v1356_v41  ;;  %v1252_v12 = vrot.slane %v1251_v23, 1  ;;  %6234 = vmatprep.mubr.f32.mxu0 %v2038_v44  ;;  %v1635_v62 = vmul.f32 %v6731_v2, %v7767_v63 }
  0xf7   : > { %v7851_v7 = vpop.eup %6732  ;;  %v1257_v21 = vrot.slane %v1256_v55, 2  ;;  %vm978_vm2 = vcmp.gt.f32.partialorder %v946_v9, 0.0  ;;  %v1010_v13 = vmul.f32 0.01, %v946_v9  ;;  %vm4131_vm9 = vcmask 1047559  }
  0xf8   : > { %v1544_v17 = vrot.slane %v1543_v11, 1  ;;  %v1546_v57 = vsel %vm1043_vm0, %v7851_v7, 0.0  ;;  %v1253_v22 = vmax.f32 %v1251_v23, %v1252_v12  ;;  %v1722_v39 = vsel %vm1043_vm0, %v1635_v62, 0 }
  0xf9   : > { %v1547_v49 = vrot.slane %v1546_v57, 4  ;;  %v1258_v45 = vmax.f32 %v1256_v55, %v1257_v21  ;;  %v1042_v61 = vsel %vm978_vm2, %v946_v9, %v1010_v13  ;;  %v7857_v10 = vand.u32 4294901760, %v1722_v39 }
  0xfa   : > { %v1545_v14 = vadd.f32 %v1544_v17, %v1543_v11  ;;  %v1297_v8 = vsub.f32 %v7822_v50, %v1253_v22  ;;  %v1261_v63 = vsel %vm1043_vm0, %v1042_v61, -inf  ;;  %vm3784_vm10 = vcmask 39968  }
  0xfb   : > { %9271 = vst [vmem:[#allocation21_spill] sm:$0xff] %v7857_v10  ;;  %v1548_v51 = vadd.f32 %v1547_v49, %v1546_v57  ;;  %v1259_v5 = vrot.slane %v1258_v45, 1  ;;  %v1262_v58 = vrot.slane %v1261_v63, 4  ;;  %v7864_v44 = vsub.f32 %v1722_v39, %v7857_v10  ;;  %6285 = vmatmul.mubr.f32.gmra.mxu1 %v7857_v10 }
  0xfc   : > { %6740 = vrcp.f32 %v1545_v14  ;;  %v1358_v62 = vmul.f32 1.442695, %v1297_v8 }
  0xfd   : > { %v7861_v41 = vpop.eup %6734  ;;  %v1549_v23 = vrot.slane %v1548_v51, 2  ;;  %v1260_v9 = vmax.f32 %v1258_v45, %v1259_v5  ;;  %v1263_v50 = vmax.f32 %v1261_v63, %v1262_v58  ;;  %v2046_v2 = vand.u32 4294901760, %v7864_v44 }
  0xfe   : > { %v1553_v55 = vsel %vm1043_vm0, %v7861_v41, 0.0  ;;  %6742 = vpow2.f32 %v1358_v62 }
  0xff   : > { %v1554_v11 = vrot.slane %v1553_v55, 4  ;;  %v1550_v12 = vadd.f32 %v1549_v23, %v1548_v51  ;;  %v1298_v21 = vsub.f32 %v1041_v56, %v1260_v9  ;;  %v1264_v13 = vrot.slane %v1263_v50, 2 }
 0x100   : > { %v2047_v17 = vsub.f32 %v7864_v44, %v2046_v2 }
 0x101   : > { %v1555_v57 = vadd.f32 %v1554_v11, %v1553_v55  ;;  %v1551_v22 = vrot.slane %v1550_v12, 1  ;;  %v1360_v39 = vmul.f32 1.442695, %v1298_v21  ;;  %v1265_v49 = vmax.f32 %v1263_v50, %v1264_v13 }
 0x102   : > { %v6737_v14 = vpop.eup %6736  ;;  %v2048_v8 = vand.u32 4294901760, %v2047_v17 }
 0x103   : > { %v1556_v10 = vrot.slane %v1555_v57, 2  ;;  %v7873_v45 = vpop.eup %6738  ;;  %v1637_v63 = vmul.f32 %v6737_v14, %v7804_v31  ;;  %v1552_v5 = vadd.f32 %v1551_v22, %v1550_v12  ;;  %6744 = vpow2.f32 %v1360_v39 }
 0x104   : > { %v1266_v51 = vrot.slane %v1265_v49, 1  ;;  %6235 = vmatmul.mubr.f32.gmra.mxu0 %v2048_v8  ;;  %v1560_v58 = vsel %vm1043_vm0, %v7873_v45, 0.0 }
 0x105   : > { %v1557_v56 = vadd.f32 %v1556_v10, %v1555_v57  ;;  %v1725_v62 = vsel %vm1043_vm0, %v1637_v63, 0  ;;  %6746 = vrcp.f32 %v1552_v5  ;;  %v1561_v23 = vrot.slane %v1560_v58, 4 }
 0x106   : > { %v1267_v55 = vmax.f32 %v1265_v49, %v1266_v51  ;;  %v7879_v9 = vand.u32 4294901760, %v1725_v62 }
 0x107   : > { %v1558_v50 = vrot.slane %v1557_v56, 1  ;;  %v1562_v11 = vadd.f32 %v1561_v23, %v1560_v58 }
 0x108   : > { %v1299_v21 = vsub.f32 %v1042_v61, %v1267_v55  ;;  %v7882_v31 = vsub.f32 %v1725_v62, %v7879_v9  ;;  %6287 = vmatprep.mubr.f32.mxu1 %v7879_v9 }
 0x109   : > { %v1559_v12 = vadd.f32 %v1558_v50, %v1557_v56  ;;  %v6741_v10 = vpop.eup %6740  ;;  %v1563_v13 = vrot.slane %v1562_v11, 2 }
 0x10a   : > { %v1362_v17 = vmul.f32 1.442695, %v1299_v21  ;;  %v9239_v57 = vand.u32 4294901760, %v7882_v31  ;;  %v1639_v22 = vmul.f32 %v6741_v10, %v7830_v40 }
 0x10b   : > { %6748 = vrcp.f32 %v1559_v12  ;;  %v7887_v39 = vpop.eup %6742  ;;  %v1564_v49 = vadd.f32 %v1563_v13, %v1562_v11 }
 0x10c   : > { %6750 = vpow2.f32 %v1362_v17  ;;  %v2057_v61 = vsub.f32 %v7882_v31, %v9239_v57  ;;  %v1728_v14 = vsel %vm1043_vm0, %v1639_v22, 0  ;;  %v1567_v8 = vsel %vm1043_vm0, %v7887_v39, 0.0 }
 0x10d   : > { %v7895_v63 = vand.u32 4294901760, %v1728_v14  ;;  %v1565_v5 = vrot.slane %v1564_v49, 1  ;;  %v1568_v51 = vrot.slane %v1567_v8, 4 }
 0x10e   : > { %v2058_v56 = vand.u32 4294901760, %v2057_v61 }
 0x10f   : > { %v7898_v40 = vsub.f32 %v1728_v14, %v7895_v63  ;;  %6288 = vmatmul.mubr.f32.gmra.mxu1 %v7895_v63  ;;  %v1566_v58 = vadd.f32 %v1565_v5, %v1564_v49  ;;  %v1569_v62 = vadd.f32 %v1568_v51, %v1567_v8 }
 0x110   : > { %v7901_v23 = vpop.eup %6744  ;;  %6237 = vmatprep.mubr.f32.mxu0 %v2058_v56 }
 0x111   : > { %v2066_v55 = vand.u32 4294901760, %v7898_v40  ;;  %6752 = vrcp.f32 %v1566_v58  ;;  %v1570_v50 = vrot.slane %v1569_v62, 2  ;;  %v1574_v11 = vsel %vm1043_vm0, %v7901_v23, 0.0 }
 0x112   : > { %v6747_v21 = vpop.eup %6746  ;;  %v1575_v12 = vrot.slane %v1574_v11, 4 }
 0x113   : > { %v2067_v10 = vsub.f32 %v7898_v40, %v2066_v55  ;;  %v1641_v13 = vmul.f32 %v6747_v21, %v7851_v7  ;;  %v1571_v17 = vadd.f32 %v1570_v50, %v1569_v62 }
 0x114   : > { %v1576_v22 = vadd.f32 %v1575_v12, %v1574_v11 }
 0x115   : > { %v2068_v49 = vand.u32 4294901760, %v2067_v10  ;;  %v1731_v61 = vsel %vm1043_vm0, %v1641_v13, 0  ;;  %v1572_v14 = vrot.slane %v1571_v17, 1 }
 0x116   : > { %v7911_v8 = vand.u32 4294901760, %v1731_v61  ;;  %v1577_v5 = vrot.slane %v1576_v22, 2 }
 0x117   : > { %6238 = vmatmul.mubr.f32.gmra.mxu0 %v2068_v49  ;;  %v1573_v56 = vadd.f32 %v1572_v14, %v1571_v17 }
 0x118   : > { %v6749_v51 = vpop.eup %6748  ;;  %v7914_v57 = vsub.f32 %v1731_v61, %v7911_v8  ;;  %6290 = vmatprep.mubr.f32.mxu1 %v7911_v8  ;;  %v1578_v62 = vadd.f32 %v1577_v5, %v1576_v22 }
 0x119   : > { %v6751_v58 = vpop.eup %6750  ;;  %v1643_v7 = vmul.f32 %v6749_v51, %v7861_v41  ;;  %6754 = vrcp.f32 %v1573_v56 }
 0x11a   : > { %v1581_v50 = vsel %vm1043_vm0, %v6751_v58, 0.0  ;;  %v2076_v11 = vand.u32 4294901760, %v7914_v57  ;;  %v1579_v12 = vrot.slane %v1578_v62, 1 }
 0x11b   : > { %v1734_v21 = vsel %vm1043_vm0, %v1643_v7, 0  ;;  %v1582_v10 = vrot.slane %v1581_v50, 4 }
 0x11c   : > { %v7921_v13 = vand.u32 4294901760, %v1734_v21  ;;  %v2077_v17 = vsub.f32 %v7914_v57, %v2076_v11  ;;  %v1580_v49 = vadd.f32 %v1579_v12, %v1578_v62 }
 0x11d   : > { %v1583_v61 = vadd.f32 %v1582_v10, %v1581_v50 }
 0x11e   : > { %v7927_v41 = vsub.f32 %v1734_v21, %v7921_v13  ;;  %6291 = vmatmul.mubr.f32.gmra.mxu1 %v7921_v13  ;;  %v6753_v22 = vpop.eup %6752  ;;  %v2078_v14 = vand.u32 4294901760, %v2077_v17  ;;  %6756 = vrcp.f32 %v1580_v49 }
 0x11f   : > { %v1584_v5 = vrot.slane %v1583_v61, 2  ;;  %v1645_v56 = vmul.f32 %v6753_v22, %v7873_v45 }
 0x120   : > { %v9241_v51 = vand.u32 4294901760, %v7927_v41  ;;  %6240 = vmatprep.mubr.f32.mxu0 %v2078_v14 }
 0x121   : > { %v1585_v7 = vadd.f32 %v1584_v5, %v1583_v61  ;;  %v1737_v50 = vsel %vm1043_vm0, %v1645_v56, 0 }
 0x122   : > { %v2087_v62 = vsub.f32 %v7927_v41, %v9241_v51  ;;  %v7936_v21 = vand.u32 4294901760, %v1737_v50 }
 0x123   : > { %v1586_v12 = vrot.slane %v1585_v7, 1 }
 0x124   : > { %v2088_v10 = vand.u32 4294901760, %v2087_v62  ;;  %v7939_v17 = vsub.f32 %v1737_v50, %v7936_v21  ;;  %6293 = vmatprep.mubr.f32.mxu1 %v7936_v21 }
 0x125   : > { %v1587_v49 = vadd.f32 %v1586_v12, %v1585_v7 }
 0x126   : > { %6241 = vmatmul.mubr.f32.gmra.mxu0 %v2088_v10  ;;  %v6755_v45 = vpop.eup %6754  ;;  %v9240_v61 = vand.u32 4294901760, %v7939_v17 }
 0x127   : > { %6758 = vrcp.f32 %v1587_v49  ;;  %v1647_v22 = vmul.f32 %v6755_v45, %v7887_v39 }
 0x128   : > { %v2097_v14 = vsub.f32 %v7939_v17, %v9240_v61 }
 0x129   : > { %v1740_v5 = vsel %vm1043_vm0, %v1647_v22, 0 }
 0x12a   : > { %v2098_v56 = vand.u32 4294901760, %v2097_v14  ;;  %v7948_v62 = vand.u32 4294901760, %v1740_v5 }
 0x12b   : > { %v6757_v50 = vpop.eup %6756 }
 0x12c   : > { %6243 = vmatprep.mubr.f32.mxu0 %v2098_v56  ;;  %v7951_v7 = vsub.f32 %v1740_v5, %v7948_v62  ;;  %6294 = vmatmul.mubr.f32.gmra.mxu1 %v7948_v62  ;;  %v1649_v12 = vmul.f32 %v6757_v50, %v7901_v23 }
 0x12e   : > { %v9244_v39 = vand.u32 4294901760, %v7951_v7  ;;  %v1743_v10 = vsel %vm1043_vm0, %v1649_v12, 0 }
 0x12f   : > { %v7957_v49 = vand.u32 4294901760, %v1743_v10 }
 0x130   : > { %v2107_v45 = vsub.f32 %v7951_v7, %v9244_v39 }
 0x131   : > { %v7963_v22 = vsub.f32 %v1743_v10, %v7957_v49  ;;  %6296 = vmatprep.mubr.f32.mxu1 %v7957_v49 }
 0x132   : > { %v2108_v14 = vand.u32 4294901760, %v2107_v45  ;;  %v9272_v45 = vand.u32 4294901760, %v7333_v59 }
 0x133   : > { %v9242_v56 = vand.u32 4294901760, %v7963_v22 }
 0x134   : > { %v6759_v5 = vpop.eup %6758  ;;  %6244 = vmatmul.mubr.f32.gmra.mxu0 %v2108_v14 }
 0x135   : > { %v1651_v23 = vmul.f32 %v6759_v5, %v6751_v58  ;;  %v2117_v50 = vsub.f32 %v7963_v22, %v9242_v56  ;;  %v9273_v5 = vand.u32 4294901760, %v7348_v27  ;;  %v9276_v56 = vand.u32 4294901760, %v7366_v48 }
 0x137   : > { %v1746_v12 = vsel %vm1043_vm0, %v1651_v23, 0  ;;  %v2118_v61 = vand.u32 4294901760, %v2117_v50  ;;  %v9275_v50 = vand.u32 4294901760, %v7372_v53  ;;  %vm3559_vm0 = vcmask 261120  }
 0x138   : > { %v7971_v51 = vand.u32 4294901760, %v1746_v12 }
 0x139   : > { %6246 = vmatprep.mubr.f32.mxu0 %v2118_v61  ;;  %v9274_v61 = vand.u32 4294901760, %v7356_v37 }
 0x13a   : > { %v7974_v10 = vsub.f32 %v1746_v12, %v7971_v51  ;;  %6297 = vmatmul.mubr.f32.gmra.mxu1 %v7971_v51  ;;  %v6203_v12 = vpop.f32.mrf.mxu0 }
 0x13b   : > { %6351 = vmatprep.mubr.f32.mxu1 %v9272_v45  ;;  %v6253_v45 = vpop.f32.mrf.mxu1 }
 0x13c   : > { %v9243_v58 = vand.u32 4294901760, %v7974_v10 }
 0x13d   : > { %v2206_v39 = vpop.f32.mrf.mxu1 }
 0x13e   : > { %v2127_v14 = vsub.f32 %v7974_v10, %v9243_v58  ;;  %6352 = vmatmul.mubr.f32.vlgmr.msra.gmra.mxu1 %v9273_v5  ;;  %v7993_v58 = vadd.f32 %v6253_v45, %v6203_v12  ;;  %v1820_v5 = vpop.f32.mrf.mxu0 }
 0x13f   : > { %6450 = vmatpush3.msra.mxu1 %v7047_v1  ;;  %6354 = vmatprep.mubr.f32.mxu1 %v9274_v61  ;;  %v7995_v1 = vadd.f32 %v2206_v39, %v1820_v5 }
 0x140   : > { %v2128_v23 = vand.u32 4294901760, %v2127_v14  ;;  %v9277_v14 = vand.u32 4294901760, %v7401_v33  ;;  %v6206_v61 = vpop.f32.mrf.mxu0 }
 0x142   : > { %6247 = vmatmul.mubr.f32.gmra.mxu0 %v2128_v23  ;;  %6355 = vmatmul.mubr.f32.gmra.mxu1 %v9275_v50  ;;  %v6256_v23 = vpop.f32.mrf.mxu1  ;;  %v1840_v50 = vpop.f32.mrf.mxu0 }
 0x143   : > { %6301 = vmatprep.mubr.f32.mxu0 %v7333_v59  ;;  %6357 = vmatprep.mubr.f32.mxu1 %v9276_v56  ;;  %v8002_v59 = vadd.f32 %v6256_v23, %v6206_v61  ;;  %v9278_v56 = vand.u32 4294901760, %v7423_v42 }
 0x144   : > { %v2218_v12 = vpop.f32.mrf.mxu1  ;;  %v6209_v45 = vpop.f32.mrf.mxu0 }
 0x145   : > { %v8006_v39 = vadd.f32 %v2218_v12, %v1840_v50 }
 0x146   : > { %6302 = vmatmul.mubr.f32.vlgmr.msra.gmra.mxu0 %v7348_v27  ;;  %6358 = vmatmul.mubr.f32.gmra.mxu1 %v9277_v14  ;;  %v9279_v27 = vand.u32 4294901760, %v7454_v29  ;;  %v6259_v5 = vpop.f32.mrf.mxu1  ;;  %v1860_v14 = vpop.f32.mrf.mxu0 }
 0x147   : > { %6400 = vmatpush3.msra.mxu0 %v7060_v6  ;;  %6304 = vmatprep.mubr.f32.mxu0 %v7356_v37  ;;  %v9280_v6 = vand.u32 4294901760, %v7462_v20  ;;  %v8014_v37 = vadd.f32 %v6259_v5, %v6209_v45 }
 0x148   : > { %6360 = vmatprep.mubr.f32.mxu1 %v9278_v56  ;;  %v2230_v61 = vpop.f32.mrf.mxu1  ;;  %v6212_v56 = vpop.f32.mrf.mxu0 }
 0x149   : > { %v8016_v23 = vadd.f32 %v2230_v61, %v1860_v14  ;;  %v9284_v14 = vand.u32 4294901760, %v7600_v30 }
 0x14a   : > { %6305 = vmatmul.mubr.f32.gmra.mxu0 %v7372_v53  ;;  %6361 = vmatmul.mubr.f32.gmra.mxu1 %v9279_v27  ;;  %v9281_v53 = vand.u32 4294901760, %v7502_v35  ;;  %v6262_v50 = vpop.f32.mrf.mxu1  ;;  %v1880_v27 = vpop.f32.mrf.mxu0 }
 0x14b   : > { %6307 = vmatprep.mubr.f32.mxu0 %v7366_v48  ;;  %6363 = vmatprep.mubr.f32.mxu1 %v9280_v6  ;;  %v9282_v48 = vand.u32 4294901760, %v7522_v25  ;;  %v8024_v12 = vadd.f32 %v6262_v50, %v6212_v56  ;;  %v9285_v56 = vand.u32 4294901760, %v7623_v52 }
 0x14c   : > { %v2242_v45 = vpop.f32.mrf.mxu1 }
 0x14d   : > { %v8026_v5 = vadd.f32 %v2242_v45, %v1880_v27  ;;  %v9289_v27 = vand.u32 4294901760, %v7721_v47 }
 0x14e   : > { %6308 = vmatmul.mubr.f32.gmra.mxu0 %v7401_v33  ;;  %6364 = vmatmul.mubr.f32.gmra.mxu1 %v9281_v53  ;;  %v9283_v33 = vand.u32 4294901760, %v7563_v54  ;;  %v6265_v6 = vpop.f32.mrf.mxu1 }
 0x14f   : > { %6310 = vmatprep.mubr.f32.mxu0 %v7423_v42  ;;  %6366 = vmatprep.mubr.f32.mxu1 %v9282_v48 }
 0x150   : > { %v2254_v61 = vpop.f32.mrf.mxu1 }
 0x152   : > { %6311 = vmatmul.mubr.f32.gmra.mxu0 %v7454_v29  ;;  %6367 = vmatmul.mubr.f32.gmra.mxu1 %v9283_v33  ;;  %v6215_v42 = vpop.f32.mrf.mxu0  ;;  %v9286_v29 = vand.u32 4294901760, %v7641_v36 }
 0x153   : > { %6313 = vmatprep.mubr.f32.mxu0 %v7462_v20  ;;  %6369 = vmatprep.mubr.f32.mxu1 %v9284_v14  ;;  %v8034_v53 = vadd.f32 %v6265_v6, %v6215_v42  ;;  %v9287_v20 = vand.u32 4294901760, %v7664_v38  ;;  %v9305_v42 = vld [vmem:[#allocation11_spill] sm:$0xff] }
 0x154   : > { %v1900_v50 = vpop.f32.mrf.mxu0 }
 0x155   : > { %v8042_v48 = vadd.f32 %v2254_v61, %v1900_v50  ;;  %v9307_v50 = vld [vmem:[#allocation13_spill] sm:$0xff] }
 0x156   : > { %6314 = vmatmul.mubr.f32.gmra.mxu0 %v7502_v35  ;;  %6370 = vmatmul.mubr.f32.gmra.mxu1 %v9285_v56  ;;  %v9288_v35 = vand.u32 4294901760, %v7691_v24 }
 0x157   : > { %6316 = vmatprep.mubr.f32.mxu0 %v7522_v25  ;;  %6372 = vmatprep.mubr.f32.mxu1 %v9286_v29  ;;  %v9290_v25 = vand.u32 4294901760, %v7737_v3  ;;  %v9308_v29 = vld [vmem:[#allocation14_spill] sm:$0xff] }
 0x15a   : > { %6317 = vmatmul.mubr.f32.gmra.mxu0 %v7563_v54  ;;  %6373 = vmatmul.mubr.f32.gmra.mxu1 %v9287_v20  ;;  %v9291_v54 = vand.u32 4294901760, %v7758_v18 }
 0x15b   : > { %6319 = vmatprep.mubr.f32.mxu0 %v7600_v30  ;;  %6375 = vmatprep.mubr.f32.mxu1 %v9288_v35  ;;  %v9292_v30 = vand.u32 4294901760, %v7797_v15  ;;  %v9309_v35 = vld [vmem:[#allocation15_spill] sm:$0xff] }
 0x15e   : > { %6320 = vmatmul.mubr.f32.gmra.mxu0 %v7623_v52  ;;  %6376 = vmatmul.mubr.f32.gmra.mxu1 %v9289_v27  ;;  %v6268_v45 = vpop.f32.mrf.mxu1  ;;  %v9293_v52 = vand.u32 4294901760, %v7816_v60  ;;  %v9310_v27 = vld [vmem:[#allocation16_spill] sm:$0xff] }
 0x15f   : > { %6322 = vmatprep.mubr.f32.mxu0 %v7641_v36  ;;  %6378 = vmatprep.mubr.f32.mxu1 %v9290_v25  ;;  %v9294_v36 = vand.u32 4294901760, %v7836_v28 }
 0x160   : > { %v2266_v33 = vpop.f32.mrf.mxu1 }
 0x162   : > { %6323 = vmatmul.mubr.f32.gmra.mxu0 %v7664_v38  ;;  %6379 = vmatmul.mubr.f32.gmra.mxu1 %v9291_v54 }
 0x163   : > { %6325 = vmatprep.mubr.f32.mxu0 %v7691_v24  ;;  %6381 = vmatprep.mubr.f32.mxu1 %v9292_v30  ;;  %v9311_v30 = vld [vmem:[#allocation17_spill] sm:$0xff] }
 0x166   : > { %6326 = vmatmul.mubr.f32.gmra.mxu0 %v7721_v47  ;;  %6382 = vmatmul.mubr.f32.gmra.mxu1 %v9293_v52  ;;  %v6218_v38 = vpop.f32.mrf.mxu0  ;;  %v9295_v47 = vand.u32 4294901760, %v7882_v31  ;;  %v9312_v52 = vld [vmem:[#allocation18_spill] sm:$0xff] }
 0x167   : > { %6328 = vmatprep.mubr.f32.mxu0 %v7737_v3  ;;  %6384 = vmatprep.mubr.f32.mxu1 %v9294_v36  ;;  %v8068_v6 = vadd.f32 %v6268_v45, %v6218_v38  ;;  %v9296_v3 = vand.u32 4294901760, %v7927_v41 }
 0x168   : > { %v1920_v24 = vpop.f32.mrf.mxu0 }
 0x169   : > { %v8076_v14 = vadd.f32 %v2266_v33, %v1920_v24  ;;  %v9313_v33 = vld [vmem:[#allocation19_spill] sm:$0xff]  ;;  %v9314_v24 = vld [vmem:[#allocation20_spill] sm:$0xff] }
 0x16a   : > { %6329 = vmatmul.mubr.f32.gmra.mxu0 %v7758_v18  ;;  %6385 = vmatmul.mubr.f32.gmra.mxu1 %v2046_v2  ;;  %v9297_v18 = vand.u32 4294901760, %v7939_v17 }
 0x16b   : > { %6331 = vmatprep.mubr.f32.mxu0 %v7797_v15  ;;  %6387 = vmatprep.mubr.f32.mxu1 %v9295_v47  ;;  %v9298_v15 = vand.u32 4294901760, %v7951_v7  ;;  %v9315_v47 = vld [vmem:[#allocation21_spill] sm:$0xff] }
 0x16e   : > { %6332 = vmatmul.mubr.f32.gmra.mxu0 %v7816_v60  ;;  %6388 = vmatmul.mubr.f32.gmra.mxu1 %v2066_v55  ;;  %v9299_v60 = vand.u32 4294901760, %v7963_v22 }
 0x16f   : > { %6334 = vmatprep.mubr.f32.mxu0 %v7836_v28  ;;  %6390 = vmatprep.mubr.f32.mxu1 %v2076_v11 }
 0x171   : > { %v6271_v28 = vpop.f32.mrf.mxu1 }
 0x172   : > { %6335 = vmatmul.mubr.f32.gmra.mxu0 %v7864_v44  ;;  %6391 = vmatmul.mubr.f32.gmra.mxu1 %v9296_v3  ;;  %v9300_v44 = vand.u32 4294901760, %v7974_v10 }
 0x173   : > { %6337 = vmatprep.mubr.f32.mxu0 %v7882_v31  ;;  %6393 = vmatprep.mubr.f32.mxu1 %v9297_v18  ;;  %v2278_v31 = vpop.f32.mrf.mxu1 }
 0x176   : > { %6338 = vmatmul.mubr.f32.gmra.mxu0 %v7898_v40  ;;  %6394 = vmatmul.mubr.f32.gmra.mxu1 %v9298_v15 }
 0x177   : > { %6340 = vmatprep.mubr.f32.mxu0 %v7914_v57  ;;  %6396 = vmatprep.mubr.f32.mxu1 %v9299_v60 }
 0x179   : > { %v6221_v2 = vpop.f32.mrf.mxu0 }
 0x17a   : > { %6341 = vmatmul.mubr.f32.gmra.mxu0 %v7927_v41  ;;  %6397 = vmatmul.mubr.f32.gmra.mxu1 %v9300_v44  ;;  %v8101_v40 = vadd.f32 %v6271_v28, %v6221_v2 }
 0x17b   : > { %6343 = vmatprep.mubr.f32.mxu0 %v7939_v17  ;;  %6451 = vmatprep.mubr.f32.mxu1 %v7323_v16  ;;  %v1940_v55 = vpop.f32.mrf.mxu0 }
 0x17c   : > { %v8105_v57 = vadd.f32 %v2278_v31, %v1940_v55 }
 0x17e   : > { %6344 = vmatmul.mubr.f32.gmra.mxu0 %v7951_v7  ;;  %6452 = vmatmul.mubr.f32.vlgmr.msra.gmra.mxu1 %v7336_v46 }
 0x17f   : > { %6346 = vmatprep.mubr.f32.mxu0 %v7963_v22  ;;  %6454 = vmatprep.mubr.f32.mxu1 %v7340_v32  ;;  %v9303_v22 = vld [vmem:[#allocation9_spill] sm:$0xff] }
 0x180   : > { %v6274_v11 = vpop.f32.mrf.mxu1 }
 0x182   : > { %6347 = vmatmul.mubr.f32.gmra.mxu0 %v7974_v10  ;;  %6455 = vmatmul.mubr.f32.gmra.mxu1 %v7359_v19  ;;  %v2290_v17 = vpop.f32.mrf.mxu1 }
 0x183   : > { %6401 = vmatprep.mubr.f32.mxu0 %v7323_v16  ;;  %6457 = vmatprep.mubr.f32.mxu1 %v7352_v43 }
 0x186   : > { %6402 = vmatmul.mubr.f32.vlgmr.msra.gmra.mxu0 %v7336_v46  ;;  %6458 = vmatmul.mubr.f32.gmra.mxu1 %v7387_v26 }
 0x187   : > { %6404 = vmatprep.mubr.f32.mxu0 %v7340_v32  ;;  %6460 = vmatprep.mubr.f32.mxu1 %v7409_v34  ;;  %v9301_v32 = vld [vmem:[#allocation7_spill] sm:$0xff] }
 0x188   : > { %v6224_v41 = vpop.f32.mrf.mxu0 }
 0x189   : > { %v8121_v16 = vadd.f32 %v6274_v11, %v6224_v41 }
 0x18a   : > { %6405 = vmatmul.mubr.f32.gmra.mxu0 %v7359_v19  ;;  %6461 = vmatmul.mubr.f32.gmra.mxu1 %v7445_v4  ;;  %v1960_v46 = vpop.f32.mrf.mxu0  ;;  %v9302_v19 = vld [vmem:[#allocation8_spill] sm:$0xff] }
 0x18b   : > { %6407 = vmatprep.mubr.f32.mxu0 %v7352_v43  ;;  %6463 = vmatprep.mubr.f32.mxu1 %v7457_v0  ;;  %v8123_v7 = vadd.f32 %v2290_v17, %v1960_v46  ;;  %v9304_v43 = vld [vmem:[#allocation10_spill] sm:$0xff] }
 0x18d   : > { %v6277_v10 = vpop.f32.mrf.mxu1 }
 0x18e   : > { %6408 = vmatmul.mubr.f32.gmra.mxu0 %v7387_v26  ;;  %6464 = vmatmul.mubr.f32.gmra.mxu1 %v9301_v32  ;;  %v9306_v26 = vld [vmem:[#allocation12_spill] sm:$0xff] }
 0x18f   : > { %6410 = vmatprep.mubr.f32.mxu0 %v7409_v34  ;;  %6466 = vmatprep.mubr.f32.mxu1 %v9302_v19  ;;  %v2302_v61 = vpop.f32.mrf.mxu1 }
 0x192   : > { %6411 = vmatmul.mubr.f32.gmra.mxu0 %v7445_v4  ;;  %6467 = vmatmul.mubr.f32.gmra.mxu1 %v9303_v22 }
 0x193   : > { %6413 = vmatprep.mubr.f32.mxu0 %v7457_v0  ;;  %6469 = vmatprep.mubr.f32.mxu1 %v9304_v43 }
 0x195   : > { %v6227_v34 = vpop.f32.mrf.mxu0 }
 0x196   : > { %6414 = vmatmul.mubr.f32.gmra.mxu0 %v9301_v32  ;;  %6470 = vmatmul.mubr.f32.gmra.mxu1 %v9305_v42  ;;  %v8137_v56 = vadd.f32 %v6277_v10, %v6227_v34 }
 0x197   : > { %6416 = vmatprep.mubr.f32.mxu0 %v9302_v19  ;;  %6472 = vmatprep.mubr.f32.mxu1 %v9306_v26  ;;  %v1980_v4 = vpop.f32.mrf.mxu0  ;;  %v6280_v20 = vpop.f32.mrf.mxu1 }
 0x198   : > { %v8141_v0 = vadd.f32 %v2302_v61, %v1980_v4 }
 0x199   : > { %v2314_v54 = vpop.f32.mrf.mxu1 }
 0x19a   : > { %6417 = vmatmul.mubr.f32.gmra.mxu0 %v9303_v22  ;;  %6473 = vmatmul.mubr.f32.gmra.mxu1 %v9307_v50 }
 0x19b   : > { %6419 = vmatprep.mubr.f32.mxu0 %v9304_v43  ;;  %6475 = vmatprep.mubr.f32.mxu1 %v9308_v29 }
 0x19e   : > { %6420 = vmatmul.mubr.f32.gmra.mxu0 %v9305_v42  ;;  %6476 = vmatmul.mubr.f32.gmra.mxu1 %v9309_v35 }
 0x19f   : > { %6422 = vmatprep.mubr.f32.mxu0 %v9306_v26  ;;  %6478 = vmatprep.mubr.f32.mxu1 %v9310_v27  ;;  %v6230_v25 = vpop.f32.mrf.mxu0 }
 0x1a0   : > { %v8151_v45 = vadd.f32 %v6280_v20, %v6230_v25 }
 0x1a1   : > { %v2000_v36 = vpop.f32.mrf.mxu0 }
 0x1a2   : > { %6423 = vmatmul.mubr.f32.gmra.mxu0 %v9307_v50  ;;  %6479 = vmatmul.mubr.f32.gmra.mxu1 %v9311_v30  ;;  %v8155_v38 = vadd.f32 %v2314_v54, %v2000_v36 }
 0x1a3   : > { %6425 = vmatprep.mubr.f32.mxu0 %v9308_v29  ;;  %6481 = vmatprep.mubr.f32.mxu1 %v9312_v52 }
 0x1a6   : > { %6426 = vmatmul.mubr.f32.gmra.mxu0 %v9309_v35  ;;  %6482 = vmatmul.mubr.f32.gmra.mxu1 %v9313_v33 }
 0x1a7   : > { %6428 = vmatprep.mubr.f32.mxu0 %v9310_v27  ;;  %6484 = vmatprep.mubr.f32.mxu1 %v9314_v24 }
 0x1a9   : > { %v6283_v3 = vpop.f32.mrf.mxu1 }
 0x1aa   : > { %6429 = vmatmul.mubr.f32.gmra.mxu0 %v9311_v30  ;;  %6485 = vmatmul.mubr.f32.gmra.mxu1 %v9315_v47 }
 0x1ab   : > { %6431 = vmatprep.mubr.f32.mxu0 %v9312_v52  ;;  %6487 = vmatprep.mubr.f32.mxu1 %v7879_v9  ;;  %v2326_v15 = vpop.f32.mrf.mxu1 }
 0x1ae   : > { %6432 = vmatmul.mubr.f32.gmra.mxu0 %v9313_v33  ;;  %6488 = vmatmul.mubr.f32.gmra.mxu1 %v7895_v63 }
 0x1af   : > { %6434 = vmatprep.mubr.f32.mxu0 %v9314_v24  ;;  %6490 = vmatprep.mubr.f32.mxu1 %v7911_v8 }
 0x1b1   : > { %v6233_v18 = vpop.f32.mrf.mxu0 }
 0x1b2   : > { %6435 = vmatmul.mubr.f32.gmra.mxu0 %v9315_v47  ;;  %6491 = vmatmul.mubr.f32.gmra.mxu1 %v7921_v13  ;;  %v8173_v60 = vadd.f32 %v6283_v3, %v6233_v18 }
 0x1b3   : > { %6437 = vmatprep.mubr.f32.mxu0 %v7879_v9  ;;  %6493 = vmatprep.mubr.f32.mxu1 %v7936_v21  ;;  %v2020_v28 = vpop.f32.mrf.mxu0 }
 0x1b4   : > { %v8177_v44 = vadd.f32 %v2326_v15, %v2020_v28 }
 0x1b6   : > { %6438 = vmatmul.mubr.f32.gmra.mxu0 %v7895_v63  ;;  %6494 = vmatmul.mubr.f32.gmra.mxu1 %v7948_v62 }
 0x1b7   : > { %6440 = vmatprep.mubr.f32.mxu0 %v7911_v8  ;;  %6496 = vmatprep.mubr.f32.mxu1 %v7957_v49 }
 0x1ba   : > { %6441 = vmatmul.mubr.f32.gmra.mxu0 %v7921_v13  ;;  %6497 = vmatmul.mubr.f32.gmra.mxu1 %v7971_v51 }
 0x1bb   : > { %6443 = vmatprep.mubr.f32.mxu0 %v7936_v21  ;;  %v6286_v9 = vpop.f32.mrf.mxu1 }
 0x1bd   : > { %v2338_v2 = vpop.f32.mrf.mxu1 }
 0x1be   : > { %6444 = vmatmul.mubr.f32.gmra.mxu0 %v7948_v62 }
 0x1bf   : > { %6446 = vmatprep.mubr.f32.mxu0 %v7957_v49 }
 0x1c2   : > { %6447 = vmatmul.mubr.f32.gmra.mxu0 %v7971_v51 }
 0x1c4   : > { %v6236_v63 = vpop.f32.mrf.mxu0 }
 0x1c5   : > { %v8187_v31 = vadd.f32 %v6286_v9, %v6236_v63 }
 0x1c6   : > { %v2040_v8 = vpop.f32.mrf.mxu0 }
 0x1c7   : > { %v8189_v55 = vadd.f32 %v2338_v2, %v2040_v8 }
 0x1cf   : > { %v6289_v11 = vpop.f32.mrf.mxu1 }
 0x1d1   : > { %v2350_v41 = vpop.f32.mrf.mxu1 }
 0x1d7   : > { %v6239_v13 = vpop.f32.mrf.mxu0 }
 0x1d8   : > { %v8191_v17 = vadd.f32 %v6289_v11, %v6239_v13 }
 0x1d9   : > { %v2060_v21 = vpop.f32.mrf.mxu0 }
 0x1da   : > { %v8193_v46 = vadd.f32 %v2350_v41, %v2060_v21 }
 0x1de   : > { %v6292_v62 = vpop.f32.mrf.mxu1 }
 0x1e0   : > { %v2362_v32 = vpop.f32.mrf.mxu1 }
 0x1e6   : > { %v6242_v49 = vpop.f32.mrf.mxu0 }
 0x1e7   : > { %v8195_v19 = vadd.f32 %v6292_v62, %v6242_v49 }
 0x1e8   : > { %v2080_v51 = vpop.f32.mrf.mxu0 }
 0x1e9   : > { %v8197_v22 = vadd.f32 %v2362_v32, %v2080_v51 }
 0x1ec   : > { %v6295_v43 = vpop.f32.mrf.mxu1 }
 0x1ee   : > { %v2374_v42 = vpop.f32.mrf.mxu1 }
 0x1f4   : > { %v6245_v10 = vpop.f32.mrf.mxu0 }
 0x1f5   : > { %v8199_v26 = vadd.f32 %v6295_v43, %v6245_v10 }
 0x1f6   : > { %v2100_v34 = vpop.f32.mrf.mxu0 }
 0x1f7   : > { %v8201_v61 = vadd.f32 %v2374_v42, %v2100_v34 }
 0x1fa   : > { %v6298_v4 = vpop.f32.mrf.mxu1 }
 0x1fc   : > { %v2386_v50 = vpop.f32.mrf.mxu1 }
 0x1fe   : > { %v6353_v29 = vpop.f32.mrf.mxu1 }
 0x200   : > { %v2757_v20 = vpop.f32.mrf.mxu1 }
 0x202   : > { %v6248_v35 = vpop.f32.mrf.mxu0  ;;  %v6356_v27 = vpop.f32.mrf.mxu1 }
 0x203   : > { %v8203_v25 = vadd.f32 %v6298_v4, %v6248_v35 }
 0x204   : > { %v2120_v54 = vpop.f32.mrf.mxu0  ;;  %v2773_v30 = vpop.f32.mrf.mxu1 }
 0x205   : > { %v8205_v52 = vadd.f32 %v2386_v50, %v2120_v54 }
 0x206   : > { %v6303_v36 = vpop.f32.mrf.mxu0  ;;  %v6359_v33 = vpop.f32.mrf.mxu1 }
 0x207   : > { %v2474_v24 = vadd.f32 %v6303_v36, %v7993_v58 }
 0x208   : > { %v2466_v47 = vpop.f32.mrf.mxu0  ;;  %v8208_v3 = vpop.f32.mrf.mxu1 }
 0x209   : > { %v8210_v18 = vadd.f32 %v6353_v29, %v2474_v24  ;;  %v2467_v15 = vadd.f32 %v2466_v47, %v7995_v1 }
 0x20a   : > { %v6306_v28 = vpop.f32.mrf.mxu0  ;;  %v8213_v9 = vpop.f32.mrf.mxu1 }
 0x20b   : > { %v8215_v63 = vadd.f32 %v2757_v20, %v2467_v15  ;;  %v2488_v2 = vadd.f32 %v6306_v28, %v8002_v59 }
 0x20c   : > { %v2480_v8 = vpop.f32.mrf.mxu0  ;;  %v8218_v11 = vpop.f32.mrf.mxu1 }
 0x20d   : > { %v8220_v13 = vadd.f32 %v6356_v27, %v2488_v2  ;;  %v2481_v58 = vadd.f32 %v2480_v8, %v8006_v39 }
 0x20e   : > { %v6309_v41 = vpop.f32.mrf.mxu0  ;;  %v6365_v21 = vpop.f32.mrf.mxu1 }
 0x20f   : > { %v8223_v62 = vadd.f32 %v2773_v30, %v2481_v58  ;;  %v2502_v1 = vadd.f32 %v6309_v41, %v8014_v37 }
 0x210   : > { %v8226_v49 = vpop.f32.mrf.mxu0  ;;  %v2821_v32 = vpop.f32.mrf.mxu1 }
 0x211   : > { %v8228_v51 = vadd.f32 %v6359_v33, %v2502_v1 }
 0x212   : > { %v8230_v43 = vpop.f32.mrf.mxu0  ;;  %v6368_v59 = vpop.f32.mrf.mxu1 }
 0x214   : > { %v8232_v10 = vpop.f32.mrf.mxu0  ;;  %v2837_v42 = vpop.f32.mrf.mxu1 }
 0x216   : > { %v6315_v34 = vpop.f32.mrf.mxu0  ;;  %v6371_v4 = vpop.f32.mrf.mxu1 }
 0x217   : > { %v2530_v39 = vadd.f32 %v6315_v34, %v8034_v53 }
 0x218   : > { %v2522_v50 = vpop.f32.mrf.mxu0  ;;  %v2853_v29 = vpop.f32.mrf.mxu1 }
 0x219   : > { %v8235_v20 = vadd.f32 %v6365_v21, %v2530_v39  ;;  %v2523_v37 = vadd.f32 %v2522_v50, %v8042_v48 }
 0x21a   : > { %v6318_v35 = vpop.f32.mrf.mxu0  ;;  %v6374_v27 = vpop.f32.mrf.mxu1 }
 0x21b   : > { %v8238_v54 = vadd.f32 %v2821_v32, %v2523_v37  ;;  %v2544_v30 = vadd.f32 %v6318_v35, %v8068_v6 }
 0x21c   : > { %v2536_v36 = vpop.f32.mrf.mxu0  ;;  %v2869_v33 = vpop.f32.mrf.mxu1 }
 0x21d   : > { %v8241_v24 = vadd.f32 %v6368_v59, %v2544_v30  ;;  %v2537_v47 = vadd.f32 %v2536_v36, %v8076_v14 }
 0x21e   : > { %v6321_v15 = vpop.f32.mrf.mxu0  ;;  %v6377_v53 = vpop.f32.mrf.mxu1 }
 0x21f   : > { %v8244_v28 = vadd.f32 %v2837_v42, %v2537_v47  ;;  %v2558_v2 = vadd.f32 %v6321_v15, %v8101_v40 }
 0x220   : > { %v2550_v8 = vpop.f32.mrf.mxu0  ;;  %v2885_v48 = vpop.f32.mrf.mxu1 }
 0x221   : > { %v8247_v58 = vadd.f32 %v6371_v4, %v2558_v2  ;;  %v2551_v41 = vadd.f32 %v2550_v8, %v8105_v57 }
 0x222   : > { %v6324_v21 = vpop.f32.mrf.mxu0  ;;  %v6380_v6 = vpop.f32.mrf.mxu1 }
 0x223   : > { %v8250_v1 = vadd.f32 %v2853_v29, %v2551_v41  ;;  %v2572_v32 = vadd.f32 %v6324_v21, %v8121_v16 }
 0x224   : > { %v2564_v59 = vpop.f32.mrf.mxu0  ;;  %v2901_v14 = vpop.f32.mrf.mxu1 }
 0x225   : > { %v8253_v34 = vadd.f32 %v6374_v27, %v2572_v32  ;;  %v2565_v42 = vadd.f32 %v2564_v59, %v8123_v7 }
 0x226   : > { %v6327_v39 = vpop.f32.mrf.mxu0  ;;  %v6383_v40 = vpop.f32.mrf.mxu1 }
 0x227   : > { %v8256_v50 = vadd.f32 %v2869_v33, %v2565_v42  ;;  %v2586_v4 = vadd.f32 %v6327_v39, %v8137_v56 }
 0x228   : > { %v2578_v37 = vpop.f32.mrf.mxu0  ;;  %v2917_v57 = vpop.f32.mrf.mxu1 }
 0x229   : > { %v8259_v35 = vadd.f32 %v6377_v53, %v2586_v4  ;;  %v2579_v29 = vadd.f32 %v2578_v37, %v8141_v0 }
 0x22a   : > { %v6330_v30 = vpop.f32.mrf.mxu0  ;;  %v6386_v16 = vpop.f32.mrf.mxu1 }
 0x22b   : > { %v8262_v36 = vadd.f32 %v2885_v48, %v2579_v29  ;;  %v2600_v27 = vadd.f32 %v6330_v30, %v8151_v45 }
 0x22c   : > { %v2592_v47 = vpop.f32.mrf.mxu0  ;;  %v2933_v7 = vpop.f32.mrf.mxu1 }
 0x22d   : > { %v8265_v15 = vadd.f32 %v6380_v6, %v2600_v27  ;;  %v2593_v33 = vadd.f32 %v2592_v47, %v8155_v38 }
 0x22e   : > { %v6333_v2 = vpop.f32.mrf.mxu0  ;;  %v6389_v56 = vpop.f32.mrf.mxu1 }
 0x22f   : > { %v8268_v8 = vadd.f32 %v2901_v14, %v2593_v33  ;;  %v2614_v53 = vadd.f32 %v6333_v2, %v8173_v60 }
 0x230   : > { %v2606_v41 = vpop.f32.mrf.mxu0  ;;  %v2949_v0 = vpop.f32.mrf.mxu1 }
 0x231   : > { %v8271_v21 = vadd.f32 %v6383_v40, %v2614_v53  ;;  %v2607_v48 = vadd.f32 %v2606_v41, %v8177_v44 }
 0x232   : > { %v6336_v32 = vpop.f32.mrf.mxu0  ;;  %v6392_v45 = vpop.f32.mrf.mxu1 }
 0x233   : > { %v8274_v59 = vadd.f32 %v2917_v57, %v2607_v48  ;;  %v2628_v6 = vadd.f32 %v6336_v32, %v8187_v31 }
 0x234   : > { %v2620_v42 = vpop.f32.mrf.mxu0  ;;  %v2965_v38 = vpop.f32.mrf.mxu1 }
 0x235   : > { %v8277_v39 = vadd.f32 %v6386_v16, %v2628_v6  ;;  %v2621_v14 = vadd.f32 %v2620_v42, %v8189_v55 }
 0x236   : > { %v6339_v4 = vpop.f32.mrf.mxu0  ;;  %v6395_v60 = vpop.f32.mrf.mxu1 }
 0x237   : > { %v8280_v37 = vadd.f32 %v2933_v7, %v2621_v14  ;;  %v2642_v40 = vadd.f32 %v6339_v4, %v8191_v17 }
 0x238   : > { %v2634_v29 = vpop.f32.mrf.mxu0  ;;  %v2981_v44 = vpop.f32.mrf.mxu1 }
 0x239   : > { %v8283_v30 = vadd.f32 %v6389_v56, %v2642_v40  ;;  %v2635_v57 = vadd.f32 %v2634_v29, %v8193_v46  ;;  %v478_v40 = vld [vmem:[%s8306_s12 + $0x8] sm:$0xff] }
 0x23a   : > { %v6342_v27 = vpop.f32.mrf.mxu0  ;;  %v6398_v31 = vpop.f32.mrf.mxu1 }
 0x23b   : > { %v8286_v47 = vadd.f32 %v2949_v0, %v2635_v57  ;;  %v2656_v16 = vadd.f32 %v6342_v27, %v8195_v19 }
 0x23c   : > { %v2648_v33 = vpop.f32.mrf.mxu0  ;;  %v2997_v55 = vpop.f32.mrf.mxu1 }
 0x23d   : > { %v8289_v2 = vadd.f32 %v6392_v45, %v2656_v16  ;;  %v2649_v7 = vadd.f32 %v2648_v33, %v8197_v22  ;;  %v2495_v16 = vadd.f32 %v8226_v49, %v8016_v23 }
 0x23e   : > { %v6345_v17 = vpop.f32.mrf.mxu0  ;;  %v6453_v53 = vpop.f32.mrf.mxu1 }
 0x23f   : > { %v8292_v41 = vadd.f32 %v2965_v38, %v2649_v7  ;;  %v2670_v56 = vadd.f32 %v6345_v17, %v8199_v26 }
 0x240   : > { %v2662_v46 = vpop.f32.mrf.mxu0  ;;  %v3337_v48 = vpop.f32.mrf.mxu1 }
 0x241   : > { %v8295_v32 = vadd.f32 %v6395_v60, %v2670_v56  ;;  %v2663_v0 = vadd.f32 %v2662_v46, %v8201_v61  ;;  %v480_v56 = vld [vmem:[%s8306_s12 + $0x18] sm:$0xff] }
 0x242   : > { %v6348_v19 = vpop.f32.mrf.mxu0  ;;  %v6456_v6 = vpop.f32.mrf.mxu1 }
 0x243   : > { %v8298_v42 = vadd.f32 %v2981_v44, %v2663_v0  ;;  %v2684_v45 = vadd.f32 %v6348_v19, %v8203_v25  ;;  %v2790_v19 = vadd.f32 %v8208_v3, %v2495_v16  ;;  %v482_v3 = vld [vmem:[%s8306_s12 + $0x28] sm:$0xff] }
 0x244   : > { %v2676_v14 = vpop.f32.mrf.mxu0  ;;  %v3349_v22 = vpop.f32.mrf.mxu1 }
 0x245   : > { %v8308_v26 = vadd.f32 %v6398_v31, %v2684_v45  ;;  %v2677_v61 = vadd.f32 %v2676_v14, %v8205_v52  ;;  %v477_v31 = vld [vmem:[%s8306_s12] sm:$0xff] }
 0x246   : > { %v6403_v38 = vpop.f32.mrf.mxu0  ;;  %v6459_v4 = vpop.f32.mrf.mxu1 }
 0x247   : > { %v8311_v60 = vadd.f32 %v2997_v55, %v2677_v61  ;;  %v3086_v25 = vadd.f32 %v6403_v38, %v8210_v18  ;;  %v2516_v18 = vadd.f32 %v8230_v43, %v8024_v12 }
 0x248   : > { %v3079_v29 = vpop.f32.mrf.mxu0  ;;  %v3361_v44 = vpop.f32.mrf.mxu1 }
 0x249   : > { %v3344_v57 = vadd.f32 %v6453_v53, %v3086_v25  ;;  %v3080_v27 = vadd.f32 %v3079_v29, %v8215_v63 }
 0x24a   : > { %v6406_v33 = vpop.f32.mrf.mxu0  ;;  %v6462_v52 = vpop.f32.mrf.mxu1 }
 0x24b   : > { %v3528_v7 = vmul.f32 %v3344_v57, %v478_v40  ;;  %v3338_v55 = vadd.f32 %v3337_v48, %v3080_v27  ;;  %v3098_v17 = vadd.f32 %v6406_v33, %v8220_v13  ;;  %v2509_v48 = vadd.f32 %v8232_v10, %v8026_v5  ;;  %v479_v13 = vld [vmem:[%s8306_s12 + $0x10] sm:$0xff] }
 0x24c   : > { %v3091_v46 = vpop.f32.mrf.mxu0  ;;  %v3373_v53 = vpop.f32.mrf.mxu1 }
 0x24d   : > { %v3567_v63 = vsel %vm3559_vm0, %v3528_v7, 0.0  ;;  %v3527_v0 = vmul.f32 %v3338_v55, %v477_v31  ;;  %v3356_v23 = vadd.f32 %v6456_v6, %v3098_v17  ;;  %v3092_v49 = vadd.f32 %v3091_v46, %v8223_v62 }
 0x24e   : > { %v3568_v45 = vrot.slane %v3567_v63, 4  ;;  %v6409_v14 = vpop.f32.mrf.mxu0  ;;  %v8329_v61 = vpop.f32.mrf.mxu1  ;;  %v2814_v6 = vadd.f32 %v8213_v9, %v2516_v18  ;;  %v2806_v31 = vadd.f32 %v8218_v11, %v2509_v48 }
 0x24f   : > { %v3560_v12 = vsel %vm3559_vm0, %v3527_v0, 0.0  ;;  %v3530_v43 = vmul.f32 %v3356_v23, %v480_v56  ;;  %v3350_v38 = vadd.f32 %v3349_v22, %v3092_v49  ;;  %v3110_v25 = vadd.f32 %v6409_v14, %v8228_v51  ;;  %v481_v51 = vld [vmem:[%s8306_s12 + $0x20] sm:$0xff]  ;;  %v484_v49 = vld [vmem:[%s8306_s12 + $0x38] sm:$0xff] }
 0x250   : > { %v3569_v62 = vadd.f32 %v3568_v45, %v3567_v63  ;;  %v3561_v40 = vrot.slane %v3560_v12, 4  ;;  %v3103_v29 = vpop.f32.mrf.mxu0  ;;  %v8335_v57 = vpop.f32.mrf.mxu1 }
 0x251   : > { %v3581_v5 = vsel %vm3559_vm0, %v3530_v43, 0.0  ;;  %v3529_v10 = vmul.f32 %v3350_v38, %v479_v13  ;;  %v3368_v27 = vadd.f32 %v6459_v4, %v3110_v25  ;;  %v3104_v16 = vadd.f32 %v3103_v29, %v2790_v19  ;;  %v483_v25 = vld [vmem:[%s8306_s12 + $0x30] sm:$0xff] }
 0x252   : > { %v3570_v22 = vrot.slane %v3569_v62, 2  ;;  %v3562_v33 = vadd.f32 %v3561_v40, %v3560_v12  ;;  %v3582_v7 = vrot.slane %v3581_v5, 4  ;;  %v6412_v55 = vpop.f32.mrf.mxu0  ;;  %v8340_v9 = vpop.f32.mrf.mxu1 }
 0x253   : > { %v3574_v17 = vsel %vm3559_vm0, %v3529_v10, 0.0  ;;  %v3532_v18 = vmul.f32 %v3368_v27, %v482_v3  ;;  %v3362_v56 = vadd.f32 %v3361_v44, %v3104_v16  ;;  %v3122_v46 = vadd.f32 %v6412_v55, %v2814_v6 }
 0x254   : > { %v3571_v63 = vadd.f32 %v3570_v22, %v3569_v62  ;;  %v3563_v4 = vrot.slane %v3562_v33, 2  ;;  %v3583_v0 = vadd.f32 %v3582_v7, %v3581_v5  ;;  %v3575_v23 = vrot.slane %v3574_v17, 4  ;;  %v3115_v11 = vpop.f32.mrf.mxu0  ;;  %v8344_v19 = vpop.f32.mrf.mxu1 }
 0x255   : > { %v3595_v48 = vsel %vm3559_vm0, %v3532_v18, 0.0  ;;  %v3531_v45 = vmul.f32 %v3362_v56, %v481_v51  ;;  %v3380_v13 = vadd.f32 %v6462_v52, %v3122_v46  ;;  %v3116_v14 = vadd.f32 %v3115_v11, %v2806_v31 }
 0x256   : > { %v3572_v44 = vrot.slane %v3571_v63, 1  ;;  %v3564_v12 = vadd.f32 %v3563_v4, %v3562_v33  ;;  %v3584_v43 = vrot.slane %v3583_v0, 2  ;;  %v3576_v38 = vadd.f32 %v3575_v23, %v3574_v17  ;;  %v6415_v6 = vpop.f32.mrf.mxu0  ;;  %v8352_v62 = vpop.f32.mrf.mxu1  ;;  %v8359_v33 = vld [vmem:[%s465_s13] ss:$0 sm:$0xff] }
 0x257   : > { %v3596_v40 = vrot.slane %v3595_v48, 4  ;;  %v3588_v3 = vsel %vm3559_vm0, %v3531_v45, 0.0  ;;  %v3534_v29 = vmul.f32 %v3380_v13, %v484_v49  ;;  %v3374_v5 = vadd.f32 %v3373_v53, %v3116_v14 }
 0x258   : > { %v8355_v10 = vadd.f32 %v3572_v44, %v3571_v63  ;;  %v3565_v52 = vrot.slane %v3564_v12, 1  ;;  %v3585_v27 = vadd.f32 %v3584_v43, %v3583_v0  ;;  %v3577_v16 = vrot.slane %v3576_v38, 2  ;;  %v3127_v31 = vpop.f32.mrf.mxu0  ;;  %v8357_v22 = vpop.f32.mrf.mxu1 }
 0x259   : > { %v3597_v7 = vadd.f32 %v3596_v40, %v3595_v48  ;;  %v3589_v51 = vrot.slane %v3588_v3, 4  ;;  %v3609_v55 = vsel %vm3559_vm0, %v3534_v29, 0.0  ;;  %v3533_v17 = vmul.f32 %v3374_v5, %v483_v25 }
 0x25a   : > { %v3586_v18 = vrot.slane %v3585_v27, 1  ;;  %v3578_v56 = vadd.f32 %v3577_v16, %v3576_v38  ;;  %v6418_v46 = vpop.f32.mrf.mxu0  ;;  %v3610_v63 = vrot.slane %v3609_v55, 4  ;;  %v8365_v0 = vmul.f32 %v8359_v33, %v8355_v10  ;;  %v8371_v13 = vpop.f32.mrf.mxu1 }
 0x25b   : > { %v3598_v4 = vrot.slane %v3597_v7, 2  ;;  %v3590_v53 = vadd.f32 %v3589_v51, %v3588_v3  ;;  %v3602_v23 = vsel %vm3559_vm0, %v3533_v17, 0.0  ;;  %v8367_v49 = vadd.f32 %v3565_v52, %v3564_v12  ;;  %v487_v51 = vld [vmem:[%s8306_s12 + $0x50] sm:$0xff] }
 0x25c   : > { %v8369_v11 = vadd.f32 %v3586_v18, %v3585_v27  ;;  %v3579_v48 = vrot.slane %v3578_v56, 1  ;;  %v3139_v45 = vpop.f32.mrf.mxu0  ;;  %v3611_v43 = vadd.f32 %v3610_v63, %v3609_v55  ;;  %v3603_v38 = vrot.slane %v3602_v23, 4  ;;  %v488_v63 = vld [vmem:[%s8306_s12 + $0x58] sm:$0xff] }
 0x25d   : > { %v3599_v14 = vadd.f32 %v3598_v4, %v3597_v7  ;;  %v3591_v44 = vrot.slane %v3590_v53, 2  ;;  %v3134_v12 = vadd.f32 %v6415_v6, %v8235_v20  ;;  %v3128_v3 = vadd.f32 %v3127_v31, %v8238_v54  ;;  %v486_v7 = vld [vmem:[%s8306_s12 + $0x48] sm:$0xff]  ;;  %v485_v4 = vld [vmem:[%s8306_s12 + $0x40] sm:$0xff] }
 0x25e   : > { %v8375_v25 = vmul.f32 %v8359_v33, %v8369_v11  ;;  %v8377_v40 = vadd.f32 %v3579_v48, %v3578_v56  ;;  %v6421_v29 = vpop.f32.mrf.mxu0  ;;  %v3612_v27 = vrot.slane %v3611_v43, 2  ;;  %v3604_v16 = vadd.f32 %v3603_v38, %v3602_v23  ;;  %v8385_v56 = vpop.f32.mrf.mxu1 }
 0x25f   : > { %v3600_v5 = vrot.slane %v3599_v14, 1  ;;  %v3592_v52 = vadd.f32 %v3591_v44, %v3590_v53  ;;  %v3392_v55 = vadd.f32 %v8329_v61, %v3134_v12  ;;  %v3146_v17 = vadd.f32 %v6418_v46, %v8241_v24 }
 0x260   : > { %9316 = vst [vmem:[#allocation7_spill] sm:$0xff] %v8377_v40  ;;  %v3151_v18 = vpop.f32.mrf.mxu0  ;;  %v8389_v20 = vmul.f32 %v8359_v33, %v8367_v49  ;;  %v8393_v54 = vmul.f32 %v8359_v33, %v8377_v40  ;;  %v3605_v31 = vrot.slane %v3604_v16, 2  ;;  %v3386_v24 = vadd.f32 %v8335_v57, %v3128_v3 }
 0x261   : > { %v3593_v6 = vrot.slane %v3592_v52, 1  ;;  %v3536_v61 = vmul.f32 %v3392_v55, %v486_v7  ;;  %v3140_v46 = vadd.f32 %v3139_v45, %v8244_v28  ;;  %v8400_v48 = vadd.f32 %v3600_v5, %v3599_v14  ;;  %v8411_v45 = vpop.f32.mrf.mxu1 }
 0x262   : > { %v6424_v23 = vpop.f32.mrf.mxu0  ;;  %v8402_v44 = vadd.f32 %v3612_v27, %v3611_v43  ;;  %v8404_v38 = vadd.f32 %v3605_v31, %v3604_v16  ;;  %v3404_v12 = vadd.f32 %v8340_v9, %v3146_v17  ;;  %v3535_v53 = vmul.f32 %v3386_v24, %v485_v4  ;;  %v490_v27 = vld [vmem:[%s8306_s12 + $0x68] sm:$0xff] }
 0x263   : > { %v3623_v40 = vsel %vm3559_vm0, %v3536_v61, 0.0  ;;  %v3158_v7 = vadd.f32 %v6421_v29, %v8247_v58  ;;  %v3398_v57 = vadd.f32 %v8344_v19, %v3140_v46  ;;  %v8414_v3 = vadd.f32 %v3593_v6, %v3592_v52  ;;  %v489_v46 = vld [vmem:[%s8306_s12 + $0x60] sm:$0xff] }
 0x264   : > { %v3163_v28 = vpop.f32.mrf.mxu0  ;;  %v3624_v43 = vrot.slane %v3623_v40, 4  ;;  %v3538_v5 = vmul.f32 %v3404_v12, %v488_v63  ;;  %v3616_v9 = vsel %vm3559_vm0, %v3535_v53, 0.0  ;;  %v3152_v55 = vadd.f32 %v3151_v18, %v8250_v1  ;;  %v8426_v1 = vpop.f32.mrf.mxu1 }
 0x265   : > { %v3537_v16 = vmul.f32 %v3398_v57, %v487_v51  ;;  %v3416_v58 = vadd.f32 %v8352_v62, %v3158_v7  ;;  %v3607_v19 = vrot.slane %v8404_v38, 1  ;;  %v3617_v31 = vrot.slane %v3616_v9, 4 }
 0x266   : > { %v6427_v29 = vpop.f32.mrf.mxu0  ;;  %v3625_v17 = vadd.f32 %v3624_v43, %v3623_v40  ;;  %v3637_v52 = vsel %vm3559_vm0, %v3538_v5, 0.0  ;;  %v3170_v53 = vadd.f32 %v6424_v23, %v8253_v34  ;;  %v3410_v63 = vadd.f32 %v8357_v22, %v3152_v55  ;;  %v492_v40 = vld [vmem:[%s8306_s12 + $0x78] sm:$0xff]  ;;  %v8437_v55 = vpop.f32.mrf.mxu1 }
 0x267   : > { %v3638_v6 = vrot.slane %v3637_v52, 4  ;;  %v3630_v4 = vsel %vm3559_vm0, %v3537_v16, 0.0  ;;  %v3540_v61 = vmul.f32 %v3416_v58, %v490_v27  ;;  %v3618_v62 = vadd.f32 %v3617_v31, %v3616_v9 }
 0x268   : > { %v8424_v51 = vpop.f32.mrf.mxu0  ;;  %v3626_v18 = vrot.slane %v3625_v17, 2  ;;  %v3631_v24 = vrot.slane %v3630_v4, 4  ;;  %v3164_v57 = vadd.f32 %v3163_v28, %v8256_v50  ;;  %v3428_v43 = vadd.f32 %v8371_v13, %v3170_v53  ;;  %v491_v28 = vld [vmem:[%s8306_s12 + $0x70] sm:$0xff] }
 0x269   : > { %v3639_v12 = vadd.f32 %v3638_v6, %v3637_v52  ;;  %v3651_v7 = vsel %vm3559_vm0, %v3540_v61, 0.0  ;;  %v3619_v5 = vrot.slane %v3618_v62, 2  ;;  %v3539_v58 = vmul.f32 %v3410_v63, %v489_v46 }
 0x26a   : > { %v8434_v34 = vpop.f32.mrf.mxu0  ;;  %v3627_v23 = vadd.f32 %v3626_v18, %v3625_v17  ;;  %v3632_v27 = vadd.f32 %v3631_v24, %v3630_v4  ;;  %v3652_v16 = vrot.slane %v3651_v7, 4  ;;  %v3542_v31 = vmul.f32 %v3428_v43, %v492_v40  ;;  %v3445_v43 = vpop.f32.mrf.mxu1 }
 0x26b   : > { %v3640_v9 = vrot.slane %v3639_v12, 2  ;;  %v3182_v22 = vadd.f32 %v6427_v29, %v8259_v35  ;;  %v3620_v6 = vadd.f32 %v3619_v5, %v3618_v62  ;;  %v3644_v13 = vsel %vm3559_vm0, %v3539_v58, 0.0 }
 0x26c   : > { %v3628_v52 = vrot.slane %v3627_v23, 1  ;;  %v3633_v61 = vrot.slane %v3632_v27, 2  ;;  %v3653_v50 = vadd.f32 %v3652_v16, %v3651_v7  ;;  %v3665_v17 = vsel %vm3559_vm0, %v3542_v31, 0.0  ;;  %v3187_v53 = vpop.f32.mrf.mxu0 }
 0x26d   : > { %v3641_v14 = vadd.f32 %v3640_v9, %v3639_v12  ;;  %v3422_v4 = vadd.f32 %v8385_v56, %v3164_v57  ;;  %v3621_v24 = vrot.slane %v3620_v6, 1  ;;  %v3645_v63 = vrot.slane %v3644_v13, 4 }
 0x26e   : > { %v8443_v18 = vadd.f32 %v3628_v52, %v3627_v23  ;;  %v3634_v46 = vadd.f32 %v3633_v61, %v3632_v27  ;;  %v3654_v35 = vrot.slane %v3653_v50, 2  ;;  %v3666_v40 = vrot.slane %v3665_v17, 4  ;;  %v6433_v9 = vpop.f32.mrf.mxu0 }
 0x26f   : > { %v3642_v29 = vrot.slane %v3641_v14, 1  ;;  %v3541_v62 = vmul.f32 %v3422_v4, %v491_v28  ;;  %v8449_v7 = vadd.f32 %v3621_v24, %v3620_v6  ;;  %v3646_v23 = vadd.f32 %v3645_v63, %v3644_v13  ;;  %v494_v13 = vld [vmem:[%s8306_s12 + $0x88] sm:$0xff] }
 0x270   : > { %v8447_v12 = vmul.f32 %v8359_v33, %v8443_v18  ;;  %v3635_v5 = vrot.slane %v3634_v46, 1  ;;  %v3655_v56 = vadd.f32 %v3654_v35, %v3653_v50  ;;  %v3667_v16 = vadd.f32 %v3666_v40, %v3665_v17  ;;  %v8465_v17 = vpop.f32.mrf.mxu1  ;;  %v493_v40 = vld [vmem:[%s8306_s12 + $0x80] sm:$0xff] }
 0x271   : > { %9317 = vst [vmem:[#allocation8_spill] sm:$0xff] %v8449_v7  ;;  %v8451_v57 = vadd.f32 %v3642_v29, %v3641_v14  ;;  %v3658_v27 = vsel %vm3559_vm0, %v3541_v62, 0.0  ;;  %v8456_v58 = vmul.f32 %v8359_v33, %v8414_v3  ;;  %v3614_v31 = vrot.slane %v8402_v44, 1  ;;  %v8484_v62 = vpop.f32.mrf.mxu0 }
 0x272   : > { %v8460_v52 = vadd.f32 %v3607_v19, %v8404_v38  ;;  %v8462_v6 = vadd.f32 %v3635_v5, %v3634_v46  ;;  %v3656_v61 = vrot.slane %v3655_v56, 1  ;;  %v3647_v14 = vrot.slane %v3646_v23, 2 }
 0x273   : > { %9318 = vst [vmem:[#allocation9_spill] sm:$0xff] %v8451_v57  ;;  %v3668_v50 = vrot.slane %v3667_v16, 2  ;;  %v3659_v28 = vrot.slane %v3658_v27, 4  ;;  %v8470_v24 = vmul.f32 %v8359_v33, %v8451_v57  ;;  %v3176_v38 = vadd.f32 %v8424_v51, %v8262_v36 }
 0x274   : > { %9319 = vst [vmem:[#allocation10_spill] sm:$0xff] %v8462_v6  ;;  %v3440_v19 = vadd.f32 %v8411_v45, %v3182_v22  ;;  %v8477_v46 = vmul.f32 %v8359_v33, %v8449_v7  ;;  %v8481_v35 = vmul.f32 %v8359_v33, %v8462_v6  ;;  %v3648_v29 = vadd.f32 %v3647_v14, %v3646_v23  ;;  %v8495_v14 = vpop.f32.mrf.mxu1 }
 0x275   : > { %v3660_v63 = vadd.f32 %v3659_v28, %v3658_v27  ;;  %v8486_v5 = vadd.f32 %v3668_v50, %v3667_v16  ;;  %v3194_v45 = vadd.f32 %v8434_v34, %v8265_v15  ;;  %v3434_v51 = vadd.f32 %v8426_v1, %v3176_v38  ;;  %v496_v27 = vld [vmem:[%s8306_s12 + $0x98] sm:$0xff] }
 0x276   : > { %v3544_v36 = vmul.f32 %v3440_v19, %v494_v13  ;;  %v8491_v22 = vadd.f32 %v3656_v61, %v3655_v56  ;;  %v3649_v4 = vrot.slane %v3648_v29, 1  ;;  %v3188_v23 = vadd.f32 %v3187_v53, %v8268_v8  ;;  %v495_v61 = vld [vmem:[%s8306_s12 + $0x90] sm:$0xff]  ;;  %v6436_v8 = vpop.f32.mrf.mxu0 }
 0x277   : > { %v3661_v6 = vrot.slane %v3660_v63, 2  ;;  %v3543_v28 = vmul.f32 %v3434_v51, %v493_v40  ;;  %v3452_v15 = vadd.f32 %v8437_v55, %v3194_v45  ;;  %v3206_v51 = vadd.f32 %v6433_v9, %v8271_v21 }
 0x278   : > { %v3679_v50 = vsel %vm3559_vm0, %v3544_v36, 0.0  ;;  %v8501_v34 = vadd.f32 %v3649_v4, %v3648_v29  ;;  %v3446_v13 = vadd.f32 %v3445_v43, %v3188_v23  ;;  %v8507_v36 = vadd.f32 %v3614_v31, %v8402_v44  ;;  %v6486_v4 = vpop.f32.mrf.mxu1  ;;  %v3211_v21 = vpop.f32.mrf.mxu0 }
 0x279   : > { %v3680_v56 = vrot.slane %v3679_v50, 4  ;;  %v3672_v38 = vsel %vm3559_vm0, %v3543_v28, 0.0  ;;  %v3546_v19 = vmul.f32 %v3452_v15, %v496_v27  ;;  %v3662_v40 = vadd.f32 %v3661_v6, %v3660_v63 }
 0x27a   : > { %9320 = vst [vmem:[#allocation11_spill] sm:$0xff] %v8501_v34  ;;  %v3673_v45 = vrot.slane %v3672_v38, 4  ;;  %v3545_v16 = vmul.f32 %v3446_v13, %v495_v61  ;;  %v4053_v43 = vmul.f32 %v8359_v33, %v8400_v48  ;;  %v4054_v23 = vmul.f32 %v8359_v33, %v8460_v52 }
 0x27b   : > { %v3681_v55 = vadd.f32 %v3680_v56, %v3679_v50  ;;  %v3693_v29 = vsel %vm3559_vm0, %v3546_v19, 0.0  ;;  %v8517_v27 = vmul.f32 %v8359_v33, %v8501_v34  ;;  %v4055_v6 = vmul.f32 %v8359_v33, %v8507_v36 }
 0x27c   : > { %v3674_v31 = vadd.f32 %v3673_v45, %v3672_v38  ;;  %v3694_v9 = vrot.slane %v3693_v29, 4  ;;  %v3686_v63 = vsel %vm3559_vm0, %v3545_v16, 0.0  ;;  %v9321_v50 = vrot.slane %v8365_v0, 7  ;;  %v3469_v45 = vpop.f32.mrf.mxu1 }
 0x27d   : > { %v3682_v44 = vrot.slane %v3681_v55, 2  ;;  %v4121_v15 = vrot.slane %v8456_v58, 4  ;;  %v3687_v13 = vrot.slane %v3686_v63, 4  ;;  %v9322_v19 = vrot.slane %v8393_v54, 6 }
 0x27e   : > { %v4114_v28 = vsel %vm4113_vm3, %v9321_v50, %v8389_v20  ;;  %v3675_v61 = vrot.slane %v3674_v31, 2  ;;  %v3695_v1 = vadd.f32 %v3694_v9, %v3693_v29  ;;  %v9323_v53 = vrot.slane %v8375_v25, 5 }
 0x27f   : > { %v3683_v56 = vadd.f32 %v3682_v44, %v3681_v55  ;;  %v4117_v38 = vsel %vm4116_vm4, %v9322_v19, %v4114_v28  ;;  %v4124_v34 = vrot.slane %v4053_v43, 3  ;;  %v4127_v0 = vrot.slane %v4054_v23, 2  ;;  %v6439_v55 = vpop.f32.mrf.mxu0  ;;  %v498_v23 = vld [vmem:[%s8306_s12 + $0xa8] sm:$0xff] }
 0x280   : > { %v4120_v16 = vsel %vm4119_vm5, %v9323_v53, %v4117_v38  ;;  %v3676_v20 = vadd.f32 %v3675_v61, %v3674_v31  ;;  %v3688_v50 = vadd.f32 %v3687_v13, %v3686_v63  ;;  %v3696_v44 = vrot.slane %v3695_v1, 2  ;;  %v6489_v31 = vpop.f32.mrf.mxu1 }
 0x281   : > { %v3684_v7 = vrot.slane %v3683_v56, 1  ;;  %v4123_v58 = vsel %vm4122_vm6, %v4121_v15, %v4120_v16  ;;  %v4130_v57 = vrot.slane %v4055_v6, 1  ;;  %v3200_v29 = vadd.f32 %v8484_v62, %v8274_v59  ;;  %v497_v62 = vld [vmem:[%s8306_s12 + $0xa0] sm:$0xff] }
 0x282   : > { %v4126_v54 = vsel %vm4125_vm7, %v4124_v34, %v4123_v58  ;;  %v3663_v25 = vrot.slane %v3662_v40, 1  ;;  %v3689_v53 = vrot.slane %v3688_v50, 2  ;;  %v3697_v63 = vadd.f32 %v3696_v44, %v3695_v1  ;;  %v3481_v16 = vpop.f32.mrf.mxu1 }
 0x283   : > { %v8537_v9 = vadd.f32 %v3684_v7, %v3683_v56  ;;  %v4129_v43 = vsel %vm4128_vm8, %v4127_v0, %v4126_v54  ;;  %v3464_v15 = vadd.f32 %v8465_v17, %v3206_v51  ;;  %v3218_v34 = vadd.f32 %v6436_v8, %v8277_v39  ;;  %v3223_v56 = vpop.f32.mrf.mxu0  ;;  %v500_v17 = vld [vmem:[%s8306_s12 + $0xb8] sm:$0xff] }
 0x284   : > { %v4132_v28 = vsel %vm4131_vm9, %v4130_v57, %v4129_v43  ;;  %v4139_v6 = vrot.slane %v8517_v27, 4  ;;  %v3677_v61 = vrot.slane %v3676_v20, 1  ;;  %v3690_v59 = vadd.f32 %v3689_v53, %v3688_v50 }
 0x285   : > { %v4179_v7 = vsel %vm3559_vm0, %v4132_v28, 0.0  ;;  %v3698_v13 = vrot.slane %v3697_v63, 1  ;;  %v3548_v19 = vmul.f32 %v3464_v15, %v498_v23  ;;  %v3458_v1 = vadd.f32 %v8495_v14, %v3200_v29  ;;  %v502_v29 = vld [vmem:[%s8306_s12 + $0xc8] sm:$0xff]  ;;  %v6492_v15 = vpop.f32.mrf.mxu1 }
 0x286   : > { %4180 = vadd.xlane.f32.xlu0 %v4179_v7  ;;  %v3212_v57 = vadd.f32 %v3211_v21, %v8280_v37  ;;  %v8550_v51 = vadd.f32 %v3663_v25, %v3662_v40  ;;  %v8554_v39 = vmul.f32 %v8359_v33, %v8537_v9  ;;  %v3691_v8 = vrot.slane %v3690_v59, 1  ;;  %v499_v40 = vld [vmem:[%s8306_s12 + $0xb0] sm:$0xff]  ;;  %v6442_v25 = vpop.f32.mrf.mxu0 }
 0x287   : > { %v3476_v38 = vadd.f32 %v6486_v4, %v3218_v34  ;;  %v8556_v0 = vadd.f32 %v3698_v13, %v3697_v63  ;;  %v3707_v50 = vsel %vm3559_vm0, %v3548_v19, 0.0  ;;  %v3547_v58 = vmul.f32 %v3458_v1, %v497_v62  ;;  %v501_v62 = vld [vmem:[%s8306_s12 + $0xc0] sm:$0xff] }
 0x288   : > { %v3230_v14 = vadd.f32 %v6439_v55, %v8283_v30  ;;  %v8560_v44 = vadd.f32 %v3691_v8, %v3690_v59  ;;  %v3708_v37 = vrot.slane %v3707_v50, 4  ;;  %v3470_v54 = vadd.f32 %v3469_v45, %v3212_v57 }
 0x289   : > { %v3550_v21 = vmul.f32 %v3476_v38, %v500_v17  ;;  %v8564_v53 = vadd.f32 %v3677_v61, %v3676_v20  ;;  %v3700_v4 = vsel %vm3559_vm0, %v3547_v58, 0.0  ;;  %v3224_v43 = vadd.f32 %v3223_v56, %v8286_v47  ;;  %v3235_v56 = vpop.f32.mrf.mxu0  ;;  %v504_v58 = vld [vmem:[%s8306_s12 + $0xd8] sm:$0xff] }
 0x28a   : > { %v3488_v23 = vadd.f32 %v6489_v31, %v3230_v14  ;;  %v4147_v63 = vrot.slane %v8554_v39, 7  ;;  %v3709_v28 = vadd.f32 %v3708_v37, %v3707_v50  ;;  %v3701_v30 = vrot.slane %v3700_v4, 4  ;;  %v3493_v14 = vpop.f32.mrf.mxu1 }
 0x28b   : > { %v3721_v55 = vsel %vm3559_vm0, %v3550_v21, 0.0  ;;  %v8572_v45 = vmul.f32 %v8359_v33, %v8556_v0  ;;  %v3549_v20 = vmul.f32 %v3470_v54, %v499_v40  ;;  %v8576_v59 = vmul.f32 %v8359_v33, %v8560_v44 }
 0x28c   : > { %v3722_v34 = vrot.slane %v3721_v55, 4  ;;  %v3552_v61 = vmul.f32 %v3488_v23, %v502_v29  ;;  %v3710_v47 = vrot.slane %v3709_v28, 2  ;;  %v3702_v31 = vadd.f32 %v3701_v30, %v3700_v4 }
 0x28d   : > { %v3242_v7 = vadd.f32 %v6442_v25, %v8289_v2  ;;  %v3714_v19 = vsel %vm3559_vm0, %v3549_v20, 0.0  ;;  %v3482_v57 = vadd.f32 %v3481_v16, %v3224_v43  ;;  %v3236_v40 = vadd.f32 %v3235_v56, %v8292_v41  ;;  %v6445_v16 = vpop.f32.mrf.mxu0 }
 0x28e   : > { %v3723_v13 = vadd.f32 %v3722_v34, %v3721_v55  ;;  %v3735_v1 = vsel %vm3559_vm0, %v3552_v61, 0.0  ;;  %v3711_v17 = vadd.f32 %v3710_v47, %v3709_v28  ;;  %v3703_v8 = vrot.slane %v3702_v31, 2  ;;  %v6495_v61 = vpop.f32.mrf.mxu1 }
 0x28f   : > { %v3715_v38 = vrot.slane %v3714_v19, 4  ;;  %v3736_v50 = vrot.slane %v3735_v1, 4  ;;  %v3551_v21 = vmul.f32 %v3482_v57, %v501_v62  ;;  %v3500_v2 = vadd.f32 %v6492_v15, %v3242_v7  ;;  %v503_v15 = vld [vmem:[%s8306_s12 + $0xd0] sm:$0xff] }
 0x290   : > { %v3724_v37 = vrot.slane %v3723_v13, 2  ;;  %v8586_v54 = vmul.f32 %v8359_v33, %v8564_v53  ;;  %v3704_v29 = vadd.f32 %v3703_v8, %v3702_v31  ;;  %v4151_v43 = vrot.slane %v8572_v45, 5  ;;  %v3247_v8 = vpop.f32.mrf.mxu0 }
 0x291   : > { %v3716_v25 = vadd.f32 %v3715_v38, %v3714_v19  ;;  %v3737_v4 = vadd.f32 %v3736_v50, %v3735_v1  ;;  %v3712_v23 = vrot.slane %v3711_v17, 1  ;;  %v3728_v28 = vsel %vm3559_vm0, %v3551_v21, 0.0 }
 0x292   : > { %v3554_v30 = vmul.f32 %v3500_v2, %v504_v58  ;;  %v3705_v55 = vrot.slane %v3704_v29, 1  ;;  %v8590_v34 = vadd.f32 %v3724_v37, %v3723_v13  ;;  %v4149_v47 = vrot.slane %v8576_v59, 6 }
 0x293   : > { %v3717_v20 = vrot.slane %v3716_v25, 2  ;;  %v3738_v41 = vrot.slane %v3737_v4, 2  ;;  %v3729_v7 = vrot.slane %v3728_v28, 4  ;;  %v3494_v62 = vadd.f32 %v3493_v14, %v3236_v40 }
 0x294   : > { %v3749_v31 = vsel %vm3559_vm0, %v3554_v30, 0.0  ;;  %v3254_v57 = vadd.f32 %v6445_v16, %v8295_v32  ;;  %v8596_v38 = vadd.f32 %v3705_v55, %v3704_v29  ;;  %v9324_v58 = vrot.slane %v8486_v5, 1 }
 0x295   : > { %v3718_v56 = vadd.f32 %v3717_v20, %v3716_v25  ;;  %v3739_v19 = vadd.f32 %v3738_v41, %v3737_v4  ;;  %v3750_v1 = vrot.slane %v3749_v31, 4  ;;  %v3730_v13 = vadd.f32 %v3729_v7, %v3728_v28  ;;  %v3505_v25 = vpop.f32.mrf.mxu1 }
 0x296   : > { %v3553_v50 = vmul.f32 %v3494_v62, %v503_v15  ;;  %v8601_v37 = vadd.f32 %v9324_v58, %v8486_v5  ;;  %v8603_v21 = vadd.f32 %v3712_v23, %v3711_v17  ;;  %v3726_v2 = vrot.slane %v8590_v34, 1  ;;  %v6448_v23 = vpop.f32.mrf.mxu0 }
 0x297   : > { %v3740_v14 = vrot.slane %v3739_v19, 1  ;;  %v3751_v40 = vadd.f32 %v3750_v1, %v3749_v31  ;;  %v3731_v4 = vrot.slane %v3730_v13, 2  ;;  %v4061_v29 = vmul.f32 %v8359_v33, %v8491_v22  ;;  %v6498_v58 = vpop.f32.mrf.mxu1 }
 0x298   : > { %v3742_v32 = vsel %vm3559_vm0, %v3553_v50, 0.0  ;;  %v4062_v16 = vmul.f32 %v8359_v33, %v8550_v51  ;;  %v3719_v28 = vrot.slane %v3718_v56, 1  ;;  %v8615_v55 = vmul.f32 %v8359_v33, %v8596_v38 }
 0x299   : > { %v8611_v30 = vadd.f32 %v3740_v14, %v3739_v19  ;;  %v3752_v5 = vrot.slane %v3751_v40, 2  ;;  %v3743_v17 = vrot.slane %v3742_v32, 4  ;;  %v3732_v20 = vadd.f32 %v3731_v4, %v3730_v13 }
 0x29a   : > { %v4063_v41 = vmul.f32 %v8359_v33, %v8601_v37  ;;  %v9325_v15 = vrot.slane %v8447_v12, 7  ;;  %v9326_v19 = vrot.slane %v8481_v35, 6  ;;  %v4143_v50 = vrot.slane %v4062_v16, 2 }
 0x29b   : > { %v3753_v31 = vadd.f32 %v3752_v5, %v3751_v40  ;;  %v3744_v62 = vadd.f32 %v3743_v17, %v3742_v32  ;;  %v8628_v13 = vmul.f32 %v8359_v33, %v8611_v30  ;;  %v9327_v14 = vrot.slane %v8470_v24, 5  ;;  %v506_v5 = vld [vmem:[%s8306_s12 + $0xe8] sm:$0xff]  ;;  %v3259_v17 = vpop.f32.mrf.mxu0 }
 0x29c   : > { %v4134_v7 = vsel %vm4113_vm3, %v9325_v15, %v8477_v46  ;;  %v4141_v12 = vrot.slane %v4061_v29, 3  ;;  %v3248_v46 = vadd.f32 %v3247_v8, %v8298_v42  ;;  %v8634_v40 = vadd.f32 %v3719_v28, %v3718_v56  ;;  %v505_v29 = vld [vmem:[%s8306_s12 + $0xe0] sm:$0xff] }
 0x29d   : > { %v4136_v1 = vsel %vm4116_vm4, %v9326_v19, %v4134_v7  ;;  %v3733_v32 = vrot.slane %v3732_v20, 1  ;;  %v3745_v35 = vrot.slane %v3744_v62, 2  ;;  %v4145_v7 = vrot.slane %v4063_v41, 1 }
 0x29e   : > { %v4138_v4 = vsel %vm4119_vm5, %v9327_v14, %v4136_v1  ;;  %v3512_v19 = vadd.f32 %v6495_v61, %v3254_v57  ;;  %v3266_v24 = vadd.f32 %v6448_v23, %v8308_v26  ;;  %v3754_v42 = vrot.slane %v3753_v31, 1  ;;  %v3517_v1 = vpop.f32.mrf.mxu1  ;;  %v508_v23 = vld [vmem:[%s8306_s12 + $0xf8] sm:$0xff] }
 0x29f   : > { %v4140_v16 = vsel %vm4122_vm6, %v4139_v6, %v4138_v4  ;;  %v3746_v56 = vadd.f32 %v3745_v35, %v3744_v62  ;;  %v3506_v28 = vadd.f32 %v3505_v25, %v3248_v46  ;;  %v4161_v27 = vrot.slane %v8628_v13, 7 }
 0x2a0   : > { %v4142_v15 = vsel %vm4125_vm7, %v4141_v12, %v4140_v16  ;;  %v3556_v14 = vmul.f32 %v3512_v19, %v506_v5  ;;  %v3260_v4 = vadd.f32 %v3259_v17, %v8311_v60  ;;  %v8647_v41 = vadd.f32 %v3733_v32, %v3732_v20  ;;  %v507_v12 = vld [vmem:[%s8306_s12 + $0xf0] sm:$0xff] }
 0x2a1   : > { %v4144_v8 = vsel %vm4128_vm8, %v4143_v50, %v4142_v15  ;;  %v3747_v61 = vrot.slane %v3746_v56, 1  ;;  %v3555_v57 = vmul.f32 %v3506_v28, %v505_v29  ;;  %v3524_v25 = vadd.f32 %v6498_v58, %v3266_v24 }
 0x2a2   : > { %v4146_v6 = vsel %vm4131_vm9, %v4145_v7, %v4144_v8  ;;  %v3763_v62 = vsel %vm3559_vm0, %v3556_v14, 0.0  ;;  %v3518_v50 = vadd.f32 %v3517_v1, %v3260_v4  ;;  %v8654_v46 = vadd.f32 %v3726_v2, %v8590_v34 }
 0x2a3   : > { %v4182_v26 = vsel %vm3559_vm0, %v4146_v6, 0.0  ;;  %v8656_v35 = vadd.f32 %v3754_v42, %v3753_v31  ;;  %v8658_v16 = vadd.f32 %v3747_v61, %v3746_v56  ;;  %v3764_v60 = vrot.slane %v3763_v62, 4 }
 0x2a4   : > { %4183 = vadd.xlane.f32.xlu0 %v4182_v26  ;;  %v3756_v20 = vsel %vm3559_vm0, %v3555_v57, 0.0  ;;  %v3558_v5 = vmul.f32 %v3524_v25, %v508_v23  ;;  %v3557_v17 = vmul.f32 %v3518_v50, %v507_v12  ;;  %v4069_v15 = vmul.f32 %v8359_v33, %v8603_v21 }
 0x2a5   : > { %v3757_v32 = vrot.slane %v3756_v20, 4  ;;  %v4072_v58 = vmul.f32 %v8359_v33, %v8647_v41  ;;  %v4074_v34 = vmul.f32 %v8359_v33, %v8658_v16  ;;  %v3765_v2 = vadd.f32 %v3764_v60, %v3763_v62 }
 0x2a6   : > { %v4070_v31 = vmul.f32 %v8359_v33, %v8634_v40  ;;  %v3777_v19 = vsel %vm3559_vm0, %v3558_v5, 0.0  ;;  %v3770_v24 = vsel %vm3559_vm0, %v3557_v17, 0.0  ;;  %v4071_v29 = vmul.f32 %v8359_v33, %v8654_v46 }
 0x2a7   : > { %v3758_v7 = vadd.f32 %v3757_v32, %v3756_v20  ;;  %v3766_v42 = vrot.slane %v3765_v2, 2  ;;  %v3778_v56 = vrot.slane %v3777_v19, 4  ;;  %v3771_v8 = vrot.slane %v3770_v24, 4 }
 0x2a8   : > { %v4148_v28 = vsel %vm4113_vm3, %v4147_v63, %v8586_v54  ;;  %v4153_v14 = vrot.slane %v8615_v55, 4  ;;  %v4155_v4 = vrot.slane %v4069_v15, 3  ;;  %v4157_v62 = vrot.slane %v4070_v31, 2 }
 0x2a9   : > { %v3759_v1 = vrot.slane %v3758_v7, 2  ;;  %v4150_v6 = vsel %vm4116_vm4, %v4149_v47, %v4148_v28  ;;  %v3767_v61 = vadd.f32 %v3766_v42, %v3765_v2  ;;  %v3779_v26 = vadd.f32 %v3778_v56, %v3777_v19 }
 0x2aa   : > { %v3772_v57 = vadd.f32 %v3771_v8, %v3770_v24  ;;  %v4152_v23 = vsel %vm4119_vm5, %v4151_v43, %v4150_v6  ;;  %v4159_v63 = vrot.slane %v4071_v29, 1  ;;  %v4075_v55 = vmul.f32 %v8359_v33, %v8656_v35 }
 0x2ab   : > { %v3760_v12 = vadd.f32 %v3759_v1, %v3758_v7  ;;  %v4154_v39 = vsel %vm4122_vm6, %v4153_v14, %v4152_v23  ;;  %v3768_v54 = vrot.slane %v3767_v61, 1  ;;  %v3780_v25 = vrot.slane %v3779_v26, 2  ;;  %v6888_v23 = vld [vmem:[%s7108_s24] sm:$0xff] }
 0x2ac   : > { %v3773_v59 = vrot.slane %v3772_v57, 2  ;;  %v4156_v47 = vsel %vm4125_vm7, %v4155_v4, %v4154_v39  ;;  %v4163_v50 = vrot.slane %v4074_v34, 6  ;;  %v4162_v34 = vsel %vm4113_vm3, %v4161_v27, %v4072_v58  ;;  %v6889_v39 = vld [vmem:[%s7108_s24 + $0x8] sm:$0xff] }
 0x2ad   : > { %v3761_v60 = vrot.slane %v3760_v12, 1  ;;  %v4158_v20 = vsel %vm4128_vm8, %v4157_v62, %v4156_v47  ;;  %v8689_v45 = vadd.f32 %v3768_v54, %v3767_v61  ;;  %v3781_v43 = vadd.f32 %v3780_v25, %v3779_v26  ;;  %v6891_v25 = vld [vmem:[%s7108_s24 + $0x18] sm:$0xff]  ;;  %v6892_v47 = vld [vmem:[%s7108_s24 + $0x20] sm:$0xff] }
 0x2ae   : > { %v3774_v32 = vadd.f32 %v3773_v59, %v3772_v57  ;;  %v4160_v5 = vsel %vm4131_vm9, %v4159_v63, %v4158_v20  ;;  %v4164_v24 = vsel %vm4116_vm4, %v4163_v50, %v4162_v34  ;;  %v4165_v29 = vrot.slane %v4075_v55, 5  ;;  %v6890_v63 = vld [vmem:[%s7108_s24 + $0x10] sm:$0xff]  ;;  %v6893_v50 = vld [vmem:[%s7108_s24 + $0x28] sm:$0xff]  ;;  %v6894_v20 = vld [vmem:[%s7108_s24 + $0x38] sm:$0xff] }
 0x2af   : > { %v8692_v17 = vadd.f32 %v3761_v60, %v3760_v12  ;;  %v4185_v15 = vsel %vm3559_vm0, %v4160_v5, 0.0  ;;  %v3782_v2 = vrot.slane %v3781_v43, 1  ;;  %v4077_v19 = vmul.f32 %v8359_v33, %v8689_v45 }
 0x2b0   : > { %v3775_v31 = vrot.slane %v3774_v32, 1  ;;  %4186 = vadd.xlane.f32.xlu1 %v4185_v15  ;;  %v4166_v27 = vsel %vm4119_vm5, %v4165_v29, %v4164_v24  ;;  %v3785_v12 = vsel %vm3784_vm10, %v6888_v23, 0.0  ;;  %v3792_v62 = vsel %vm3784_vm10, %v6889_v39, 0.0 }
 0x2b1   : > { %9328 = vst [vmem:[#allocation12_spill] sm:$0xff] %v8692_v17  ;;  %v4076_v7 = vmul.f32 %v8359_v33, %v8692_v17  ;;  %v8705_v56 = vadd.f32 %v3782_v2, %v3781_v43  ;;  %v4169_v1 = vrot.slane %v4077_v19, 3  ;;  %v3799_v54 = vsel %vm3784_vm10, %v6890_v63, 0.0 }
 0x2b2   : > { %v8703_v42 = vadd.f32 %v3775_v31, %v3774_v32  ;;  %v3806_v59 = vsel %vm3784_vm10, %v6891_v25, 0.0  ;;  %v3813_v55 = vsel %vm3784_vm10, %v6892_v47, 0.0  ;;  %v3820_v60 = vsel %vm3784_vm10, %v6893_v50, 0.0 }
 0x2b3   : > { %v4167_v8 = vrot.slane %v4076_v7, 4  ;;  %v4079_v13 = vmul.f32 %v8359_v33, %v8705_v56  ;;  %v3834_v43 = vsel %vm3784_vm10, %v6894_v20, 0.0  ;;  %v3786_v32 = vrot.slane %v3785_v12, 4 }
 0x2b4   : > { %9329 = vst [vmem:[#allocation13_spill] sm:$0xff] %v8703_v42  ;;  %v4078_v28 = vmul.f32 %v8359_v33, %v8703_v42  ;;  %v6961_v33 = vmov 4   ;;  %v3793_v5 = vrot.slane %v3792_v62, 4  ;;  %v3800_v15 = vrot.slane %v3799_v54, 4 }
 0x2b5   : > { %v4168_v58 = vsel %vm4122_vm6, %v4167_v8, %v4166_v27  ;;  %v4173_v4 = vrot.slane %v4079_v13, 1  ;;  %6626 = vset.pattern.permute.xlu0 %v6961_v33  ;;  %6627 = vset.pattern.permute.xlu1 %v6961_v33  ;;  %v3807_v2 = vrot.slane %v3806_v59, 4  ;;  %v3814_v31 = vrot.slane %v3813_v55, 4  ;;  %v6895_v27 = vld [vmem:[%s7108_s24 + $0x30] sm:$0xff] }
 0x2b6   : > { %v4171_v6 = vrot.slane %v4078_v28, 2  ;;  %v4170_v14 = vsel %vm4125_vm7, %v4169_v1, %v4168_v58  ;;  %v3821_v34 = vrot.slane %v3820_v60, 4  ;;  %v3835_v7 = vrot.slane %v3834_v43, 4 }
 0x2b7   : > { %v3787_v19 = vadd.f32 %v3786_v32, %v3785_v12  ;;  %v3794_v24 = vadd.f32 %v3793_v5, %v3792_v62  ;;  %v3801_v29 = vadd.f32 %v3800_v15, %v3799_v54  ;;  %v3808_v8 = vadd.f32 %v3807_v2, %v3806_v59 }
 0x2b8   : > { %v4172_v61 = vsel %vm4128_vm8, %v4171_v6, %v4170_v14  ;;  %v3815_v28 = vadd.f32 %v3814_v31, %v3813_v55  ;;  %v3822_v13 = vadd.f32 %v3821_v34, %v3820_v60  ;;  %v3827_v58 = vsel %vm3784_vm10, %v6895_v27, 0.0 }
 0x2b9   : > { %v4174_v26 = vsel %vm4131_vm9, %v4173_v4, %v4172_v61  ;;  %v3836_v1 = vadd.f32 %v3835_v7, %v3834_v43  ;;  %v3788_v6 = vrot.slane %v3787_v19, 2  ;;  %v3795_v14 = vrot.slane %v3794_v24, 2 }
 0x2ba   : > { %v4188_v57 = vsel %vm3559_vm0, %v4174_v26, 0.0  ;;  %v3802_v4 = vrot.slane %v3801_v29, 2  ;;  %v3809_v61 = vrot.slane %v3808_v8, 2  ;;  %v3816_v26 = vrot.slane %v3815_v28, 2 }
 0x2bb   : > { %4189 = vadd.xlane.f32.xlu1 %v4188_v57  ;;  %v3828_v57 = vrot.slane %v3827_v58, 4  ;;  %v3823_v33 = vrot.slane %v3822_v13, 2  ;;  %v3837_v23 = vrot.slane %v3836_v1, 2  ;;  %v3789_v39 = vadd.f32 %v3788_v6, %v3787_v19 }
 0x2bc   : > { %v3796_v63 = vadd.f32 %v3795_v14, %v3794_v24  ;;  %v3803_v12 = vadd.f32 %v3802_v4, %v3801_v29  ;;  %v3810_v62 = vadd.f32 %v3809_v61, %v3808_v8  ;;  %v3817_v54 = vadd.f32 %v3816_v26, %v3815_v28  ;;  %v6897_v61 = vld [vmem:[%s7108_s24 + $0x58] sm:$0xff] }
 0x2bd   : > { %v3829_v25 = vadd.f32 %v3828_v57, %v3827_v58  ;;  %v3824_v59 = vadd.f32 %v3823_v33, %v3822_v13  ;;  %v3838_v47 = vadd.f32 %v3837_v23, %v3836_v1  ;;  %v3790_v55 = vrot.slane %v3789_v39, 1  ;;  %v6896_v58 = vld [vmem:[%s7108_s24 + $0x48] sm:$0xff] }
 0x2be   : > { %v3797_v50 = vrot.slane %v3796_v63, 1  ;;  %v3804_v60 = vrot.slane %v3803_v12, 1  ;;  %v3811_v20 = vrot.slane %v3810_v62, 1  ;;  %v3818_v43 = vrot.slane %v3817_v54, 1 }
 0x2bf   : > { %v3830_v32 = vrot.slane %v3829_v25, 2  ;;  %v3825_v5 = vrot.slane %v3824_v59, 1  ;;  %v3839_v15 = vrot.slane %v3838_v47, 1  ;;  %v3791_v2 = vadd.f32 %v3790_v55, %v3789_v39  ;;  %v6898_v39 = vld [vmem:[%s7108_s24 + $0x40] sm:$0xff] }
 0x2c0   : > { %v3798_v31 = vadd.f32 %v3797_v50, %v3796_v63  ;;  %v3805_v34 = vadd.f32 %v3804_v60, %v3803_v12  ;;  %v3812_v7 = vadd.f32 %v3811_v20, %v3810_v62  ;;  %v3819_v19 = vadd.f32 %v3818_v43, %v3817_v54  ;;  %v6899_v12 = vld [vmem:[%s7108_s24 + $0x68] sm:$0xff] }
 0x2c1   : > { %v3831_v24 = vadd.f32 %v3830_v32, %v3829_v25  ;;  %v3826_v29 = vadd.f32 %v3825_v5, %v3824_v59  ;;  %v3840_v8 = vadd.f32 %v3839_v15, %v3838_v47  ;;  %v4010_v28 = vmul.f32 0.125, %v3791_v2 }
 0x2c2   : > { %v4011_v13 = vmul.f32 0.125, %v3798_v31  ;;  %v4012_v27 = vmul.f32 0.125, %v3805_v34  ;;  %v3848_v1 = vsel %vm3784_vm10, %v6896_v58, 0.0  ;;  %v4013_v14 = vmul.f32 0.125, %v3812_v7  ;;  %v6900_v7 = vld [vmem:[%s7108_s24 + $0x78] sm:$0xff] }
 0x2c3   : > { %v3832_v6 = vrot.slane %v3831_v24, 1  ;;  %v4014_v4 = vmul.f32 0.125, %v3819_v19  ;;  %v3862_v26 = vsel %vm3784_vm10, %v6897_v61, 0.0  ;;  %v4015_v57 = vmul.f32 0.125, %v3826_v29 }
 0x2c4   : > { %v4017_v33 = vmul.f32 0.125, %v3840_v8  ;;  %v3841_v63 = vsel %vm3784_vm10, %v6898_v39, 0.0  ;;  %v3876_v62 = vsel %vm3784_vm10, %v6899_v12, 0.0  ;;  %v3849_v47 = vrot.slane %v3848_v1, 4  ;;  %v6901_v12 = vld [vmem:[%s7108_s24 + $0x50] sm:$0xff] }
 0x2c5   : > { %v3863_v20 = vrot.slane %v3862_v26, 4  ;;  %v3877_v15 = vrot.slane %v3876_v62, 4  ;;  %v3890_v19 = vsel %vm3784_vm10, %v6900_v7, 0.0  ;;  %v3833_v29 = vadd.f32 %v3832_v6, %v3831_v24 }
 0x2c6   : > { %v3842_v61 = vrot.slane %v3841_v63, 4 }
 0x2c8   : > { %v3843_v6 = vadd.f32 %v3842_v61, %v3841_v63 }
 0x30f   : > { %v4181_v23 = vpop.xlane.xlu0 %4180 }
 0x310   : > { %v4195_v54 = vrot.slane %v4181_v23, 1  ;;  %v4196_v25 = vrot.slane %v4181_v23, 2  ;;  %v4197_v59 = vrot.slane %v4181_v23, 3  ;;  %v4198_v55 = vrot.slane %v4181_v23, 4 }
 0x311   : > { %v4199_v50 = vrot.slane %v4181_v23, 5  ;;  %v4255_v60 = vadd.f32 %v4181_v23, %v4010_v28  ;;  %v4201_v2 = vrot.slane %v4181_v23, 7  ;;  %v3850_v28 = vadd.f32 %v3849_v47, %v3848_v1 }
 0x312   : > { %v4256_v43 = vadd.f32 %v4195_v54, %v4011_v13  ;;  %v4257_v32 = vadd.f32 %v4196_v25, %v4012_v27  ;;  %v4258_v5 = vadd.f32 %v4197_v59, %v4013_v14  ;;  %v4259_v39 = vadd.f32 %v4198_v55, %v4014_v4 }
 0x313   : > { %v4260_v31 = vadd.f32 %v4199_v50, %v4015_v57  ;;  %v5915_v34 = vmul.f32 -1.442695, %v4255_v60  ;;  %v3855_v13 = vsel %vm3784_vm10, %v6901_v12, 0.0  ;;  %v3864_v14 = vadd.f32 %v3863_v20, %v3862_v26  ;;  %v6902_v60 = vld [vmem:[%s7108_s24 + $0x60] sm:$0xff] }
 0x314   : > { %v5916_v8 = vmul.f32 -1.442695, %v4256_v43  ;;  %v5917_v58 = vmul.f32 -1.442695, %v4257_v32  ;;  %v5918_v27 = vmul.f32 -1.442695, %v4258_v5  ;;  %v4262_v57 = vadd.f32 %v4201_v2, %v4017_v33 }
 0x315   : > { %6760 = vpow2.f32 %v5915_v34  ;;  %v3891_v54 = vrot.slane %v3890_v19, 4  ;;  %v5920_v25 = vmul.f32 -1.442695, %v4260_v31  ;;  %v3878_v59 = vadd.f32 %v3877_v15, %v3876_v62 }
 0x316   : > { %6762 = vpow2.f32 %v5916_v8  ;;  %v4016_v50 = vmul.f32 0.125, %v3833_v29  ;;  %v4200_v24 = vrot.slane %v4181_v23, 6  ;;  %v3869_v4 = vsel %vm3784_vm10, %v6902_v60, 0.0  ;;  %v6903_v23 = vld [vmem:[%s7108_s24 + $0x70] sm:$0xff] }
 0x317   : > { %6764 = vpow2.f32 %v5917_v58  ;;  %v5919_v55 = vmul.f32 -1.442695, %v4259_v39  ;;  %v3851_v1 = vrot.slane %v3850_v28, 2  ;;  %v3856_v47 = vrot.slane %v3855_v13, 4 }
 0x318   : > { %v3865_v43 = vrot.slane %v3864_v14, 2  ;;  %v3892_v32 = vadd.f32 %v3891_v54, %v3890_v19  ;;  %6766 = vpow2.f32 %v5918_v27  ;;  %v5922_v5 = vmul.f32 -1.442695, %v4262_v57  ;;  %v6904_v54 = vld [vmem:[%s7108_s24 + $0x88] sm:$0xff] }
 0x319   : > { %v3870_v26 = vrot.slane %v3869_v4, 4  ;;  %v3879_v20 = vrot.slane %v3878_v59, 2  ;;  %6768 = vpow2.f32 %v5920_v25  ;;  %v4261_v33 = vadd.f32 %v4200_v24, %v4016_v50 }
 0x31a   : > { %v3844_v2 = vrot.slane %v3843_v6, 2  ;;  %6770 = vpow2.f32 %v5919_v55  ;;  %v3852_v62 = vadd.f32 %v3851_v1, %v3850_v28  ;;  %v3883_v63 = vsel %vm3784_vm10, %v6903_v23, 0.0 }
 0x31b   : > { %v3866_v15 = vadd.f32 %v3865_v43, %v3864_v14  ;;  %v3893_v31 = vrot.slane %v3892_v32, 2  ;;  %v3857_v34 = vadd.f32 %v3856_v47, %v3855_v13  ;;  %v3871_v7 = vadd.f32 %v3870_v26, %v3869_v4 }
 0x31c   : > { %v3880_v29 = vadd.f32 %v3879_v20, %v3878_v59  ;;  %6772 = vpow2.f32 %v5922_v5  ;;  %v5921_v19 = vmul.f32 -1.442695, %v4261_v33  ;;  %v3845_v8 = vadd.f32 %v3844_v2, %v3843_v6 }
 0x31d   : > { %v3884_v58 = vrot.slane %v3883_v63, 4  ;;  %v3853_v61 = vrot.slane %v3852_v62, 1  ;;  %v3867_v12 = vrot.slane %v3866_v15, 1  ;;  %v3894_v27 = vadd.f32 %v3893_v31, %v3892_v32 }
 0x31e   : > { %v3904_v28 = vsel %vm3784_vm10, %v6904_v54, 0.0  ;;  %v3858_v50 = vrot.slane %v3857_v34, 2  ;;  %v3872_v24 = vrot.slane %v3871_v7, 2  ;;  %v3881_v14 = vrot.slane %v3880_v29, 1 }
 0x31f   : > { %6774 = vpow2.f32 %v5921_v19  ;;  %v3846_v59 = vrot.slane %v3845_v8, 1  ;;  %v3885_v4 = vadd.f32 %v3884_v58, %v3883_v63  ;;  %v3854_v6 = vadd.f32 %v3853_v61, %v3852_v62  ;;  %v6905_v61 = vld [vmem:[%s7108_s24 + $0x98] sm:$0xff] }
 0x320   : > { %v3905_v1 = vrot.slane %v3904_v28, 4  ;;  %v3868_v47 = vadd.f32 %v3867_v12, %v3866_v15  ;;  %v3895_v43 = vrot.slane %v3894_v27, 1  ;;  %v3859_v5 = vadd.f32 %v3858_v50, %v3857_v34  ;;  %v6906_v50 = vld [vmem:[%s7108_s24 + $0xa8] sm:$0xff] }
 0x321   : > { %v3873_v26 = vadd.f32 %v3872_v24, %v3871_v7  ;;  %v3882_v20 = vadd.f32 %v3881_v14, %v3880_v29  ;;  %v3886_v2 = vrot.slane %v3885_v4, 2  ;;  %v3847_v31 = vadd.f32 %v3846_v59, %v3845_v8 }
 0x322   : > { %v6761_v39 = vpop.eup %6760  ;;  %v4019_v19 = vmul.f32 0.125, %v3854_v6  ;;  %v3896_v58 = vadd.f32 %v3895_v43, %v3894_v27  ;;  %v4021_v62 = vmul.f32 0.125, %v3868_v47  ;;  %v3918_v15 = vsel %vm3784_vm10, %v6905_v61, 0.0  ;;  %v6907_v61 = vld [vmem:[%s7108_s24 + $0x80] sm:$0xff] }
 0x323   : > { %v6763_v57 = vpop.eup %6762  ;;  %v4383_v25 = vadd.f32 1.0, %v6761_v39  ;;  %v3906_v39 = vadd.f32 %v3905_v1, %v3904_v28  ;;  %v3860_v12 = vrot.slane %v3859_v5, 1  ;;  %v3874_v54 = vrot.slane %v3873_v26, 1 }
 0x324   : > { %v6765_v60 = vpop.eup %6764  ;;  %v4384_v13 = vadd.f32 1.0, %v6763_v57  ;;  %v4023_v34 = vmul.f32 0.125, %v3882_v20  ;;  %v3932_v27 = vsel %vm3784_vm10, %v6906_v50, 0.0  ;;  %v4025_v59 = vmul.f32 0.125, %v3896_v58  ;;  %v6908_v58 = vld [vmem:[%s7108_s24 + $0xb8] sm:$0xff] }
 0x325   : > { %v4385_v55 = vadd.f32 1.0, %v6765_v60  ;;  %6776 = vrcp.f32 %v4383_v25  ;;  %v6767_v32 = vpop.eup %6766  ;;  %v3887_v25 = vadd.f32 %v3886_v2, %v3885_v4  ;;  %v3907_v60 = vrot.slane %v3906_v39, 2 }
 0x326   : > { %6778 = vrcp.f32 %v4384_v13  ;;  %v6769_v33 = vpop.eup %6768  ;;  %v4386_v23 = vadd.f32 1.0, %v6767_v32  ;;  %v3919_v13 = vrot.slane %v3918_v15, 4  ;;  %v3933_v47 = vrot.slane %v3932_v27, 4 }
 0x327   : > { %6780 = vrcp.f32 %v4385_v55  ;;  %v6771_v63 = vpop.eup %6770  ;;  %v4388_v29 = vadd.f32 1.0, %v6769_v33  ;;  %v3861_v32 = vadd.f32 %v3860_v12, %v3859_v5  ;;  %v4018_v20 = vmul.f32 0.125, %v3847_v31 }
 0x328   : > { %6782 = vrcp.f32 %v4386_v23  ;;  %v4387_v24 = vadd.f32 1.0, %v6771_v63  ;;  %v3875_v63 = vadd.f32 %v3874_v54, %v3873_v26  ;;  %v3897_v50 = vsel %vm3784_vm10, %v6907_v61, 0.0 }
 0x329   : > { %v6773_v57 = vpop.eup %6772  ;;  %6784 = vrcp.f32 %v4388_v29  ;;  %v3946_v42 = vsel %vm3784_vm10, %v6908_v58, 0.0  ;;  %v3888_v5 = vrot.slane %v3887_v25, 1  ;;  %v3908_v31 = vadd.f32 %v3907_v60, %v3906_v39 }
 0x32a   : > { %v4390_v43 = vadd.f32 1.0, %v6773_v57  ;;  %6786 = vrcp.f32 %v4387_v24  ;;  %v3934_v12 = vadd.f32 %v3933_v47, %v3932_v27  ;;  %v3947_v54 = vrot.slane %v3946_v42, 4 }
 0x32b   : > { %v3898_v39 = vrot.slane %v3897_v50, 4 }
 0x32c   : > { %v6775_v23 = vpop.eup %6774  ;;  %v3948_v47 = vadd.f32 %v3947_v54, %v3946_v42 }
 0x32d   : > { %v8753_v7 = vpop.xlane.xlu0 %4183  ;;  %v4389_v26 = vadd.f32 1.0, %v6775_v23 }
 0x32e   : > { %v4202_v8 = vrot.slane %v8753_v7, 1  ;;  %v4204_v28 = vrot.slane %v8753_v7, 3  ;;  %v4206_v14 = vrot.slane %v8753_v7, 5  ;;  %v4208_v55 = vrot.slane %v8753_v7, 7 }
 0x32f   : > { %v4263_v24 = vadd.f32 %v8753_v7, %v4018_v20 }
 0x330   : > { %v4264_v6 = vadd.f32 %v4202_v8, %v4019_v19  ;;  %v4266_v1 = vadd.f32 %v4204_v28, %v4021_v62  ;;  %v4268_v4 = vadd.f32 %v4206_v14, %v4023_v34  ;;  %v4270_v19 = vadd.f32 %v4208_v55, %v4025_v59  ;;  %v6909_v55 = vld [vmem:[%s7108_s24 + $0x90] sm:$0xff] }
 0x331   : > { %v3920_v34 = vadd.f32 %v3919_v13, %v3918_v15  ;;  %v4020_v8 = vmul.f32 0.125, %v3861_v32  ;;  %v4203_v28 = vrot.slane %v8753_v7, 2  ;;  %v3889_v13 = vadd.f32 %v3888_v5, %v3887_v25 }
 0x332   : > { %v5924_v33 = vmul.f32 -1.442695, %v4264_v6  ;;  %v5926_v2 = vmul.f32 -1.442695, %v4266_v1  ;;  %v8765_v17 = vpop.eup %6776  ;;  %v5928_v62 = vmul.f32 -1.442695, %v4268_v4 }
 0x333   : > { %v6779_v29 = vpop.eup %6778  ;;  %4481 = vperm.xlu0 %6626, %v8765_v17   ;;  %v5930_v15 = vmul.f32 -1.442695, %v4270_v19  ;;  %v3921_v27 = vrot.slane %v3920_v34, 2  ;;  %v4022_v59 = vmul.f32 0.125, %v3875_v63  ;;  %v3911_v6 = vsel %vm3784_vm10, %v6909_v55, 0.0  ;;  %v6910_v19 = vld [vmem:[%s7108_s24 + $0xa0] sm:$0xff] }
 0x334   : > { %6788 = vpow2.f32 %v5924_v33  ;;  %4486 = vperm.xlu1 %6627, %v6779_v29   ;;  %v4672_v57 = vsub.f32 1.0, %v6779_v29  ;;  %v8770_v14 = vpop.eup %6780  ;;  %v3909_v1 = vrot.slane %v3908_v31, 1  ;;  %v3935_v4 = vrot.slane %v3934_v12, 2 }
 0x335   : > { %6790 = vrcp.f32 %v4390_v43  ;;  %v6783_v60 = vpop.eup %6782  ;;  %v4205_v43 = vrot.slane %v8753_v7, 4  ;;  %v4265_v32 = vadd.f32 %v4203_v28, %v4020_v8  ;;  %v5923_v20 = vmul.f32 -1.442695, %v4263_v24 }
 0x336   : > { %6792 = vpow2.f32 %v5926_v2  ;;  %v4674_v33 = vsub.f32 1.0, %v6783_v60  ;;  %v3899_v2 = vadd.f32 %v3898_v39, %v3897_v50  ;;  %v3922_v25 = vadd.f32 %v3921_v27, %v3920_v34  ;;  %v6785_v61 = vpop.eup %6784 }
 0x337   : > { %6794 = vpow2.f32 %v5928_v62  ;;  %4710 = vperm.xlu0 %6626, %v4672_v57   ;;  %v4024_v23 = vmul.f32 0.125, %v3889_v13  ;;  %v3912_v63 = vrot.slane %v3911_v6, 4  ;;  %v3910_v58 = vadd.f32 %v3909_v1, %v3908_v31  ;;  %v8779_v57 = vpop.eup %6786 }
 0x338   : > { %6796 = vrcp.f32 %v4389_v26  ;;  %4491 = vperm.xlu1 %6627, %v8770_v14   ;;  %v3925_v62 = vsel %vm3784_vm10, %v6910_v19, 0.0  ;;  %v3936_v42 = vadd.f32 %v3935_v4, %v3934_v12  ;;  %v3949_v29 = vrot.slane %v3948_v47, 2 }
 0x339   : > { %6798 = vpow2.f32 %v5930_v15  ;;  %v4207_v5 = vrot.slane %v8753_v7, 6  ;;  %v4267_v26 = vadd.f32 %v4205_v43, %v4022_v59  ;;  %v5925_v54 = vmul.f32 -1.442695, %v4265_v32  ;;  %v8781_v8 = vpop.xlane.xlu1 %4186  ;;  %v6911_v15 = vld [vmem:[%s7108_s24 + $0xb0] sm:$0xff] }
 0x33a   : > { %6800 = vpow2.f32 %v5923_v20  ;;  %v3900_v50 = vrot.slane %v3899_v2, 2  ;;  %v3923_v34 = vrot.slane %v3922_v25, 1  ;;  %v3913_v31 = vadd.f32 %v3912_v63, %v3911_v6 }
 0x33b   : > { %4720 = vperm.xlu0 %6626, %v4674_v33   ;;  %v3926_v24 = vrot.slane %v3925_v62, 4  ;;  %v3939_v39 = vsel %vm3784_vm10, %v6911_v15, 0.0  ;;  %v4676_v12 = vsub.f32 1.0, %v6785_v61  ;;  %v3937_v13 = vrot.slane %v3936_v42, 1 }
 0x33c   : > { %4496 = vperm.xlu1 %6627, %v6783_v60   ;;  %v3950_v7 = vadd.f32 %v3949_v29, %v3948_v47  ;;  %v4027_v59 = vmul.f32 0.125, %v3910_v58  ;;  %v4269_v1 = vadd.f32 %v4207_v5, %v4024_v23  ;;  %6802 = vpow2.f32 %v5925_v54  ;;  %v6912_v29 = vld [vmem:[%s7108_s24 + $0xc8] sm:$0xff] }
 0x33d   : > { %v5927_v4 = vmul.f32 -1.442695, %v4267_v26  ;;  %v4209_v43 = vrot.slane %v8781_v8, 1  ;;  %v3924_v32 = vadd.f32 %v3923_v34, %v3922_v25  ;;  %v3914_v33 = vrot.slane %v3913_v31, 2 }
 0x33e   : > { %v3927_v63 = vadd.f32 %v3926_v24, %v3925_v62  ;;  %v3940_v19 = vrot.slane %v3939_v39, 4  ;;  %v3901_v47 = vadd.f32 %v3900_v50, %v3899_v2  ;;  %v3938_v58 = vadd.f32 %v3937_v13, %v3936_v42 }
 0x33f   : > { %4730 = vperm.xlu0 %6626, %v4676_v12   ;;  %v3960_v15 = vsel %vm3784_vm10, %v6912_v29, 0.0  ;;  %v5929_v5 = vmul.f32 -1.442695, %v4269_v1  ;;  %v3951_v26 = vrot.slane %v3950_v7, 1  ;;  %v4272_v54 = vadd.f32 %v4209_v43, %v4027_v59  ;;  %v6914_v29 = vld [vmem:[%s7108_s24 + $0xe8] sm:$0xff] }
 0x340   : > { %4501 = vperm.xlu1 %6627, %v8779_v57   ;;  %v4029_v34 = vmul.f32 0.125, %v3924_v32  ;;  %v4211_v62 = vrot.slane %v8781_v8, 3  ;;  %v3915_v2 = vadd.f32 %v3914_v33, %v3913_v31  ;;  %v3928_v42 = vrot.slane %v3927_v63, 2 }
 0x341   : > { %v6789_v28 = vpop.eup %6788  ;;  %v3941_v50 = vadd.f32 %v3940_v19, %v3939_v39  ;;  %v3902_v12 = vrot.slane %v3901_v47, 1  ;;  %v3952_v59 = vadd.f32 %v3951_v26, %v3950_v7  ;;  %v5932_v1 = vmul.f32 -1.442695, %v4272_v54 }
 0x342   : > { %v6791_v27 = vpop.eup %6790  ;;  %v4392_v60 = vadd.f32 1.0, %v6789_v28  ;;  %v4274_v31 = vadd.f32 %v4211_v62, %v4029_v34  ;;  %v3916_v32 = vrot.slane %v3915_v2, 1  ;;  %v3929_v39 = vadd.f32 %v3928_v42, %v3927_v63 }
 0x343   : > { %v6793_v55 = vpop.eup %6792  ;;  %v4678_v28 = vsub.f32 1.0, %v6791_v27  ;;  %v3903_v33 = vadd.f32 %v3902_v12, %v3901_v47  ;;  %v4033_v7 = vmul.f32 0.125, %v3952_v59  ;;  %v4215_v54 = vrot.slane %v8781_v8, 7 }
 0x344   : > { %v4394_v6 = vadd.f32 1.0, %v6793_v55  ;;  %6804 = vrcp.f32 %v4392_v60  ;;  %v6795_v20 = vpop.eup %6794  ;;  %4506 = vperm.xlu1 %6627, %v6785_v61   ;;  %v3961_v60 = vrot.slane %v3960_v15, 4  ;;  %v6913_v61 = vld [vmem:[%s7108_s24 + $0xd8] sm:$0xff]  ;;  %v4031_v55 = vmul.f32 0.125, %v3938_v58 }
 0x345   : > { %v8789_v23 = vpop.eup %6796  ;;  %6806 = vpow2.f32 %v5927_v4  ;;  %4740 = vperm.xlu0 %6626, %v4678_v28   ;;  %v4396_v25 = vadd.f32 1.0, %v6795_v20  ;;  %v3974_v13 = vsel %vm3784_vm10, %v6913_v61, 0.0  ;;  %v3942_v20 = vrot.slane %v3941_v50, 2 }
 0x346   : > { %6808 = vrcp.f32 %v4394_v6  ;;  %v6799_v24 = vpop.eup %6798  ;;  %v4213_v6 = vrot.slane %v8781_v8, 5  ;;  %v3962_v19 = vadd.f32 %v3961_v60, %v3960_v15  ;;  %v3975_v28 = vrot.slane %v3974_v13, 4  ;;  %v6915_v60 = vld [vmem:[%s7108_s24 + $0xf8] sm:$0xff] }
 0x347   : > { %6810 = vpow2.f32 %v5929_v5  ;;  %v6801_v4 = vpop.eup %6800  ;;  %v4398_v43 = vadd.f32 1.0, %v6799_v24  ;;  %v3988_v61 = vsel %vm3784_vm10, %v6914_v29, 0.0  ;;  %v4671_v58 = vsub.f32 1.0, %v8765_v17 }
 0x348   : > { %4511 = vperm.xlu1 %6627, %v8789_v23   ;;  %6812 = vrcp.f32 %v4396_v25  ;;  %v4391_v5 = vadd.f32 1.0, %v6801_v4  ;;  %v4276_v25 = vadd.f32 %v4213_v6, %v4031_v55  ;;  %v5934_v63 = vmul.f32 -1.442695, %v4274_v31  ;;  %v6916_v31 = vld [vmem:[%s7108_s24 + $0xc0] sm:$0xff] }
 0x349   : > { %6814 = vpow2.f32 %v5932_v1  ;;  %v6803_v26 = vpop.eup %6802  ;;  %v3917_v47 = vadd.f32 %v3916_v32, %v3915_v2  ;;  %v3930_v15 = vrot.slane %v3929_v39, 1  ;;  %v3943_v62 = vadd.f32 %v3942_v20, %v3941_v50 }
 0x34a   : > { %6816 = vrcp.f32 %v4398_v43  ;;  %v3963_v24 = vrot.slane %v3962_v19, 2  ;;  %v3976_v42 = vadd.f32 %v3975_v28, %v3974_v13  ;;  %v4393_v17 = vadd.f32 1.0, %v6803_v26 }
 0x34b   : > { %6818 = vrcp.f32 %v4391_v5  ;;  %v4026_v12 = vmul.f32 0.125, %v3903_v33  ;;  %v4002_v59 = vsel %vm3784_vm10, %v6915_v60, 0.0  ;;  %v4278_v1 = vadd.f32 %v4215_v54, %v4033_v7 }
 0x34c   : > { %4516 = vperm.xlu1 %6627, %v6791_v27   ;;  %v3989_v27 = vrot.slane %v3988_v61, 4  ;;  %6820 = vpow2.f32 %v5934_v63  ;;  %v5936_v4 = vmul.f32 -1.442695, %v4276_v25  ;;  %v4673_v2 = vsub.f32 1.0, %v8770_v14  ;;  %v6917_v63 = vld [vmem:[%s7108_s24 + $0xd0] sm:$0xff] }
 0x34d   : > { %v3931_v13 = vadd.f32 %v3930_v15, %v3929_v39  ;;  %v3944_v43 = vrot.slane %v3943_v62, 1  ;;  %v4028_v6 = vmul.f32 0.125, %v3917_v47  ;;  %v3953_v32 = vsel %vm3784_vm10, %v6916_v31, 0.0 }
 0x34e   : > { %v3964_v20 = vadd.f32 %v3963_v24, %v3962_v19  ;;  %v3977_v28 = vrot.slane %v3976_v42, 2  ;;  %v3990_v33 = vadd.f32 %v3989_v27, %v3988_v61  ;;  %v4003_v29 = vrot.slane %v4002_v59, 4 }
 0x34f   : > { %6822 = vrcp.f32 %v4393_v17  ;;  %v4210_v14 = vrot.slane %v8781_v8, 2  ;;  %v4271_v7 = vadd.f32 %v8781_v8, %v4026_v12  ;;  %v4675_v26 = vsub.f32 1.0, %v8779_v57 }
 0x350   : > { %4705 = vperm.xlu1 %6627, %v4671_v58   ;;  %6824 = vpow2.f32 %v5936_v4  ;;  %v5938_v58 = vmul.f32 -1.442695, %v4278_v1  ;;  %v3945_v19 = vadd.f32 %v3944_v43, %v3943_v62  ;;  %v4030_v61 = vmul.f32 0.125, %v3931_v13  ;;  %v6918_v43 = vld [vmem:[%s7108_s24 + $0xe0] sm:$0xff] }
 0x351   : > { %v8800_v34 = vpop.eup %6804  ;;  %v3954_v25 = vrot.slane %v3953_v32, 4  ;;  %v3967_v47 = vsel %vm3784_vm10, %v6917_v63, 0.0  ;;  %v3965_v15 = vrot.slane %v3964_v20, 1  ;;  %v3978_v24 = vadd.f32 %v3977_v28, %v3976_v42 }
 0x352   : > { %4526 = vperm.xlu0 %6626, %v8800_v34   ;;  %v6807_v55 = vpop.eup %6806  ;;  %v3991_v27 = vrot.slane %v3990_v33, 2  ;;  %v4004_v17 = vadd.f32 %v4003_v29, %v4002_v59  ;;  %v4212_v12 = vrot.slane %v8781_v8, 4  ;;  %v4273_v57 = vadd.f32 %v4210_v14, %v4028_v6 }
 0x353   : > { %v8806_v50 = vpop.eup %6808  ;;  %v4395_v5 = vadd.f32 1.0, %v6807_v55  ;;  %v5931_v60 = vmul.f32 -1.442695, %v4271_v7  ;;  %v4677_v1 = vsub.f32 1.0, %v8789_v23  ;;  %v3955_v42 = vadd.f32 %v3954_v25, %v3953_v32  ;;  %v6919_v25 = vld [vmem:[%s7108_s24 + $0xf0] sm:$0xff] }
 0x354   : > { %4715 = vperm.xlu1 %6627, %v4673_v2   ;;  %v6811_v39 = vpop.eup %6810  ;;  %v4032_v2 = vmul.f32 0.125, %v3945_v19  ;;  %v3968_v13 = vrot.slane %v3967_v47, 4  ;;  %v3981_v59 = vsel %vm3784_vm10, %v6918_v43, 0.0  ;;  %v3966_v31 = vadd.f32 %v3965_v15, %v3964_v20 }
 0x355   : > { %v8814_v54 = vpop.eup %6812  ;;  %6826 = vrcp.f32 %v4395_v5  ;;  %v4397_v62 = vadd.f32 1.0, %v6811_v39  ;;  %v3979_v28 = vrot.slane %v3978_v24, 1  ;;  %v3992_v29 = vadd.f32 %v3991_v27, %v3990_v33  ;;  %v8829_v39 = vpop.xlane.xlu1 %4189 }
 0x356   : > { %4536 = vperm.xlu0 %6626, %v8806_v50   ;;  %v6815_v55 = vpop.eup %6814  ;;  %6828 = vpow2.f32 %v5938_v58  ;;  %v4005_v5 = vrot.slane %v4004_v17, 2  ;;  %v4214_v6 = vrot.slane %v8781_v8, 6  ;;  %v4275_v14 = vadd.f32 %v4212_v12, %v4030_v61 }
 0x357   : > { %v8821_v4 = vpop.eup %6816  ;;  %6830 = vpow2.f32 %v5931_v60  ;;  %v5933_v23 = vmul.f32 -1.442695, %v4273_v57  ;;  %v4400_v32 = vadd.f32 1.0, %v6815_v55  ;;  %v4680_v20 = vsub.f32 1.0, %v8800_v34 }
 0x358   : > { %4725 = vperm.xlu1 %6627, %v4675_v26   ;;  %v8827_v7 = vpop.eup %6818  ;;  %6832 = vrcp.f32 %v4397_v62  ;;  %v3956_v33 = vrot.slane %v3955_v42, 2  ;;  %v3969_v26 = vadd.f32 %v3968_v13, %v3967_v47  ;;  %v3982_v19 = vrot.slane %v3981_v59, 4 }
 0x359   : > { %v6821_v58 = vpop.eup %6820  ;;  %v3995_v63 = vsel %vm3784_vm10, %v6919_v25, 0.0  ;;  %v3980_v15 = vadd.f32 %v3979_v28, %v3978_v24  ;;  %v3993_v8 = vrot.slane %v3992_v29, 1  ;;  %v4006_v61 = vadd.f32 %v4005_v5, %v4004_v17 }
 0x35a   : > { %4546 = vperm.xlu0 %6626, %v8814_v54   ;;  %v4035_v27 = vmul.f32 0.125, %v3966_v31  ;;  %v4277_v12 = vadd.f32 %v4214_v6, %v4032_v2  ;;  %6834 = vpow2.f32 %v5933_v23  ;;  %v5935_v57 = vmul.f32 -1.442695, %v4275_v14 }
 0x35b   : > { %v4216_v60 = vrot.slane %v8829_v39, 1  ;;  %v4402_v55 = vadd.f32 1.0, %v6821_v58  ;;  %6836 = vrcp.f32 %v4400_v32  ;;  %v4682_v47 = vsub.f32 1.0, %v8806_v50 }
 0x35c   : > { %4735 = vperm.xlu1 %6627, %v4677_v1   ;;  %v8836_v34 = vpop.eup %6822  ;;  %v3957_v1 = vadd.f32 %v3956_v33, %v3955_v42  ;;  %v3983_v24 = vadd.f32 %v3982_v19, %v3981_v59  ;;  %v3970_v13 = vrot.slane %v3969_v26, 2  ;;  %v3994_v17 = vadd.f32 %v3993_v8, %v3992_v29 }
 0x35d   : > { %v6825_v62 = vpop.eup %6824  ;;  %v3996_v43 = vrot.slane %v3995_v63, 4  ;;  %v4037_v31 = vmul.f32 0.125, %v3980_v15  ;;  %6838 = vpow2.f32 %v5935_v57  ;;  %v5937_v2 = vmul.f32 -1.442695, %v4277_v12 }
 0x35e   : > { %4556 = vperm.xlu0 %6626, %v8821_v4   ;;  %v4007_v28 = vrot.slane %v4006_v61, 1  ;;  %v4280_v5 = vadd.f32 %v4216_v60, %v4035_v27  ;;  %v4404_v14 = vadd.f32 1.0, %v6825_v62  ;;  %6840 = vrcp.f32 %v4402_v55 }
 0x35f   : > { %v4218_v50 = vrot.slane %v8829_v39, 3  ;;  %v4684_v42 = vsub.f32 1.0, %v8814_v54  ;;  %v3958_v23 = vrot.slane %v3957_v1, 1  ;;  %v3971_v29 = vadd.f32 %v3970_v13, %v3969_v26 }
 0x360   : > { %4521 = vperm.xlu1 %6627, %v8827_v7   ;;  %v3984_v32 = vrot.slane %v3983_v24, 2  ;;  %v4039_v58 = vmul.f32 0.125, %v3994_v17  ;;  %6842 = vpow2.f32 %v5937_v2  ;;  %v4008_v33 = vadd.f32 %v4007_v28, %v4006_v61 }
 0x361   : > { %v4220_v19 = vrot.slane %v8829_v39, 5  ;;  %v5940_v25 = vmul.f32 -1.442695, %v4280_v5  ;;  %6844 = vrcp.f32 %v4404_v14  ;;  %v4282_v27 = vadd.f32 %v4218_v50, %v4037_v31 }
 0x362   : > { %4750 = vperm.xlu0 %6626, %v4680_v20   ;;  %v8840_v6 = vpop.eup %6826  ;;  %v3997_v20 = vadd.f32 %v3996_v43, %v3995_v63  ;;  %v4686_v54 = vsub.f32 1.0, %v8821_v4  ;;  %v3959_v57 = vadd.f32 %v3958_v23, %v3957_v1  ;;  %v3972_v26 = vrot.slane %v3971_v29, 1 }
 0x363   : > { %v6829_v59 = vpop.eup %6828  ;;  %v3985_v60 = vadd.f32 %v3984_v32, %v3983_v24  ;;  %v4222_v61 = vrot.slane %v8829_v39, 7  ;;  %6846 = vpow2.f32 %v5940_v25  ;;  %v4284_v13 = vadd.f32 %v4220_v19, %v4039_v58 }
 0x364   : > { %4531 = vperm.xlu1 %6627, %v8836_v34   ;;  %v6831_v15 = vpop.eup %6830  ;;  %v4406_v8 = vadd.f32 1.0, %v6829_v59  ;;  %v3998_v63 = vrot.slane %v3997_v20, 2  ;;  %v5942_v17 = vmul.f32 -1.442695, %v4282_v27  ;;  %v4679_v43 = vsub.f32 1.0, %v8827_v7 }
 0x365   : > { %v6833_v12 = vpop.eup %6832  ;;  %v4399_v55 = vadd.f32 1.0, %v6831_v15  ;;  %v3973_v4 = vadd.f32 %v3972_v26, %v3971_v29  ;;  %v3986_v2 = vrot.slane %v3985_v60, 1  ;;  %v4034_v28 = vmul.f32 0.125, %v3959_v57 }
 0x366   : > { %4760 = vperm.xlu0 %6626, %v4682_v47   ;;  %v4041_v47 = vmul.f32 0.125, %v4008_v33  ;;  %6848 = vrcp.f32 %v4406_v8  ;;  %v3999_v1 = vadd.f32 %v3998_v63, %v3997_v20  ;;  %v5944_v50 = vmul.f32 -1.442695, %v4284_v13 }
 0x367   : > { %v6835_v62 = vpop.eup %6834  ;;  %6850 = vrcp.f32 %v4399_v55  ;;  %v3987_v23 = vadd.f32 %v3986_v2, %v3985_v60  ;;  %v4036_v58 = vmul.f32 0.125, %v3973_v4  ;;  %v4217_v7 = vrot.slane %v8829_v39, 2 }
 0x368   : > { %4541 = vperm.xlu1 %6627, %v8840_v6   ;;  %v6837_v31 = vpop.eup %6836  ;;  %v4401_v24 = vadd.f32 1.0, %v6835_v62  ;;  %v4286_v5 = vadd.f32 %v4222_v61, %v4041_v47  ;;  %6852 = vpow2.f32 %v5942_v17  ;;  %v4000_v32 = vrot.slane %v3999_v1, 1 }
 0x369   : > { %v4279_v29 = vadd.f32 %v8829_v39, %v4034_v28  ;;  %v4683_v25 = vsub.f32 1.0, %v8840_v6  ;;  %v4219_v27 = vrot.slane %v8829_v39, 4  ;;  %v4685_v63 = vsub.f32 1.0, %v6833_v12 }
 0x36a   : > { %4770 = vperm.xlu0 %6626, %v4684_v42   ;;  %v6839_v14 = vpop.eup %6838  ;;  %v4681_v42 = vsub.f32 1.0, %v8836_v34  ;;  %6854 = vrcp.f32 %v4401_v24  ;;  %v5946_v20 = vmul.f32 -1.442695, %v4286_v5  ;;  %v4001_v8 = vadd.f32 %v4000_v32, %v3999_v1 }
 0x36b   : > { %v6841_v59 = vpop.eup %6840  ;;  %v4403_v19 = vadd.f32 1.0, %v6839_v14  ;;  %6856 = vpow2.f32 %v5944_v50  ;;  %v4038_v34 = vmul.f32 0.125, %v3987_v23  ;;  %v5939_v57 = vmul.f32 -1.442695, %v4279_v29 }
 0x36c   : > { %4551 = vperm.xlu1 %6627, %v6833_v12   ;;  %6858 = vpow2.f32 %v5946_v20  ;;  %v4040_v47 = vmul.f32 0.125, %v4001_v8  ;;  %v4221_v6 = vrot.slane %v8829_v39, 6  ;;  %v4690_v28 = vsub.f32 1.0, %v6841_v59 }
 0x36d   : > { %v6843_v33 = vpop.eup %6842  ;;  %6860 = vrcp.f32 %v4403_v19  ;;  %v4283_v61 = vadd.f32 %v4219_v27, %v4038_v34 }
 0x36e   : > { %4780 = vperm.xlu0 %6626, %v4686_v54   ;;  %v6845_v15 = vpop.eup %6844  ;;  %v4281_v54 = vadd.f32 %v4217_v7, %v4036_v58  ;;  %v4405_v60 = vadd.f32 1.0, %v6843_v33  ;;  %6862 = vpow2.f32 %v5939_v57  ;;  %v4285_v2 = vadd.f32 %v4221_v6, %v4040_v47 }
 0x36f   : > { %v5943_v1 = vmul.f32 -1.442695, %v4283_v61 }
 0x370   : > { %4745 = vperm.xlu1 %6627, %v4679_v43   ;;  %v6847_v26 = vpop.eup %6846  ;;  %v5941_v62 = vmul.f32 -1.442695, %v4281_v54  ;;  %6864 = vrcp.f32 %v4405_v60  ;;  %v4688_v43 = vsub.f32 1.0, %v6837_v31  ;;  %v5945_v39 = vmul.f32 -1.442695, %v4285_v2 }
 0x371   : > { %v4408_v17 = vadd.f32 1.0, %v6847_v26 }
 0x372   : > { %4566 = vperm.xlu0 %6626, %v6837_v31   ;;  %6866 = vpow2.f32 %v5941_v62 }
 0x373   : > { %v6849_v55 = vpop.eup %6848  ;;  %6868 = vrcp.f32 %v4408_v17 }
 0x374   : > { %4755 = vperm.xlu1 %6627, %v4681_v42   ;;  %v6851_v13 = vpop.eup %6850  ;;  %6870 = vpow2.f32 %v5943_v1  ;;  %v4692_v42 = vsub.f32 1.0, %v6845_v15  ;;  %v4694_v58 = vsub.f32 1.0, %v6849_v55 }
 0x375   : > { %v6853_v4 = vpop.eup %6852  ;;  %v4687_v20 = vsub.f32 1.0, %v6851_v13 }
 0x376   : > { %4576 = vperm.xlu0 %6626, %v6841_v59   ;;  %v4410_v24 = vadd.f32 1.0, %v6853_v4  ;;  %v541_v4 = vld [vmem:[%s8860_s17] sm:$0xff] }
 0x377   : > { %v6855_v12 = vpop.eup %6854 }
 0x378   : > { %4765 = vperm.xlu1 %6627, %v4683_v25   ;;  %v6857_v5 = vpop.eup %6856  ;;  %6872 = vrcp.f32 %v4410_v24  ;;  %v4867_v24 = vrot.slane %v541_v4, 1 }
 0x379   : > { %v6859_v14 = vpop.eup %6858  ;;  %v4412_v50 = vadd.f32 1.0, %v6857_v5  ;;  %6874 = vpow2.f32 %v5945_v39 }
 0x37a   : > { %4586 = vperm.xlu0 %6626, %v6845_v15   ;;  %v6861_v31 = vpop.eup %6860  ;;  %v4414_v32 = vadd.f32 1.0, %v6859_v14  ;;  %v4689_v15 = vsub.f32 1.0, %v6855_v12 }
 0x37b   : > { %v6863_v23 = vpop.eup %6862  ;;  %6876 = vrcp.f32 %v4412_v50  ;;  %v4691_v54 = vsub.f32 1.0, %v6861_v31 }
 0x37c   : > { %4775 = vperm.xlu1 %6627, %v4685_v63   ;;  %v4407_v29 = vadd.f32 1.0, %v6863_v23  ;;  %6878 = vrcp.f32 %v4414_v32 }
 0x37d   : > { %v6865_v7 = vpop.eup %6864 }
 0x37e   : > { %4596 = vperm.xlu0 %6626, %v6849_v55   ;;  %6880 = vrcp.f32 %v4407_v29  ;;  %v4693_v60 = vsub.f32 1.0, %v6865_v7 }
 0x37f   : > { %v6867_v59 = vpop.eup %6866 }
 0x380   : > { %4561 = vperm.xlu1 %6627, %v6851_v13   ;;  %v6869_v33 = vpop.eup %6868  ;;  %v4409_v25 = vadd.f32 1.0, %v6867_v59 }
 0x381   : > { %v6871_v19 = vpop.eup %6870  ;;  %v4696_v55 = vsub.f32 1.0, %v6869_v33 }
 0x382   : > { %4790 = vperm.xlu0 %6626, %v4688_v43   ;;  %v4411_v27 = vadd.f32 1.0, %v6871_v19  ;;  %6882 = vrcp.f32 %v4409_v25  ;;  %v4871_v19 = vrot.slane %v541_v4, 5 }
 0x384   : > { %4571 = vperm.xlu1 %6627, %v6855_v12   ;;  %6884 = vrcp.f32 %v4411_v27 }
 0x385   : > { %v6873_v8 = vpop.eup %6872 }
 0x386   : > { %4800 = vperm.xlu0 %6626, %v4690_v28   ;;  %v6875_v34 = vpop.eup %6874  ;;  %v4698_v6 = vsub.f32 1.0, %v6873_v8 }
 0x387   : > { %v4413_v26 = vadd.f32 1.0, %v6875_v34 }
 0x388   : > { %4581 = vperm.xlu1 %6627, %v6861_v31   ;;  %v6877_v57 = vpop.eup %6876 }
 0x389   : > { %v6879_v63 = vpop.eup %6878  ;;  %6886 = vrcp.f32 %v4413_v26  ;;  %v4700_v62 = vsub.f32 1.0, %v6877_v57 }
 0x38a   : > { %4810 = vperm.xlu0 %6626, %v4692_v42   ;;  %v4702_v17 = vsub.f32 1.0, %v6879_v63  ;;  %v4869_v42 = vrot.slane %v541_v4, 3 }
 0x38b   : > { %v6881_v47 = vpop.eup %6880 }
 0x38c   : > { %4591 = vperm.xlu1 %6627, %v6865_v7   ;;  %v4695_v1 = vsub.f32 1.0, %v6881_v47 }
 0x38e   : > { %4820 = vperm.xlu0 %6626, %v4694_v58  }
 0x38f   : > { %v6883_v61 = vpop.eup %6882 }
 0x390   : > { %4785 = vperm.xlu1 %6627, %v4687_v20   ;;  %v4697_v5 = vsub.f32 1.0, %v6883_v61 }
 0x391   : > { %v6885_v13 = vpop.eup %6884 }
 0x392   : > { %4606 = vperm.xlu0 %6626, %v6869_v33   ;;  %v4699_v32 = vsub.f32 1.0, %v6885_v13 }
 0x394   : > { %4795 = vperm.xlu1 %6627, %v4689_v15  }
 0x396   : > { %4616 = vperm.xlu0 %6626, %v6873_v8   ;;  %v6887_v43 = vpop.eup %6886 }
 0x397   : > { %v4701_v20 = vsub.f32 1.0, %v6887_v43 }
 0x398   : > { %4805 = vperm.xlu1 %6627, %v4691_v54   ;;  %v4873_v54 = vrot.slane %v541_v4, 7 }
 0x39a   : > { %4626 = vperm.xlu0 %6626, %v6877_v57  }
 0x39c   : > { %4815 = vperm.xlu1 %6627, %v4693_v60  }
 0x39e   : > { %4636 = vperm.xlu0 %6626, %v6879_v63  }
 0x3a0   : > { %4601 = vperm.xlu1 %6627, %v6881_v47  }
 0x3a2   : > { %4830 = vperm.xlu0 %6626, %v4696_v55  }
 0x3a4   : > { %4611 = vperm.xlu1 %6627, %v6883_v61  }
 0x3a6   : > { %4840 = vperm.xlu0 %6626, %v4698_v6  }
 0x3a8   : > { %4621 = vperm.xlu1 %6627, %v6885_v13  }
 0x3aa   : > { %4850 = vperm.xlu0 %6626, %v4700_v62   ;;  %v4868_v62 = vrot.slane %v541_v4, 2 }
 0x3ac   : > { %4631 = vperm.xlu1 %6627, %v6887_v43   ;;  %v9330_v43 = vld [vmem:[#allocation7_spill] sm:$0xff] }
 0x3ae   : > { %4860 = vperm.xlu0 %6626, %v4702_v17   ;;  %v4482_v2 = vpop.permute.xlu0 %4481 }
 0x3af   : > { %v4487_v12 = vpop.permute.xlu1 %4486  ;;  %v4639_v6 = vmul.f32 %v4482_v2, %v8367_v49 }
 0x3b0   : > { %4825 = vperm.xlu1 %6627, %v4695_v1   ;;  %v4640_v39 = vmul.f32 %v4487_v12, %v8355_v10 }
 0x3b2   : > { %v4711_v28 = vpop.permute.xlu0 %4710 }
 0x3b3   : > { %v4928_v14 = vmul.f32 %v4867_v24, %v4711_v28  ;;  %v4492_v50 = vpop.permute.xlu1 %4491  ;;  %v4870_v24 = vrot.slane %v541_v4, 4 }
 0x3b4   : > { %4835 = vperm.xlu1 %6627, %v4697_v5   ;;  %v4641_v1 = vmul.f32 %v4492_v50, %v9330_v43 }
 0x3b5   : > { %v8864_v31 = vadd.f32 %v4928_v14, %v4640_v39 }
 0x3b6   : > { %v4721_v23 = vpop.permute.xlu0 %4720 }
 0x3b7   : > { %v4497_v58 = vpop.permute.xlu1 %4496  ;;  %v4930_v7 = vmul.f32 %v4869_v42, %v4721_v23  ;;  %v4872_v42 = vrot.slane %v541_v4, 6  ;;  %v542_v23 = vld [vmem:[%s8860_s17 + $0x8] sm:$0xff] }
 0x3b8   : > { %v4642_v59 = vmul.f32 %v4497_v58, %v8369_v11  ;;  %4845 = vperm.xlu1 %6627, %v4699_v32  }
 0x3ba   : > { %v8867_v29 = vadd.f32 %v4930_v7, %v4642_v59  ;;  %v4731_v10 = vpop.permute.xlu0 %4730  ;;  %v4874_v7 = vrot.slane %v542_v23, 1 }
 0x3bb   : > { %v4502_v33 = vpop.permute.xlu1 %4501  ;;  %v4932_v15 = vmul.f32 %v4871_v19, %v4731_v10 }
 0x3bc   : > { %4855 = vperm.xlu1 %6627, %v4701_v20   ;;  %v4643_v39 = vmul.f32 %v4502_v33, %v8414_v3 }
 0x3bf   : > { %v4507_v25 = vpop.permute.xlu1 %4506 }
 0x3c0   : > { %v4644_v8 = vmul.f32 %v4507_v25, %v8400_v48  ;;  %v4741_v57 = vpop.permute.xlu0 %4740 }
 0x3c1   : > { %v4934_v60 = vmul.f32 %v4873_v54, %v4741_v57 }
 0x3c2   : > { %v8870_v34 = vadd.f32 %v4932_v15, %v4644_v8  ;;  %v4876_v15 = vrot.slane %v542_v23, 3  ;;  %v9331_v8 = vld [vmem:[#allocation9_spill] sm:$0xff] }
 0x3c3   : > { %v4512_v27 = vpop.permute.xlu1 %4511 }
 0x3c4   : > { %v4645_v58 = vmul.f32 %v4512_v27, %v8460_v52 }
 0x3c7   : > { %v4517_v26 = vpop.permute.xlu1 %4516 }
 0x3c8   : > { %v4646_v11 = vmul.f32 %v4517_v26, %v8507_v36  ;;  %v4878_v26 = vrot.slane %v542_v23, 5 }
 0x3ca   : > { %v8873_v63 = vadd.f32 %v4934_v60, %v4646_v11 }
 0x3cb   : > { %v4706_v47 = vpop.permute.xlu1 %4705 }
 0x3cc   : > { %v4927_v61 = vmul.f32 %v4706_v47, %v541_v4 }
 0x3cd   : > { %v4527_v55 = vpop.permute.xlu0 %4526 }
 0x3ce   : > { %v8876_v13 = vadd.f32 %v4927_v61, %v4639_v6  ;;  %v4648_v10 = vmul.f32 %v4527_v55, %v8443_v18  ;;  %v4880_v6 = vrot.slane %v542_v23, 7 }
 0x3cf   : > { %v4716_v17 = vpop.permute.xlu1 %4715 }
 0x3d0   : > { %v4929_v12 = vmul.f32 %v4868_v62, %v4716_v17 }
 0x3d1   : > { %v4537_v48 = vpop.permute.xlu0 %4536 }
 0x3d2   : > { %v8879_v28 = vadd.f32 %v4929_v12, %v4641_v1  ;;  %v4650_v54 = vmul.f32 %v4537_v48, %v9331_v8  ;;  %v9332_v12 = vld [vmem:[#allocation8_spill] sm:$0xff] }
 0x3d3   : > { %v4726_v5 = vpop.permute.xlu1 %4725 }
 0x3d4   : > { %v4931_v14 = vmul.f32 %v4870_v24, %v4726_v5 }
 0x3d5   : > { %v4547_v36 = vpop.permute.xlu0 %4546 }
 0x3d6   : > { %v8883_v49 = vadd.f32 %v4931_v14, %v4643_v39  ;;  %v4652_v11 = vmul.f32 %v4547_v36, %v8491_v22  ;;  %v4875_v39 = vrot.slane %v542_v23, 2 }
 0x3d7   : > { %v4736_v32 = vpop.permute.xlu1 %4735 }
 0x3d8   : > { %v4933_v59 = vmul.f32 %v4872_v42, %v4736_v32  ;;  %v9333_v42 = vld [vmem:[#allocation10_spill] sm:$0xff] }
 0x3d9   : > { %v4557_v2 = vpop.permute.xlu0 %4556 }
 0x3da   : > { %v8886_v50 = vadd.f32 %v4933_v59, %v4645_v58  ;;  %v4654_v62 = vmul.f32 %v4557_v2, %v8601_v37 }
 0x3db   : > { %v4522_v19 = vpop.permute.xlu1 %4521 }
 0x3dc   : > { %v4647_v24 = vmul.f32 %v4522_v19, %v9332_v12 }
 0x3dd   : > { %v4751_v20 = vpop.permute.xlu0 %4750 }
 0x3de   : > { %v4936_v25 = vmul.f32 %v4874_v7, %v4751_v20  ;;  %v4877_v7 = vrot.slane %v542_v23, 4  ;;  %v9334_v20 = vld [vmem:[#allocation11_spill] sm:$0xff] }
 0x3df   : > { %v4532_v33 = vpop.permute.xlu1 %4531 }
 0x3e0   : > { %v8889_v3 = vadd.f32 %v4936_v25, %v4648_v10  ;;  %v4649_v32 = vmul.f32 %v4532_v33, %v9333_v42 }
 0x3e1   : > { %v4761_v4 = vpop.permute.xlu0 %4760 }
 0x3e2   : > { %v4938_v57 = vmul.f32 %v4876_v15, %v4761_v4  ;;  %v4879_v15 = vrot.slane %v542_v23, 6  ;;  %v543_v4 = vld [vmem:[%s8860_s17 + $0x10] sm:$0xff] }
 0x3e3   : > { %v4542_v27 = vpop.permute.xlu1 %4541  ;;  %v4887_v42 = vrot.slane %v543_v4, 7 }
 0x3e4   : > { %v8892_v60 = vadd.f32 %v4938_v57, %v4650_v54  ;;  %v4651_v10 = vmul.f32 %v4542_v27, %v9334_v20 }
 0x3e5   : > { %v4771_v52 = vpop.permute.xlu0 %4770 }
 0x3e6   : > { %v4940_v47 = vmul.f32 %v4878_v26, %v4771_v52  ;;  %v4881_v26 = vrot.slane %v543_v4, 1 }
 0x3e7   : > { %v4552_v55 = vpop.permute.xlu1 %4551 }
 0x3e8   : > { %v8895_v61 = vadd.f32 %v4940_v47, %v4652_v11  ;;  %v4653_v57 = vmul.f32 %v4552_v55, %v8550_v51 }
 0x3e9   : > { %v4781_v18 = vpop.permute.xlu0 %4780 }
 0x3ea   : > { %v4942_v17 = vmul.f32 %v4880_v6, %v4781_v18 }
 0x3eb   : > { %v4746_v1 = vpop.permute.xlu1 %4745 }
 0x3ec   : > { %v8898_v43 = vadd.f32 %v4942_v17, %v4654_v62  ;;  %v4935_v5 = vmul.f32 %v4746_v1, %v542_v23  ;;  %v4883_v62 = vrot.slane %v543_v4, 3 }
 0x3ed   : > { %v4567_v48 = vpop.permute.xlu0 %4566 }
 0x3ee   : > { %v8901_v14 = vadd.f32 %v4935_v5, %v4647_v24  ;;  %v4656_v6 = vmul.f32 %v4567_v48, %v8537_v9  ;;  %v4885_v24 = vrot.slane %v543_v4, 5 }
 0x3ef   : > { %v4756_v36 = vpop.permute.xlu1 %4755 }
 0x3f0   : > { %v4937_v58 = vmul.f32 %v4875_v39, %v4756_v36 }
 0x3f1   : > { %v4577_v22 = vpop.permute.xlu0 %4576 }
 0x3f2   : > { %v8904_v59 = vadd.f32 %v4937_v58, %v4649_v32  ;;  %v4658_v1 = vmul.f32 %v4577_v22, %v8556_v0 }
 0x3f3   : > { %v4766_v2 = vpop.permute.xlu1 %4765 }
 0x3f4   : > { %v4939_v25 = vmul.f32 %v4877_v7, %v4766_v2 }
 0x3f5   : > { %v4587_v37 = vpop.permute.xlu0 %4586 }
 0x3f6   : > { %v8908_v19 = vadd.f32 %v4939_v25, %v4651_v10  ;;  %v4660_v39 = vmul.f32 %v4587_v37, %v8603_v21  ;;  %v4882_v25 = vrot.slane %v543_v4, 2 }
 0x3f7   : > { %v4776_v54 = vpop.permute.xlu1 %4775 }
 0x3f8   : > { %v4941_v52 = vmul.f32 %v4879_v15, %v4776_v54 }
 0x3f9   : > { %v4597_v8 = vpop.permute.xlu0 %4596 }
 0x3fa   : > { %v8911_v33 = vadd.f32 %v4941_v52, %v4653_v57  ;;  %v4662_v58 = vmul.f32 %v4597_v8, %v8654_v46 }
 0x3fb   : > { %v4562_v47 = vpop.permute.xlu1 %4561 }
 0x3fc   : > { %v4655_v20 = vmul.f32 %v4562_v47, %v8564_v53 }
 0x3fd   : > { %v4791_v11 = vpop.permute.xlu0 %4790 }
 0x3fe   : > { %v4944_v18 = vmul.f32 %v4881_v26, %v4791_v11  ;;  %v4884_v26 = vrot.slane %v543_v4, 4 }
 0x3ff   : > { %v4572_v17 = vpop.permute.xlu1 %4571 }
 0x400   : > { %v8914_v27 = vadd.f32 %v4944_v18, %v4656_v6  ;;  %v4657_v54 = vmul.f32 %v4572_v17, %v8560_v44  ;;  %v4886_v18 = vrot.slane %v543_v4, 6 }
 0x401   : > { %v4801_v23 = vpop.permute.xlu0 %4800 }
 0x402   : > { %v4946_v12 = vmul.f32 %v4883_v62, %v4801_v23  ;;  %v544_v62 = vld [vmem:[%s8860_s17 + $0x18] sm:$0xff] }
 0x403   : > { %v4582_v55 = vpop.permute.xlu1 %4581 }
 0x404   : > { %v8917_v5 = vadd.f32 %v4946_v12, %v4658_v1  ;;  %v4659_v11 = vmul.f32 %v4582_v55, %v8596_v38  ;;  %v4888_v12 = vrot.slane %v544_v62, 1 }
 0x405   : > { %v4811_v51 = vpop.permute.xlu0 %4810 }
 0x406   : > { %v4948_v36 = vmul.f32 %v4885_v24, %v4811_v51 }
 0x407   : > { %v4592_v48 = vpop.permute.xlu1 %4591 }
 0x408   : > { %v8920_v32 = vadd.f32 %v4948_v36, %v4660_v39  ;;  %v4661_v1 = vmul.f32 %v4592_v48, %v8634_v40 }
 0x409   : > { %v4821_v9 = vpop.permute.xlu0 %4820 }
 0x40a   : > { %v4950_v7 = vmul.f32 %v4887_v42, %v4821_v9  ;;  %v4890_v42 = vrot.slane %v544_v62, 3 }
 0x40b   : > { %v4786_v22 = vpop.permute.xlu1 %4785 }
 0x40c   : > { %v8923_v2 = vadd.f32 %v4950_v7, %v4662_v58  ;;  %v4943_v10 = vmul.f32 %v4786_v22, %v543_v4  ;;  %v4892_v7 = vrot.slane %v544_v62, 5 }
 0x40d   : > { %v4607_v0 = vpop.permute.xlu0 %4606 }
 0x40e   : > { %v8926_v15 = vadd.f32 %v4943_v10, %v4655_v20  ;;  %v4664_v39 = vmul.f32 %v4607_v0, %v8611_v30 }
 0x40f   : > { %v4796_v37 = vpop.permute.xlu1 %4795 }
 0x410   : > { %v4945_v57 = vmul.f32 %v4882_v25, %v4796_v37  ;;  %v4894_v25 = vrot.slane %v544_v62, 7 }
 0x411   : > { %v4617_v21 = vpop.permute.xlu0 %4616 }
 0x412   : > { %v8929_v52 = vadd.f32 %v4945_v57, %v4657_v54  ;;  %v4666_v9 = vmul.f32 %v4617_v21, %v8656_v35 }
 0x413   : > { %v4806_v8 = vpop.permute.xlu1 %4805 }
 0x414   : > { %v4947_v6 = vmul.f32 %v4884_v26, %v4806_v8 }
 0x415   : > { %v4627_v46 = vpop.permute.xlu0 %4626 }
 0x416   : > { %v8933_v53 = vadd.f32 %v4947_v6, %v4659_v11  ;;  %v4668_v20 = vmul.f32 %v4627_v46, %v8689_v45  ;;  %v4889_v11 = vrot.slane %v544_v62, 2 }
 0x417   : > { %v4816_v23 = vpop.permute.xlu1 %4815 }
 0x418   : > { %v4949_v24 = vmul.f32 %v4886_v18, %v4816_v23  ;;  %v4891_v23 = vrot.slane %v544_v62, 4 }
 0x419   : > { %v4637_v47 = vpop.permute.xlu0 %4636 }
 0x41a   : > { %v8936_v44 = vadd.f32 %v4949_v24, %v4661_v1  ;;  %v4670_v54 = vmul.f32 %v4637_v47, %v8705_v56  ;;  %v9335_v24 = vld [vmem:[#allocation12_spill] sm:$0xff] }
 0x41b   : > { %v4602_v51 = vpop.permute.xlu1 %4601 }
 0x41c   : > { %v4663_v21 = vmul.f32 %v4602_v51, %v8647_v41  ;;  %v9336_v41 = vld [vmem:[#allocation13_spill] sm:$0xff] }
 0x41d   : > { %v4831_v17 = vpop.permute.xlu0 %4830 }
 0x41e   : > { %v4952_v36 = vmul.f32 %v4888_v12, %v4831_v17  ;;  %v4893_v17 = vrot.slane %v544_v62, 6 }
 0x41f   : > { %v4612_v55 = vpop.permute.xlu1 %4611 }
 0x420   : > { %v8939_v38 = vadd.f32 %v4952_v36, %v4664_v39  ;;  %v4665_v45 = vmul.f32 %v4612_v55, %v8658_v16 }
 0x421   : > { %v4841_v4 = vpop.permute.xlu0 %4840 }
 0x422   : > { %v4954_v58 = vmul.f32 %v4890_v42, %v4841_v4 }
 0x423   : > { %v4622_v48 = vpop.permute.xlu1 %4621 }
 0x424   : > { %v8942_v22 = vadd.f32 %v4954_v58, %v4666_v9  ;;  %v4667_v56 = vmul.f32 %v4622_v48, %v9335_v24 }
 0x425   : > { %v4851_v40 = vpop.permute.xlu0 %4850 }
 0x426   : > { %v4956_v10 = vmul.f32 %v4892_v7, %v4851_v40 }
 0x427   : > { %v4632_v0 = vpop.permute.xlu1 %4631 }
 0x428   : > { %v8945_v37 = vadd.f32 %v4956_v10, %v4668_v20  ;;  %v4669_v51 = vmul.f32 %v4632_v0, %v9336_v41 }
 0x429   : > { %v4861_v30 = vpop.permute.xlu0 %4860 }
 0x42a   : > { %v4958_v57 = vmul.f32 %v4894_v25, %v4861_v30 }
 0x42b   : > { %v4826_v35 = vpop.permute.xlu1 %4825 }
 0x42c   : > { %v8948_v26 = vadd.f32 %v4958_v57, %v4670_v54  ;;  %v4951_v8 = vmul.f32 %v4826_v35, %v544_v62 }
 0x42e   : > { %v8951_v6 = vadd.f32 %v4951_v8, %v4663_v21 }
 0x42f   : > { %v4836_v18 = vpop.permute.xlu1 %4835 }
 0x430   : > { %v4953_v46 = vmul.f32 %v4889_v11, %v4836_v18 }
 0x432   : > { %v8954_v1 = vadd.f32 %v4953_v46, %v4665_v45 }
 0x433   : > { %v4846_v12 = vpop.permute.xlu1 %4845 }
 0x434   : > { %v4955_v47 = vmul.f32 %v4891_v23, %v4846_v12 }
 0x436   : > { %v8957_v39 = vadd.f32 %v4955_v47, %v4667_v56  ;;  %4994 = sbr.rel (%p5947_p8) target bundleno = 1086 (0x43e), region = 56 }
 0x437   : > { %v4856_v36 = vpop.permute.xlu1 %4855 }
 0x438   : > { %v4957_v42 = vmul.f32 %v4893_v17, %v4856_v36 }
 0x43a   : > { %v8960_v4 = vadd.f32 %v4957_v42, %v4669_v51 }
 0x43b   : > { %v6962_v16 = vmov 0.0  }
 0x43c   : > { %4995 = vst.msk [vmem:[#allocation2] sm:$0xff] %vm3559_vm0, %v6962_v16  ;;  %4996 = vst.msk [vmem:[#allocation2 + $0x8] sm:$0xff] %vm3559_vm0, %v6962_v16 }
 0x43d   : > { %4997 = vst.msk [vmem:[#allocation2 + $0x10] sm:$0xff] %vm3559_vm0, %v6962_v16  ;;  %4998 = vst.msk [vmem:[#allocation2 + $0x18] sm:$0xff] %vm3559_vm0, %v6962_v16 }
 0x43e PF: > { %v9337_v62 = vld [vmem:[#allocation6_spill] sm:$0xff]  ;;  %v9338_v9 = vld [vmem:[#allocation5_spill] sm:$0xff]  ;;  %v9339_v7 = vld [vmem:[#allocation4_spill] sm:$0xff]  ;;  %v5035_v10 = vrot.slane %v8864_v31, 7  ;;  %v5037_v25 = vrot.slane %v8879_v28, 6  ;;  %v5039_v30 = vrot.slane %v8867_v29, 5 }
 0x43f   : > { %v8968_v55 = vand.u32 4294901760, %v9337_v62  ;;  %v8971_v58 = vand.u32 4294901760, %v9338_v9  ;;  %v8974_v40 = vand.u32 4294901760, %v9339_v7  ;;  %v9340_v48 = vld [vmem:[#allocation3_spill] sm:$0xff]  ;;  %v5041_v0 = vrot.slane %v8883_v49, 4  ;;  %p5948_p9 = scmp.ne.s32.totalorder %s6942_s27, 1 }
 0x440   : > { %v8977_v20 = vand.u32 4294901760, %v9340_v48  ;;  %v5036_v29 = vsel %vm4113_vm3, %v5035_v10, %v8876_v13  ;;  %v5043_v28 = vrot.slane %v8870_v34, 3  ;;  %v5045_v49 = vrot.slane %v8886_v50, 2 }
 0x441   : > { %6499 = vmatprep.subr.mxu0 %v8968_v55  ;;  %v8986_v54 = vsub.f32 %v9337_v62, %v8968_v55  ;;  %v8990_v57 = vsub.f32 %v9338_v9, %v8971_v58  ;;  %v8994_v35 = vsub.f32 %v9339_v7, %v8974_v40  ;;  %v5047_v21 = vrot.slane %v8873_v63, 1 }
 0x442   : > { %v8998_v31 = vsub.f32 %v9340_v48, %v8977_v20  ;;  %6500 = vmatpush3.msra.mxu0 %v8968_v55  ;;  %v5038_v34 = vsel %vm4116_vm4, %v5037_v25, %v5036_v29  ;;  %v5049_v63 = vrot.slane %v8889_v3, 7  ;;  %v5051_v13 = vrot.slane %v8904_v59, 6 }
 0x443   : > { %v9007_v8 = vand.u32 4294901760, %v8986_v54  ;;  %6501 = vmatprep.subr.mxu0 %v8971_v58  ;;  %v9011_v11 = vand.u32 4294901760, %v8990_v57  ;;  %v9014_v18 = vand.u32 4294901760, %v8994_v35  ;;  %v5053_v50 = vrot.slane %v8892_v60, 5 }
 0x444   : > { %v9017_v45 = vand.u32 4294901760, %v8998_v31  ;;  %6502 = vmatpush3.msra.mxu0 %v8971_v58  ;;  %v5040_v3 = vsel %vm4119_vm5, %v5039_v30, %v5038_v34  ;;  %v5050_v60 = vsel %vm4113_vm3, %v5049_v63, %v8901_v14  ;;  %v5055_v59 = vrot.slane %v8908_v19, 4 }
 0x445   : > { %v5236_v46 = vsub.f32 %v8986_v54, %v9007_v8  ;;  %v5243_v23 = vsub.f32 %v8990_v57, %v9011_v11  ;;  %6503 = vmatprep.subr.mxu0 %v8974_v40  ;;  %v5250_v12 = vsub.f32 %v8994_v35, %v9014_v18  ;;  %v5057_v56 = vrot.slane %v8895_v61, 3 }
 0x446   : > { %v5257_v24 = vsub.f32 %v8998_v31, %v9017_v45  ;;  %6504 = vmatpush3.msra.mxu0 %v8974_v40  ;;  %v5042_v51 = vsel %vm4122_vm6, %v5041_v0, %v5040_v3  ;;  %v5052_v42 = vsel %vm4116_vm4, %v5051_v13, %v5050_v60  ;;  %v5059_v16 = vrot.slane %v8911_v33, 2 }
 0x447   : > { %v5237_v47 = vand.u32 4294901760, %v5236_v46  ;;  %v5244_v17 = vand.u32 4294901760, %v5243_v23  ;;  %v5251_v36 = vand.u32 4294901760, %v5250_v12  ;;  %6505 = vmatprep.subr.mxu0 %v8977_v20  ;;  %v5061_v14 = vrot.slane %v8898_v43, 1 }
 0x448   : > { %v5258_v41 = vand.u32 4294901760, %v5257_v24  ;;  %6506 = vmatpush3.msra.mxu0 %v8977_v20  ;;  %v5044_v19 = vsel %vm4125_vm7, %v5043_v28, %v5042_v51  ;;  %v5054_v61 = vsel %vm4119_vm5, %v5053_v50, %v5052_v42  ;;  %v5063_v62 = vrot.slane %v8914_v27, 7 }
 0x449   : > { %6513 = vmatprep.subr.mxu1 %v5237_v47  ;;  %6527 = vmatprep.subr.mxu0 %v8986_v54  ;;  %v5065_v9 = vrot.slane %v8929_v52, 6  ;;  %v5046_v7 = vsel %vm4128_vm8, %v5045_v49, %v5044_v19  ;;  %v5056_v48 = vsel %vm4122_vm6, %v5055_v59, %v5054_v61  ;;  %v5067_v33 = vrot.slane %v8917_v5, 5 }
 0x44a   : > { %6514 = vmatpush3.msra.mxu1 %v5237_v47  ;;  %v5069_v43 = vrot.slane %v8933_v53, 4  ;;  %v5048_v10 = vsel %vm4131_vm9, %v5047_v21, %v5046_v7  ;;  %v5058_v25 = vsel %vm4125_vm7, %v5057_v56, %v5056_v48  ;;  %v5064_v30 = vsel %vm4113_vm3, %v5063_v62, %v8926_v15 }
 0x44b   : > { %6515 = vmatprep.subr.mxu1 %v5244_v17  ;;  %v5071_v27 = vrot.slane %v8920_v32, 3  ;;  %v5091_v52 = vsel %vm3559_vm0, %v5048_v10, 0  ;;  %v5060_v0 = vsel %vm4128_vm8, %v5059_v16, %v5058_v25  ;;  %v5066_v29 = vsel %vm4116_vm4, %v5065_v9, %v5064_v30 }
 0x44c   : > { %6516 = vmatpush3.msra.mxu1 %v5244_v17  ;;  %v5073_v5 = vrot.slane %v8936_v44, 2  ;;  %v9063_v53 = vand.u32 4294901760, %v5091_v52  ;;  %v5062_v28 = vsel %vm4131_vm9, %v5061_v14, %v5060_v0  ;;  %v5068_v49 = vsel %vm4119_vm5, %v5067_v33, %v5066_v29 }
 0x44d   : > { %6517 = vmatprep.subr.mxu1 %v5251_v36  ;;  %v5075_v15 = vrot.slane %v8923_v2, 1  ;;  %v5093_v32 = vsel %vm3559_vm0, %v5062_v28, 0  ;;  %v5070_v21 = vsel %vm4122_vm6, %v5069_v43, %v5068_v49  ;;  %v5077_v34 = vrot.slane %v8939_v38, 7 }
 0x44e   : > { %6518 = vmatpush3.msra.mxu1 %v5251_v36  ;;  %v5079_v63 = vrot.slane %v8954_v1, 6  ;;  %v9073_v44 = vsub.f32 %v5091_v52, %v9063_v53  ;;  %6521 = vmatprep.mubr.f32.mxu1 %v9063_v53  ;;  %v9076_v13 = vand.u32 4294901760, %v5093_v32  ;;  %v5072_v50 = vsel %vm4125_vm7, %v5071_v27, %v5070_v21 }
 0x44f   : > { %6519 = vmatprep.subr.mxu1 %v5258_v41  ;;  %v5081_v2 = vrot.slane %v8942_v22, 5  ;;  %v5074_v46 = vsel %vm4128_vm8, %v5073_v5, %v5072_v50  ;;  %v5078_v38 = vsel %vm4113_vm3, %v5077_v34, %v8951_v6  ;;  %v5083_v1 = vrot.slane %v8957_v39, 4  ;;  %v5000_v50 = vld [vmem:[#allocation2 + $0x8] sm:$0xff] }
 0x450   : > { %6520 = vmatpush3.msra.mxu1 %v5258_v41  ;;  %v5085_v23 = vrot.slane %v8945_v37, 3  ;;  %v5170_v12 = vand.u32 4294901760, %v9073_v44  ;;  %v5179_v24 = vsub.f32 %v5093_v32, %v9076_v13  ;;  %v5076_v22 = vsel %vm4131_vm9, %v5075_v15, %v5074_v46 }
 0x451   : > { %6522 = vmatmul.mubr.f32.vlgmr.msra.gmra.mxu1 %v9076_v13  ;;  %6541 = vmatprep.subr.mxu1 %v8968_v55  ;;  %v5080_v3 = vsel %vm4116_vm4, %v5079_v63, %v5078_v38  ;;  %v5095_v6 = vsel %vm3559_vm0, %v5076_v22, 0  ;;  %v5087_v37 = vrot.slane %v8960_v4, 2  ;;  %v5089_v60 = vrot.slane %v8948_v26, 1 }
 0x452   : > { %6542 = vmatpush3.msra.mxu1 %v8968_v55  ;;  %v5082_v39 = vsel %vm4119_vm5, %v5081_v2, %v5080_v3  ;;  %v5171_v59 = vsub.f32 %v9073_v44, %v5170_v12  ;;  %v5180_v56 = vand.u32 4294901760, %v5179_v24  ;;  %v9098_v47 = vand.u32 4294901760, %v5095_v6 }
 0x453   : > { %6543 = vmatprep.subr.mxu1 %v8971_v58  ;;  %v5084_v17 = vsel %vm4122_vm6, %v5083_v1, %v5082_v39 }
 0x454   : > { %6544 = vmatpush3.msra.mxu1 %v8971_v58  ;;  %v5086_v36 = vsel %vm4125_vm7, %v5085_v23, %v5084_v17  ;;  %v5172_v41 = vand.u32 4294901760, %v5171_v59  ;;  %v5181_v51 = vsub.f32 %v5179_v24, %v5180_v56  ;;  %v5189_v42 = vsub.f32 %v5095_v6, %v9098_v47  ;;  %6524 = vmatprep.mubr.f32.mxu1 %v9098_v47  ;;  %v4999_v23 = vld [vmem:[#allocation2] sm:$0xff]  ;;  %v5001_v17 = vld [vmem:[#allocation2 + $0x10] sm:$0xff] }
 0x455   : > { %v5088_v26 = vsel %vm4128_vm8, %v5087_v37, %v5086_v36  ;;  %6545 = vmatprep.subr.mxu1 %v8974_v40  ;;  %v5002_v37 = vld [vmem:[#allocation2 + $0x18] sm:$0xff] }
 0x456   : > { %v5090_v4 = vsel %vm4131_vm9, %v5089_v60, %v5088_v26  ;;  %6546 = vmatpush3.msra.mxu1 %v8974_v40  ;;  %6507 = vmatprep.mubr.f32.mxu0 %v5172_v41  ;;  %v5182_v16 = vand.u32 4294901760, %v5181_v51  ;;  %v5190_v14 = vand.u32 4294901760, %v5189_v42 }
 0x457   : > { %v5097_v19 = vsel %vm3559_vm0, %v5090_v4, 0  ;;  %6547 = vmatprep.subr.mxu1 %v8977_v20 }
 0x458   : > { %v5198_v61 = vand.u32 4294901760, %v5097_v19  ;;  %6548 = vmatpush3.msra.mxu1 %v8977_v20  ;;  %6508 = vmatmul.mubr.f32.vlgmr.msra.gmra.mxu0 %v5182_v16  ;;  %v5191_v62 = vsub.f32 %v5189_v42, %v5190_v14 }
 0x459   : > { %6569 = vmatprep.subr.mxu1 %v8968_v55  ;;  %6528 = vmatpush3.msra.mxu0 %v8986_v54 }
 0x45a   : > { %v5199_v9 = vsub.f32 %v5097_v19, %v5198_v61  ;;  %6525 = vmatmul.mubr.f32.gmra.mxu1 %v5198_v61  ;;  %6529 = vmatprep.subr.mxu0 %v8990_v57  ;;  %v5192_v7 = vand.u32 4294901760, %v5191_v62 }
 0x45b   : > { %6549 = vmatprep.mubr.f32.mxu1 %v5170_v12  ;;  %6530 = vmatpush3.msra.mxu0 %v8990_v57 }
 0x45c   : > { %v5200_v48 = vand.u32 4294901760, %v5199_v9  ;;  %6510 = vmatprep.mubr.f32.mxu0 %v5192_v7  ;;  %6531 = vmatprep.subr.mxu0 %v8994_v35 }
 0x45d   : > { %6532 = vmatpush3.msra.mxu0 %v8994_v35 }
 0x45e   : > { %v5201_v33 = vsub.f32 %v5199_v9, %v5200_v48  ;;  %6550 = vmatmul.mubr.f32.vlgmr.msra.gmra.mxu1 %v5180_v56  ;;  %6533 = vmatprep.subr.mxu0 %v8998_v31 }
 0x45f   : > { %6570 = vmatpush3.msra.mxu1 %v8968_v55  ;;  %6534 = vmatpush3.msra.mxu0 %v8998_v31 }
 0x460   : > { %v5202_v54 = vand.u32 4294901760, %v5201_v33  ;;  %6571 = vmatprep.subr.mxu1 %v8971_v58  ;;  %6555 = vmatprep.subr.mxu0 %v9007_v8 }
 0x461   : > { %6552 = vmatprep.mubr.f32.mxu1 %v5190_v14  ;;  %6572 = vmatpush3.msra.mxu1 %v8971_v58 }
 0x462   : > { %6511 = vmatmul.mubr.f32.gmra.mxu0 %v5202_v54  ;;  %6553 = vmatmul.mubr.f32.gmra.mxu1 %v5200_v48 }
 0x463   : > { %6535 = vmatprep.mubr.f32.mxu0 %v9073_v44  ;;  %6573 = vmatprep.subr.mxu1 %v8974_v40 }
 0x464   : > { %6577 = vmatprep.mubr.f32.mxu1 %v9063_v53  ;;  %6574 = vmatpush3.msra.mxu1 %v8974_v40 }
 0x465   : > { %6575 = vmatprep.subr.mxu1 %v8977_v20 }
 0x466   : > { %6536 = vmatmul.mubr.f32.vlgmr.msra.gmra.mxu0 %v5179_v24  ;;  %6576 = vmatpush3.msra.mxu1 %v8977_v20 }
 0x467   : > { %6556 = vmatpush3.msra.mxu0 %v9007_v8  ;;  %6538 = vmatprep.mubr.f32.mxu0 %v5189_v42 }
 0x468   : > { %6557 = vmatprep.subr.mxu0 %v9011_v11  ;;  %6578 = vmatmul.mubr.f32.vlgmr.msra.gmra.mxu1 %v9076_v13 }
 0x469   : > { %6558 = vmatpush3.msra.mxu0 %v9011_v11  ;;  %6580 = vmatprep.mubr.f32.mxu1 %v9098_v47 }
 0x46a   : > { %6559 = vmatprep.subr.mxu0 %v9014_v18  ;;  %6539 = vmatmul.mubr.f32.gmra.mxu0 %v5199_v9 }
 0x46b   : > { %6560 = vmatpush3.msra.mxu0 %v9014_v18  ;;  %6563 = vmatprep.mubr.f32.mxu0 %v9063_v53 }
 0x46c   : > { %6561 = vmatprep.subr.mxu0 %v9017_v45  ;;  %6581 = vmatmul.mubr.f32.gmra.mxu1 %v5198_v61 }
 0x46d   : > { %6562 = vmatpush3.msra.mxu0 %v9017_v45 }
 0x46e   : > { %6564 = vmatmul.mubr.f32.vlgmr.msra.gmra.mxu0 %v9076_v13 }
 0x46f   : > { %6566 = vmatprep.mubr.f32.mxu0 %v9098_v47 }
 0x472   : > { %6567 = vmatmul.mubr.f32.gmra.mxu0 %v5198_v61 }
 0x511   : > { %v6523_v55 = vpop.f32.mrf.mxu1 }
 0x513   : > { %v5295_v58 = vpop.f32.mrf.mxu1 }
 0x518   : > { %v6509_v40 = vpop.f32.mrf.mxu0 }
 0x519   : > { %v5302_v45 = vadd.f32 %v6523_v55, %v6509_v40 }
 0x51a   : > { %v6526_v20 = vpop.f32.mrf.mxu1  ;;  %v5174_v35 = vpop.f32.mrf.mxu0 }
 0x51b   : > { %v5296_v27 = vadd.f32 %v5295_v58, %v5174_v35 }
 0x51c   : > { %v5307_v57 = vpop.f32.mrf.mxu1 }
 0x51e   : > { %v6551_v31 = vpop.f32.mrf.mxu1 }
 0x520   : > { %v5491_v8 = vpop.f32.mrf.mxu1 }
 0x522   : > { %v6512_v11 = vpop.f32.mrf.mxu0  ;;  %v6554_v18 = vpop.f32.mrf.mxu1 }
 0x523   : > { %v5314_v5 = vadd.f32 %v6526_v20, %v6512_v11 }
 0x524   : > { %v5194_v43 = vpop.f32.mrf.mxu0  ;;  %v5507_v25 = vpop.f32.mrf.mxu1 }
 0x525   : > { %v5308_v49 = vadd.f32 %v5307_v57, %v5194_v43 }
 0x526   : > { %v6537_v10 = vpop.f32.mrf.mxu0 }
 0x527   : > { %v5401_v52 = vadd.f32 %v6537_v10, %v5302_v45 }
 0x528   : > { %v5393_v30 = vpop.f32.mrf.mxu0  ;;  %v6579_v29 = vpop.f32.mrf.mxu1 }
 0x529   : > { %v5394_v53 = vadd.f32 %v5393_v30, %v5296_v27  ;;  %v5500_v15 = vadd.f32 %v6551_v31, %v5401_v52 }
 0x52a   : > { %v6540_v0 = vpop.f32.mrf.mxu0  ;;  %v5691_v34 = vpop.f32.mrf.mxu1 }
 0x52b   : > { %v5415_v32 = vadd.f32 %v6540_v0, %v5314_v5  ;;  %v5492_v63 = vadd.f32 %v5491_v8, %v5394_v53 }
 0x52c   : > { %v5407_v28 = vpop.f32.mrf.mxu0  ;;  %v6582_v24 = vpop.f32.mrf.mxu1 }
 0x52d   : > { %v5408_v44 = vadd.f32 %v5407_v28, %v5308_v49  ;;  %v5516_v46 = vadd.f32 %v6554_v18, %v5415_v32 }
 0x52e   : > { %v6565_v21 = vpop.f32.mrf.mxu0  ;;  %v5703_v36 = vpop.f32.mrf.mxu1 }
 0x52f   : > { %v5605_v13 = vadd.f32 %v6565_v21, %v5500_v15  ;;  %v5508_v22 = vadd.f32 %v5507_v25, %v5408_v44 }
 0x530   : > { %v5598_v2 = vpop.f32.mrf.mxu0 }
 0x531   : > { %v5698_v38 = vadd.f32 %v6579_v29, %v5605_v13  ;;  %v5599_v1 = vadd.f32 %v5598_v2, %v5492_v63 }
 0x532   : > { %v6568_v12 = vpop.f32.mrf.mxu0 }
 0x533   : > { %v5714_v3 = vadd.f32 %v5698_v38, %v5000_v50  ;;  %v5692_v6 = vadd.f32 %v5691_v34, %v5599_v1  ;;  %v5617_v39 = vadd.f32 %v6568_v12, %v5516_v46 }
 0x534   : > { %v5610_v60 = vpop.f32.mrf.mxu0 }
 0x535   : > { %5718 = vst.msk [vmem:[#allocation2 + $0x8] sm:$0xff] %vm3559_vm0, %v5714_v3  ;;  %v5713_v59 = vadd.f32 %v5692_v6, %v4999_v23  ;;  %v5710_v56 = vadd.f32 %v6582_v24, %v5617_v39  ;;  %v5611_v47 = vadd.f32 %v5610_v60, %v5508_v22 }
 0x537   : > { %5717 = vst.msk [vmem:[#allocation2] sm:$0xff] %vm3559_vm0, %v5713_v59  ;;  %v5716_v41 = vadd.f32 %v5710_v56, %v5002_v37  ;;  %v5704_v51 = vadd.f32 %v5703_v36, %v5611_v47  ;;  %5724 = sbr.rel (%p5948_p9) target bundleno = 1350 (0x546), region = 60 }
 0x539   : > { %5720 = vst.msk [vmem:[#allocation2 + $0x18] sm:$0xff] %vm3559_vm0, %v5716_v41  ;;  %v5715_v42 = vadd.f32 %v5704_v51, %v5001_v17 }
 0x53b   : > { %5719 = vst.msk [vmem:[#allocation2 + $0x10] sm:$0xff] %vm3559_vm0, %v5715_v42 }
 0x53c   : > { %v5949_v4 = vld [vmem:[%s9180_s7] ss:$0 sm:$0xff]  ;;  %v5726_v16 = vld [vmem:[#allocation2 + $0x8] sm:$0xff] }
 0x53d   : > { %v5737_v19 = vadd.f32 %v5949_v4, %v5726_v16 }
 0x53e   : > { %v5725_v26 = vld [vmem:[#allocation2] sm:$0xff] }
 0x53f   : > { %v5736_v14 = vadd.f32 %v5949_v4, %v5725_v26  ;;  %5741 = vst.msk [vmem:[%s7094_s21 + $0x8] sm:$0xff] %vm3559_vm0, %v5737_v19 }
 0x540   : > { %v5728_v62 = vld [vmem:[#allocation2 + $0x18] sm:$0xff] }
 0x541   : > { %v5739_v7 = vadd.f32 %v5949_v4, %v5728_v62  ;;  %5740 = vst.msk [vmem:[%s7094_s21] sm:$0xff] %vm3559_vm0, %v5736_v14 }
 0x542   : > { %v5727_v61 = vld [vmem:[#allocation2 + $0x10] sm:$0xff] }
 0x543   : > { %v5738_v9 = vadd.f32 %v5949_v4, %v5727_v61  ;;  %5743 = vst.msk [vmem:[%s7094_s21 + $0x18] sm:$0xff] %vm3559_vm0, %v5739_v7 }
 0x545   : > { %5742 = vst.msk [vmem:[%s7094_s21 + $0x10] sm:$0xff] %vm3559_vm0, %v5738_v9 }
 0x546 PF: > { %s18_s9 = sadd.s32 1, %s6958_s9   ;;  %s9341_s27 = smov %s6950_s29 }
 0x547   : > { %p15_p10 = scmp.ge.s32.totalorder %s18_s9, 6   ;;  %s9342_s28 = smov %s6954_s30 }
 0x548   : > { %s9343_s29 = smov %s9346_s10  ;;  %s9344_s30 = smov %s9350_s11 }
 0x549   :  { %17 = sbr.rel (!%p15_p10) target bundleno = 3 (0x3), region = 105 }

</bundles_post_ra>
